<compile_context>
chip_gen: v6e
topology: v6e:2x2x1
jax: 0.10.0
libtpu: 0.0.40
codegen_flags: <defaults>
</compile_context>

<pallas_src>
import numpy as np

import jax
import jax.numpy as jnp
from jax import lax
from jax.experimental import pallas as pl
from jax.experimental.pallas import tpu as pltpu


# ----------------------------------------------------------------------------
# Static layout geometry (28x28 input, padding=4 conv1 => canonical LeNet dims)
# ----------------------------------------------------------------------------
_PAD_HW = 36                 # 28 + 2*4 (conv1 zero padding)
_P0 = 1408                   # padded flat input length >= 4*36+4 + 32*36 = 1300
_L1 = 32 * _PAD_HW           # conv1 out, flat, row width 36 (valid 32x32) = 1152
_M1 = 1112                   # pool1 pre-max length (>= 2*15*36+2*15+1 = 1111)
_W1 = 16                     # pooled1 row width
_P1 = 264                    # pooled1 flat length >= 4*16+4 + 12*16 = 260
_L2 = 12 * _W1               # conv2 out, flat, row width 16 (valid 12x12) = 192
_M2 = 172                    # pool2 pre-max length (>= 2*5*16+2*5+1 = 171)
_W2 = 6                      # pooled2 row width
_P2 = 40                     # pooled2 flat length >= 4*6+4 + 2*6 = 40
_L3 = 2 * _W2                # conv3 out, flat, row width 6 (valid 2x2) = 12
_FC_COLS = (0, 1, 6, 7)      # valid conv3 columns, in PyTorch flatten (y, x) order


def _pool_selector(src_row_w, dst_row_w, out_hw, src_len, dst_len):
    """0/1 matrix: S[2y*src_row_w + 2x, y*dst_row_w + x] = 1."""
    s = np.zeros((src_len, dst_len), np.float32)
    for y in range(out_hw):
        for x in range(out_hw):
            s[2 * y * src_row_w + 2 * x, y * dst_row_w + x] = 1.0
    return s


_S1_NP = _pool_selector(_PAD_HW, _W1, 16, _M1, _P1)   # (1112, 264)
_S2_NP = _pool_selector(_W1, _W2, 6, _M2, _P2)        # (172, 40)


# ----------------------------------------------------------------------------
# The fused kernel (one grid step == one image)
# ----------------------------------------------------------------------------
def _lenet5_kernel(x_ref, w1_ref, b1_ref, s1_ref, w2_ref, b2_ref, s2_ref,
                   w3_ref, b3_ref, wf1_ref, bf1_ref, wf2_ref, bf2_ref, o_ref):
    f32 = jnp.float32

    def conv_tanh(a, w, b, row_w, out_len):
        # a: (Cin, P) flattened activation with row width `row_w`.
        # Build the 5x5 shifted-window patch matrix via sublane concat of
        # static lane slices, then one lane-dense MXU matmul.
        cols = [a[:, kh * row_w + kw: kh * row_w + kw + out_len]
                for kh in range(5) for kw in range(5)]
        patches = jnp.concatenate(cols, axis=0)               # (25*Cin, out_len)
        acc = jnp.dot(w, patches, preferred_element_type=f32) # (Cout, out_len)
        return jnp.tanh(acc + b)

    def pool2x2(a, row_w, sel, m_len):
        # 2x2/stride-2 max pool: VPU max of the 4 window taps, then a 0/1
        # selection matmul that re-compacts to a dense flat layout.
        m = jnp.maximum(
            jnp.maximum(a[:, 0:m_len], a[:, 1:m_len + 1]),
            jnp.maximum(a[:, row_w:row_w + m_len],
                        a[:, row_w + 1:row_w + 1 + m_len]))
        return jnp.dot(m, sel, preferred_element_type=f32)

    a = x_ref[0]                                                    # (1, 1408)
    a = conv_tanh(a, w1_ref[...], b1_ref[...], _PAD_HW, _L1)        # (6, 1152)
    a = pool2x2(a, _PAD_HW, s1_ref[...], _M1)                       # (6, 264)
    a = conv_tanh(a, w2_ref[...], b2_ref[...], _W1, _L2)            # (16, 192)
    a = pool2x2(a, _W1, s2_ref[...], _M2)                           # (16, 40)
    a = conv_tanh(a, w3_ref[...], b3_ref[...], _W2, _L3)            # (120, 12)

    # fc1: contract over (channel, valid spatial) as 4 accumulated matvecs.
    h = bf1_ref[...]                                                # (84, 1)
    for t, col in enumerate(_FC_COLS):
        h = h + jnp.dot(wf1_ref[t], a[:, col:col + 1],
                        preferred_element_type=f32)
    h = jnp.tanh(h)                                                 # (84, 1)
    o_ref[0] = jnp.dot(wf2_ref[...], h,
                       preferred_element_type=f32) + bf2_ref[...]   # (10, 1)


# ----------------------------------------------------------------------------
# Forward wrapper (only cheap weight-layout prep + zero padding outside kernel)
# ----------------------------------------------------------------------------
def lenet5_forward(params, x):
    n = x.shape[0]

    # Weight layout prep (tiny, weights only; patch order is (kh, kw, cin)).
    w1 = params["conv1_w"].reshape(6, 25)
    w2 = params["conv2_w"].transpose(0, 2, 3, 1).reshape(16, 25 * 6)
    w3 = params["conv3_w"].transpose(0, 2, 3, 1).reshape(120, 25 * 16)
    b1 = params["conv1_b"].reshape(6, 1)
    b2 = params["conv2_b"].reshape(16, 1)
    b3 = params["conv3_b"].reshape(120, 1)
    # fc1 weight regrouped per valid conv3 column t = y*2 + x (flatten = c*4+t).
    wf1 = jnp.stack([params["fc1_w"][:, t::4] for t in range(4)], axis=0)
    bf1 = params["fc1_b"].reshape(84, 1)
    wf2 = params["fc2_w"]
    bf2 = params["fc2_b"].reshape(10, 1)
    s1 = jnp.asarray(_S1_NP)
    s2 = jnp.asarray(_S2_NP)

    # Input prep: conv1 zero-padding, flatten spatial, pad lane dim (zeros in
    # the slack are never selected as valid outputs).
    xp = jnp.pad(x, ((0, 0), (0, 0), (4, 4), (4, 4)))               # (n,1,36,36)
    xf = xp.reshape(n, 1, _PAD_HW * _PAD_HW)
    xf = jnp.pad(xf, ((0, 0), (0, 0), (0, _P0 - _PAD_HW * _PAD_HW)))  # (n,1,1408)

    def full(arr):
        return pl.BlockSpec(arr.shape, lambda i, _nd=arr.ndim: (0,) * _nd)

    in_specs = [
        pl.BlockSpec((1, 1, _P0), lambda i: (i, 0, 0)),   # per-image input
        full(w1), full(b1), full(s1),
        full(w2), full(b2), full(s2),
        full(w3), full(b3),
        full(wf1), full(bf1), full(wf2), full(bf2),
    ]
    out_specs = pl.BlockSpec((1, 10, 1), lambda i: (i, 0, 0))
    out_shape = jax.ShapeDtypeStruct((n, 10, 1), jnp.float32)

    # Advisory cost estimate for the XLA scheduler.
    macs = (6 * 25 * _L1 + 6 * _M1 * _P1 + 16 * 150 * _L2 + 16 * _M2 * _P2
            + 120 * 400 * _L3 + 4 * 84 * 120 + 10 * 84)
    tanh_count = 6 * _L1 + 16 * _L2 + 120 * _L3 + 84
    weight_bytes = 4 * sum(int(a.size) for a in
                           (w1, b1, s1, w2, b2, s2, w3, b3, wf1, bf1, wf2, bf2))
    cost = pl.CostEstimate(flops=2 * macs * n,
                           transcendentals=tanh_count * n,
                           bytes_accessed=weight_bytes + 4 * (n * _P0 + n * 10))

    out = pl.pallas_call(
        _lenet5_kernel,
        out_shape=out_shape,
        grid=(n,),
        in_specs=in_specs,
        out_specs=out_specs,
        compiler_params=pltpu.CompilerParams(
            dimension_semantics=("parallel",)),
        cost_estimate=cost,
    )(xf, w1, b1, s1, w2, b2, s2, w3, b3, wf1, bf1, wf2, bf2)

    return out.reshape(n, 10)


# ----------------------------------------------------------------------------
# Pure-JAX reference (for a loose numerical check) and param init
# ----------------------------------------------------------------------------
def _reference_forward(params, x):
    dn = ("NCHW", "OIHW", "NCHW")
    hp = lax.Precision.HIGHEST

    def conv(h, w, b, pad):
        y = lax.conv_general_dilated(h, w, (1, 1), pad, dimension_numbers=dn,
                                     precision=hp)
        return jnp.tanh(y + b[None, :, None, None])

    def pool(h):
        return lax.reduce_window(h, -jnp.inf, lax.max,
                                 (1, 1, 2, 2), (1, 1, 2, 2), "VALID")

    h = pool(conv(x, params["conv1_w"], params["conv1_b"], ((4, 4), (4, 4))))
    h = pool(conv(h, params["conv2_w"], params["conv2_b"], "VALID"))
    h = conv(h, params["conv3_w"], params["conv3_b"], "VALID")
    h = h.reshape(h.shape[0], -1)
    h = jnp.tanh(h @ params["fc1_w"].T + params["fc1_b"])
    return h @ params["fc2_w"].T + params["fc2_b"]


def init_params(key):
    def init(k, shape, scale=0.1):
        return scale * jax.random.normal(k, shape, dtype=jnp.float32)

    ks = jax.random.split(key, 10)
    return {
        "conv1_w": init(ks[0], (6, 1, 5, 5)),
        "conv1_b": init(ks[1], (6,)),
        "conv2_w": init(ks[2], (16, 6, 5, 5)),
        "conv2_b": init(ks[3], (16,)),
        "conv3_w": init(ks[4], (120, 16, 5, 5)),
        "conv3_b": init(ks[5], (120,)),
        "fc1_w": init(ks[6], (84, 480)),     # PyTorch Linear: (out, in)
        "fc1_b": init(ks[7], (84,)),
        "fc2_w": init(ks[8], (10, 84)),
        "fc2_b": init(ks[9], (10,)),
    }


if __name__ == "__main__":
    key = jax.random.PRNGKey(0)
    pkey, xkey = jax.random.split(key)
    params = init_params(pkey)
    # LeNet5 geometry (fc1 expects 480 = 120*2*2) implies 28x28 single-channel input.
    x = jax.random.normal(xkey, (2, 1, 28, 28), dtype=jnp.float32)

    out = jax.jit(lenet5_forward)(params, x)
    out = jax.block_until_ready(out)
    assert out.shape == (2, 10), out.shape
    assert out.dtype == jnp.float32
    assert bool(jnp.all(jnp.isfinite(out)))

    ref = jax.jit(_reference_forward)(params, x)
    ref = jax.block_until_ready(ref)
    assert bool(jnp.allclose(out, ref, atol=2e-2, rtol=2e-2)), (
        float(jnp.max(jnp.abs(out - ref))))

    print("KERNEL_OK")
</pallas_src>

<mosaic_0001>
module attributes {stable_mosaic.version = 11 : i64} {
  func.func @_lenet5_kernel(%arg0: i32, %arg1: memref<1x1x1408xf32, #tpu.memory_space<vmem>>, %arg2: memref<6x25xf32, #tpu.memory_space<vmem>>, %arg3: memref<6x1xf32, #tpu.memory_space<vmem>>, %arg4: memref<1112x264xf32, #tpu.memory_space<vmem>>, %arg5: memref<16x150xf32, #tpu.memory_space<vmem>>, %arg6: memref<16x1xf32, #tpu.memory_space<vmem>>, %arg7: memref<172x40xf32, #tpu.memory_space<vmem>>, %arg8: memref<120x400xf32, #tpu.memory_space<vmem>>, %arg9: memref<120x1xf32, #tpu.memory_space<vmem>>, %arg10: memref<4x84x120xf32, #tpu.memory_space<vmem>>, %arg11: memref<84x1xf32, #tpu.memory_space<vmem>>, %arg12: memref<10x84xf32, #tpu.memory_space<vmem>>, %arg13: memref<10x1xf32, #tpu.memory_space<vmem>>, %arg14: memref<1x10x1xf32, #tpu.memory_space<vmem>>) attributes {dimension_semantics = [#tpu.dimension_semantics<parallel>], iteration_bounds = array<i64: 2>, scalar_prefetch = 0 : i64, scratch_operands = 0 : i64, tpu.core_type = #tpu.core_type<tc>, window_params = [{transform_indices = @transform_0, window_bounds = array<i64: 1, 1, 1408>}, {pipeline_mode = #tpu.pipeline_mode<synchronous>, transform_indices = @transform_1, window_bounds = array<i64: 6, 25>}, {pipeline_mode = #tpu.pipeline_mode<synchronous>, transform_indices = @transform_2, window_bounds = array<i64: 6, 1>}, {pipeline_mode = #tpu.pipeline_mode<synchronous>, transform_indices = @transform_3, window_bounds = array<i64: 1112, 264>}, {pipeline_mode = #tpu.pipeline_mode<synchronous>, transform_indices = @transform_4, window_bounds = array<i64: 16, 150>}, {pipeline_mode = #tpu.pipeline_mode<synchronous>, transform_indices = @transform_5, window_bounds = array<i64: 16, 1>}, {pipeline_mode = #tpu.pipeline_mode<synchronous>, transform_indices = @transform_6, window_bounds = array<i64: 172, 40>}, {pipeline_mode = #tpu.pipeline_mode<synchronous>, transform_indices = @transform_7, window_bounds = array<i64: 120, 400>}, {pipeline_mode = #tpu.pipeline_mode<synchronous>, transform_indices = @transform_8, window_bounds = array<i64: 120, 1>}, {pipeline_mode = #tpu.pipeline_mode<synchronous>, transform_indices = @transform_9, window_bounds = array<i64: 4, 84, 120>}, {pipeline_mode = #tpu.pipeline_mode<synchronous>, transform_indices = @transform_10, window_bounds = array<i64: 84, 1>}, {pipeline_mode = #tpu.pipeline_mode<synchronous>, transform_indices = @transform_11, window_bounds = array<i64: 10, 84>}, {pipeline_mode = #tpu.pipeline_mode<synchronous>, transform_indices = @transform_12, window_bounds = array<i64: 10, 1>}, {transform_indices = @transform_13, window_bounds = array<i64: 1, 10, 1>}]} {
    %c0 = arith.constant 0 : index
    %c0_0 = arith.constant 0 : index
    %c0_1 = arith.constant 0 : index
    %0 = vector.load %arg1[%c0, %c0_0, %c0_1] : memref<1x1x1408xf32, #tpu.memory_space<vmem>>, vector<1x1x1408xf32>
    %1 = vector.shape_cast %0 : vector<1x1x1408xf32> to vector<1x1408xf32>
    %c0_2 = arith.constant 0 : index
    %c0_3 = arith.constant 0 : index
    %2 = vector.load %arg2[%c0_2, %c0_3] : memref<6x25xf32, #tpu.memory_space<vmem>>, vector<6x25xf32>
    %c0_4 = arith.constant 0 : index
    %c0_5 = arith.constant 0 : index
    %3 = vector.load %arg3[%c0_4, %c0_5] : memref<6x1xf32, #tpu.memory_space<vmem>>, vector<6x1xf32>
    %4 = vector.extract_strided_slice %1 {offsets = [0, 0], sizes = [1, 1152], strides = [1, 1]} : vector<1x1408xf32> to vector<1x1152xf32>
    %5 = vector.extract_strided_slice %1 {offsets = [0, 1], sizes = [1, 1152], strides = [1, 1]} : vector<1x1408xf32> to vector<1x1152xf32>
    %6 = vector.extract_strided_slice %1 {offsets = [0, 2], sizes = [1, 1152], strides = [1, 1]} : vector<1x1408xf32> to vector<1x1152xf32>
    %7 = vector.extract_strided_slice %1 {offsets = [0, 3], sizes = [1, 1152], strides = [1, 1]} : vector<1x1408xf32> to vector<1x1152xf32>
    %8 = vector.extract_strided_slice %1 {offsets = [0, 4], sizes = [1, 1152], strides = [1, 1]} : vector<1x1408xf32> to vector<1x1152xf32>
    %9 = vector.extract_strided_slice %1 {offsets = [0, 36], sizes = [1, 1152], strides = [1, 1]} : vector<1x1408xf32> to vector<1x1152xf32>
    %10 = vector.extract_strided_slice %1 {offsets = [0, 37], sizes = [1, 1152], strides = [1, 1]} : vector<1x1408xf32> to vector<1x1152xf32>
    %11 = vector.extract_strided_slice %1 {offsets = [0, 38], sizes = [1, 1152], strides = [1, 1]} : vector<1x1408xf32> to vector<1x1152xf32>
    %12 = vector.extract_strided_slice %1 {offsets = [0, 39], sizes = [1, 1152], strides = [1, 1]} : vector<1x1408xf32> to vector<1x1152xf32>
    %13 = vector.extract_strided_slice %1 {offsets = [0, 40], sizes = [1, 1152], strides = [1, 1]} : vector<1x1408xf32> to vector<1x1152xf32>
    %14 = vector.extract_strided_slice %1 {offsets = [0, 72], sizes = [1, 1152], strides = [1, 1]} : vector<1x1408xf32> to vector<1x1152xf32>
    %15 = vector.extract_strided_slice %1 {offsets = [0, 73], sizes = [1, 1152], strides = [1, 1]} : vector<1x1408xf32> to vector<1x1152xf32>
    %16 = vector.extract_strided_slice %1 {offsets = [0, 74], sizes = [1, 1152], strides = [1, 1]} : vector<1x1408xf32> to vector<1x1152xf32>
    %17 = vector.extract_strided_slice %1 {offsets = [0, 75], sizes = [1, 1152], strides = [1, 1]} : vector<1x1408xf32> to vector<1x1152xf32>
    %18 = vector.extract_strided_slice %1 {offsets = [0, 76], sizes = [1, 1152], strides = [1, 1]} : vector<1x1408xf32> to vector<1x1152xf32>
    %19 = vector.extract_strided_slice %1 {offsets = [0, 108], sizes = [1, 1152], strides = [1, 1]} : vector<1x1408xf32> to vector<1x1152xf32>
    %20 = vector.extract_strided_slice %1 {offsets = [0, 109], sizes = [1, 1152], strides = [1, 1]} : vector<1x1408xf32> to vector<1x1152xf32>
    %21 = vector.extract_strided_slice %1 {offsets = [0, 110], sizes = [1, 1152], strides = [1, 1]} : vector<1x1408xf32> to vector<1x1152xf32>
    %22 = vector.extract_strided_slice %1 {offsets = [0, 111], sizes = [1, 1152], strides = [1, 1]} : vector<1x1408xf32> to vector<1x1152xf32>
    %23 = vector.extract_strided_slice %1 {offsets = [0, 112], sizes = [1, 1152], strides = [1, 1]} : vector<1x1408xf32> to vector<1x1152xf32>
    %24 = vector.extract_strided_slice %1 {offsets = [0, 144], sizes = [1, 1152], strides = [1, 1]} : vector<1x1408xf32> to vector<1x1152xf32>
    %25 = vector.extract_strided_slice %1 {offsets = [0, 145], sizes = [1, 1152], strides = [1, 1]} : vector<1x1408xf32> to vector<1x1152xf32>
    %26 = vector.extract_strided_slice %1 {offsets = [0, 146], sizes = [1, 1152], strides = [1, 1]} : vector<1x1408xf32> to vector<1x1152xf32>
    %27 = vector.extract_strided_slice %1 {offsets = [0, 147], sizes = [1, 1152], strides = [1, 1]} : vector<1x1408xf32> to vector<1x1152xf32>
    %28 = vector.extract_strided_slice %1 {offsets = [0, 148], sizes = [1, 1152], strides = [1, 1]} : vector<1x1408xf32> to vector<1x1152xf32>
    %29 = tpu.concatenate %4, %5, %6, %7, %8, %9, %10, %11, %12, %13, %14, %15, %16, %17, %18, %19 in 0 : vector<1x1152xf32>, vector<1x1152xf32>, vector<1x1152xf32>, vector<1x1152xf32>, vector<1x1152xf32>, vector<1x1152xf32>, vector<1x1152xf32>, vector<1x1152xf32>, vector<1x1152xf32>, vector<1x1152xf32>, vector<1x1152xf32>, vector<1x1152xf32>, vector<1x1152xf32>, vector<1x1152xf32>, vector<1x1152xf32>, vector<1x1152xf32> -> vector<16x1152xf32>
    %30 = tpu.concatenate %20, %21, %22, %23, %24, %25, %26, %27, %28 in 0 : vector<1x1152xf32>, vector<1x1152xf32>, vector<1x1152xf32>, vector<1x1152xf32>, vector<1x1152xf32>, vector<1x1152xf32>, vector<1x1152xf32>, vector<1x1152xf32>, vector<1x1152xf32> -> vector<9x1152xf32>
    %31 = tpu.concatenate %29, %30 in 0 : vector<16x1152xf32>, vector<9x1152xf32> -> vector<25x1152xf32>
    %cst = arith.constant dense<0.000000e+00> : vector<6x1152xf32>
    %32 = tpu.matmul %2, %31, %cst {dimension_numbers = #tpu.dot_dimension_numbers<[1], [0], [0], [1], [0, 0, 1, 1], [], []>} : vector<6x25xf32>, vector<25x1152xf32>, vector<6x1152xf32> -> vector<6x1152xf32>
    %33 = vector.broadcast %3 : vector<6x1xf32> to vector<6x1152xf32>
    %34 = arith.addf %32, %33 : vector<6x1152xf32>
    %35 = math.tanh %34 : vector<6x1152xf32>
    %c0_6 = arith.constant 0 : index
    %c0_7 = arith.constant 0 : index
    %36 = vector.load %arg4[%c0_6, %c0_7] : memref<1112x264xf32, #tpu.memory_space<vmem>>, vector<1112x264xf32>
    %37 = vector.extract_strided_slice %35 {offsets = [0, 0], sizes = [6, 1112], strides = [1, 1]} : vector<6x1152xf32> to vector<6x1112xf32>
    %38 = vector.extract_strided_slice %35 {offsets = [0, 1], sizes = [6, 1112], strides = [1, 1]} : vector<6x1152xf32> to vector<6x1112xf32>
    %39 = arith.maximumf %37, %38 : vector<6x1112xf32>
    %40 = vector.extract_strided_slice %35 {offsets = [0, 36], sizes = [6, 1112], strides = [1, 1]} : vector<6x1152xf32> to vector<6x1112xf32>
    %41 = vector.extract_strided_slice %35 {offsets = [0, 37], sizes = [6, 1112], strides = [1, 1]} : vector<6x1152xf32> to vector<6x1112xf32>
    %42 = arith.maximumf %40, %41 : vector<6x1112xf32>
    %43 = arith.maximumf %39, %42 : vector<6x1112xf32>
    %cst_8 = arith.constant dense<0.000000e+00> : vector<6x264xf32>
    %44 = tpu.matmul %43, %36, %cst_8 {dimension_numbers = #tpu.dot_dimension_numbers<[1], [0], [0], [1], [0, 0, 1, 1], [], []>} : vector<6x1112xf32>, vector<1112x264xf32>, vector<6x264xf32> -> vector<6x264xf32>
    %c0_9 = arith.constant 0 : index
    %c0_10 = arith.constant 0 : index
    %45 = vector.load %arg5[%c0_9, %c0_10] : memref<16x150xf32, #tpu.memory_space<vmem>>, vector<16x150xf32>
    %c0_11 = arith.constant 0 : index
    %c0_12 = arith.constant 0 : index
    %46 = vector.load %arg6[%c0_11, %c0_12] : memref<16x1xf32, #tpu.memory_space<vmem>>, vector<16x1xf32>
    %47 = vector.extract_strided_slice %44 {offsets = [0, 0], sizes = [6, 192], strides = [1, 1]} : vector<6x264xf32> to vector<6x192xf32>
    %48 = vector.extract_strided_slice %44 {offsets = [0, 1], sizes = [6, 192], strides = [1, 1]} : vector<6x264xf32> to vector<6x192xf32>
    %49 = vector.extract_strided_slice %44 {offsets = [0, 2], sizes = [6, 192], strides = [1, 1]} : vector<6x264xf32> to vector<6x192xf32>
    %50 = vector.extract_strided_slice %44 {offsets = [0, 3], sizes = [6, 192], strides = [1, 1]} : vector<6x264xf32> to vector<6x192xf32>
    %51 = vector.extract_strided_slice %44 {offsets = [0, 4], sizes = [6, 192], strides = [1, 1]} : vector<6x264xf32> to vector<6x192xf32>
    %52 = vector.extract_strided_slice %44 {offsets = [0, 16], sizes = [6, 192], strides = [1, 1]} : vector<6x264xf32> to vector<6x192xf32>
    %53 = vector.extract_strided_slice %44 {offsets = [0, 17], sizes = [6, 192], strides = [1, 1]} : vector<6x264xf32> to vector<6x192xf32>
    %54 = vector.extract_strided_slice %44 {offsets = [0, 18], sizes = [6, 192], strides = [1, 1]} : vector<6x264xf32> to vector<6x192xf32>
    %55 = vector.extract_strided_slice %44 {offsets = [0, 19], sizes = [6, 192], strides = [1, 1]} : vector<6x264xf32> to vector<6x192xf32>
    %56 = vector.extract_strided_slice %44 {offsets = [0, 20], sizes = [6, 192], strides = [1, 1]} : vector<6x264xf32> to vector<6x192xf32>
    %57 = vector.extract_strided_slice %44 {offsets = [0, 32], sizes = [6, 192], strides = [1, 1]} : vector<6x264xf32> to vector<6x192xf32>
    %58 = vector.extract_strided_slice %44 {offsets = [0, 33], sizes = [6, 192], strides = [1, 1]} : vector<6x264xf32> to vector<6x192xf32>
    %59 = vector.extract_strided_slice %44 {offsets = [0, 34], sizes = [6, 192], strides = [1, 1]} : vector<6x264xf32> to vector<6x192xf32>
    %60 = vector.extract_strided_slice %44 {offsets = [0, 35], sizes = [6, 192], strides = [1, 1]} : vector<6x264xf32> to vector<6x192xf32>
    %61 = vector.extract_strided_slice %44 {offsets = [0, 36], sizes = [6, 192], strides = [1, 1]} : vector<6x264xf32> to vector<6x192xf32>
    %62 = vector.extract_strided_slice %44 {offsets = [0, 48], sizes = [6, 192], strides = [1, 1]} : vector<6x264xf32> to vector<6x192xf32>
    %63 = vector.extract_strided_slice %44 {offsets = [0, 49], sizes = [6, 192], strides = [1, 1]} : vector<6x264xf32> to vector<6x192xf32>
    %64 = vector.extract_strided_slice %44 {offsets = [0, 50], sizes = [6, 192], strides = [1, 1]} : vector<6x264xf32> to vector<6x192xf32>
    %65 = vector.extract_strided_slice %44 {offsets = [0, 51], sizes = [6, 192], strides = [1, 1]} : vector<6x264xf32> to vector<6x192xf32>
    %66 = vector.extract_strided_slice %44 {offsets = [0, 52], sizes = [6, 192], strides = [1, 1]} : vector<6x264xf32> to vector<6x192xf32>
    %67 = vector.extract_strided_slice %44 {offsets = [0, 64], sizes = [6, 192], strides = [1, 1]} : vector<6x264xf32> to vector<6x192xf32>
    %68 = vector.extract_strided_slice %44 {offsets = [0, 65], sizes = [6, 192], strides = [1, 1]} : vector<6x264xf32> to vector<6x192xf32>
    %69 = vector.extract_strided_slice %44 {offsets = [0, 66], sizes = [6, 192], strides = [1, 1]} : vector<6x264xf32> to vector<6x192xf32>
    %70 = vector.extract_strided_slice %44 {offsets = [0, 67], sizes = [6, 192], strides = [1, 1]} : vector<6x264xf32> to vector<6x192xf32>
    %71 = vector.extract_strided_slice %44 {offsets = [0, 68], sizes = [6, 192], strides = [1, 1]} : vector<6x264xf32> to vector<6x192xf32>
    %72 = tpu.concatenate %47, %48, %49, %50, %51, %52, %53, %54, %55, %56, %57, %58, %59, %60, %61, %62 in 0 : vector<6x192xf32>, vector<6x192xf32>, vector<6x192xf32>, vector<6x192xf32>, vector<6x192xf32>, vector<6x192xf32>, vector<6x192xf32>, vector<6x192xf32>, vector<6x192xf32>, vector<6x192xf32>, vector<6x192xf32>, vector<6x192xf32>, vector<6x192xf32>, vector<6x192xf32>, vector<6x192xf32>, vector<6x192xf32> -> vector<96x192xf32>
    %73 = tpu.concatenate %63, %64, %65, %66, %67, %68, %69, %70, %71 in 0 : vector<6x192xf32>, vector<6x192xf32>, vector<6x192xf32>, vector<6x192xf32>, vector<6x192xf32>, vector<6x192xf32>, vector<6x192xf32>, vector<6x192xf32>, vector<6x192xf32> -> vector<54x192xf32>
    %74 = tpu.concatenate %72, %73 in 0 : vector<96x192xf32>, vector<54x192xf32> -> vector<150x192xf32>
    %cst_13 = arith.constant dense<0.000000e+00> : vector<16x192xf32>
    %75 = tpu.matmul %45, %74, %cst_13 {dimension_numbers = #tpu.dot_dimension_numbers<[1], [0], [0], [1], [0, 0, 1, 1], [], []>} : vector<16x150xf32>, vector<150x192xf32>, vector<16x192xf32> -> vector<16x192xf32>
    %76 = vector.broadcast %46 : vector<16x1xf32> to vector<16x192xf32>
    %77 = arith.addf %75, %76 : vector<16x192xf32>
    %78 = math.tanh %77 : vector<16x192xf32>
    %c0_14 = arith.constant 0 : index
    %c0_15 = arith.constant 0 : index
    %79 = vector.load %arg7[%c0_14, %c0_15] : memref<172x40xf32, #tpu.memory_space<vmem>>, vector<172x40xf32>
    %80 = vector.extract_strided_slice %78 {offsets = [0, 0], sizes = [16, 172], strides = [1, 1]} : vector<16x192xf32> to vector<16x172xf32>
    %81 = vector.extract_strided_slice %78 {offsets = [0, 1], sizes = [16, 172], strides = [1, 1]} : vector<16x192xf32> to vector<16x172xf32>
    %82 = arith.maximumf %80, %81 : vector<16x172xf32>
    %83 = vector.extract_strided_slice %78 {offsets = [0, 16], sizes = [16, 172], strides = [1, 1]} : vector<16x192xf32> to vector<16x172xf32>
    %84 = vector.extract_strided_slice %78 {offsets = [0, 17], sizes = [16, 172], strides = [1, 1]} : vector<16x192xf32> to vector<16x172xf32>
    %85 = arith.maximumf %83, %84 : vector<16x172xf32>
    %86 = arith.maximumf %82, %85 : vector<16x172xf32>
    %cst_16 = arith.constant dense<0.000000e+00> : vector<16x40xf32>
    %87 = tpu.matmul %86, %79, %cst_16 {dimension_numbers = #tpu.dot_dimension_numbers<[1], [0], [0], [1], [0, 0, 1, 1], [], []>} : vector<16x172xf32>, vector<172x40xf32>, vector<16x40xf32> -> vector<16x40xf32>
    %c0_17 = arith.constant 0 : index
    %c0_18 = arith.constant 0 : index
    %88 = vector.load %arg8[%c0_17, %c0_18] : memref<120x400xf32, #tpu.memory_space<vmem>>, vector<120x400xf32>
    %c0_19 = arith.constant 0 : index
    %c0_20 = arith.constant 0 : index
    %89 = vector.load %arg9[%c0_19, %c0_20] : memref<120x1xf32, #tpu.memory_space<vmem>>, vector<120x1xf32>
    %90 = vector.extract_strided_slice %87 {offsets = [0, 0], sizes = [16, 12], strides = [1, 1]} : vector<16x40xf32> to vector<16x12xf32>
    %91 = vector.extract_strided_slice %87 {offsets = [0, 1], sizes = [16, 12], strides = [1, 1]} : vector<16x40xf32> to vector<16x12xf32>
    %92 = vector.extract_strided_slice %87 {offsets = [0, 2], sizes = [16, 12], strides = [1, 1]} : vector<16x40xf32> to vector<16x12xf32>
    %93 = vector.extract_strided_slice %87 {offsets = [0, 3], sizes = [16, 12], strides = [1, 1]} : vector<16x40xf32> to vector<16x12xf32>
    %94 = vector.extract_strided_slice %87 {offsets = [0, 4], sizes = [16, 12], strides = [1, 1]} : vector<16x40xf32> to vector<16x12xf32>
    %95 = vector.extract_strided_slice %87 {offsets = [0, 6], sizes = [16, 12], strides = [1, 1]} : vector<16x40xf32> to vector<16x12xf32>
    %96 = vector.extract_strided_slice %87 {offsets = [0, 7], sizes = [16, 12], strides = [1, 1]} : vector<16x40xf32> to vector<16x12xf32>
    %97 = vector.extract_strided_slice %87 {offsets = [0, 8], sizes = [16, 12], strides = [1, 1]} : vector<16x40xf32> to vector<16x12xf32>
    %98 = vector.extract_strided_slice %87 {offsets = [0, 9], sizes = [16, 12], strides = [1, 1]} : vector<16x40xf32> to vector<16x12xf32>
    %99 = vector.extract_strided_slice %87 {offsets = [0, 10], sizes = [16, 12], strides = [1, 1]} : vector<16x40xf32> to vector<16x12xf32>
    %100 = vector.extract_strided_slice %87 {offsets = [0, 12], sizes = [16, 12], strides = [1, 1]} : vector<16x40xf32> to vector<16x12xf32>
    %101 = vector.extract_strided_slice %87 {offsets = [0, 13], sizes = [16, 12], strides = [1, 1]} : vector<16x40xf32> to vector<16x12xf32>
    %102 = vector.extract_strided_slice %87 {offsets = [0, 14], sizes = [16, 12], strides = [1, 1]} : vector<16x40xf32> to vector<16x12xf32>
    %103 = vector.extract_strided_slice %87 {offsets = [0, 15], sizes = [16, 12], strides = [1, 1]} : vector<16x40xf32> to vector<16x12xf32>
    %104 = vector.extract_strided_slice %87 {offsets = [0, 16], sizes = [16, 12], strides = [1, 1]} : vector<16x40xf32> to vector<16x12xf32>
    %105 = vector.extract_strided_slice %87 {offsets = [0, 18], sizes = [16, 12], strides = [1, 1]} : vector<16x40xf32> to vector<16x12xf32>
    %106 = vector.extract_strided_slice %87 {offsets = [0, 19], sizes = [16, 12], strides = [1, 1]} : vector<16x40xf32> to vector<16x12xf32>
    %107 = vector.extract_strided_slice %87 {offsets = [0, 20], sizes = [16, 12], strides = [1, 1]} : vector<16x40xf32> to vector<16x12xf32>
    %108 = vector.extract_strided_slice %87 {offsets = [0, 21], sizes = [16, 12], strides = [1, 1]} : vector<16x40xf32> to vector<16x12xf32>
    %109 = vector.extract_strided_slice %87 {offsets = [0, 22], sizes = [16, 12], strides = [1, 1]} : vector<16x40xf32> to vector<16x12xf32>
    %110 = vector.extract_strided_slice %87 {offsets = [0, 24], sizes = [16, 12], strides = [1, 1]} : vector<16x40xf32> to vector<16x12xf32>
    %111 = vector.extract_strided_slice %87 {offsets = [0, 25], sizes = [16, 12], strides = [1, 1]} : vector<16x40xf32> to vector<16x12xf32>
    %112 = vector.extract_strided_slice %87 {offsets = [0, 26], sizes = [16, 12], strides = [1, 1]} : vector<16x40xf32> to vector<16x12xf32>
    %113 = vector.extract_strided_slice %87 {offsets = [0, 27], sizes = [16, 12], strides = [1, 1]} : vector<16x40xf32> to vector<16x12xf32>
    %114 = vector.extract_strided_slice %87 {offsets = [0, 28], sizes = [16, 12], strides = [1, 1]} : vector<16x40xf32> to vector<16x12xf32>
    %115 = tpu.concatenate %90, %91, %92, %93, %94, %95, %96, %97, %98, %99, %100, %101, %102, %103, %104, %105 in 0 : vector<16x12xf32>, vector<16x12xf32>, vector<16x12xf32>, vector<16x12xf32>, vector<16x12xf32>, vector<16x12xf32>, vector<16x12xf32>, vector<16x12xf32>, vector<16x12xf32>, vector<16x12xf32>, vector<16x12xf32>, vector<16x12xf32>, vector<16x12xf32>, vector<16x12xf32>, vector<16x12xf32>, vector<16x12xf32> -> vector<256x12xf32>
    %116 = tpu.concatenate %106, %107, %108, %109, %110, %111, %112, %113, %114 in 0 : vector<16x12xf32>, vector<16x12xf32>, vector<16x12xf32>, vector<16x12xf32>, vector<16x12xf32>, vector<16x12xf32>, vector<16x12xf32>, vector<16x12xf32>, vector<16x12xf32> -> vector<144x12xf32>
    %117 = tpu.concatenate %115, %116 in 0 : vector<256x12xf32>, vector<144x12xf32> -> vector<400x12xf32>
    %cst_21 = arith.constant dense<0.000000e+00> : vector<120x12xf32>
    %118 = tpu.matmul %88, %117, %cst_21 {dimension_numbers = #tpu.dot_dimension_numbers<[1], [0], [0], [1], [0, 0, 1, 1], [], []>} : vector<120x400xf32>, vector<400x12xf32>, vector<120x12xf32> -> vector<120x12xf32>
    %119 = vector.broadcast %89 : vector<120x1xf32> to vector<120x12xf32>
    %120 = arith.addf %118, %119 : vector<120x12xf32>
    %121 = math.tanh %120 : vector<120x12xf32>
    %c0_22 = arith.constant 0 : index
    %c0_23 = arith.constant 0 : index
    %122 = vector.load %arg11[%c0_22, %c0_23] : memref<84x1xf32, #tpu.memory_space<vmem>>, vector<84x1xf32>
    %c0_24 = arith.constant 0 : index
    %c0_25 = arith.constant 0 : index
    %c0_26 = arith.constant 0 : index
    %123 = vector.load %arg10[%c0_24, %c0_25, %c0_26] : memref<4x84x120xf32, #tpu.memory_space<vmem>>, vector<1x84x120xf32>
    %124 = vector.shape_cast %123 : vector<1x84x120xf32> to vector<84x120xf32>
    %125 = vector.extract_strided_slice %121 {offsets = [0, 0], sizes = [120, 1], strides = [1, 1]} : vector<120x12xf32> to vector<120x1xf32>
    %cst_27 = arith.constant dense<0.000000e+00> : vector<84x1xf32>
    %126 = tpu.matmul %124, %125, %cst_27 {dimension_numbers = #tpu.dot_dimension_numbers<[1], [0], [0], [1], [0, 0, 1, 1], [], []>} : vector<84x120xf32>, vector<120x1xf32>, vector<84x1xf32> -> vector<84x1xf32>
    %127 = arith.addf %122, %126 : vector<84x1xf32>
    %c1 = arith.constant 1 : index
    %c0_28 = arith.constant 0 : index
    %c0_29 = arith.constant 0 : index
    %128 = vector.load %arg10[%c1, %c0_28, %c0_29] : memref<4x84x120xf32, #tpu.memory_space<vmem>>, vector<1x84x120xf32>
    %129 = vector.shape_cast %128 : vector<1x84x120xf32> to vector<84x120xf32>
    %130 = vector.extract_strided_slice %121 {offsets = [0, 1], sizes = [120, 1], strides = [1, 1]} : vector<120x12xf32> to vector<120x1xf32>
    %cst_30 = arith.constant dense<0.000000e+00> : vector<84x1xf32>
    %131 = tpu.matmul %129, %130, %cst_30 {dimension_numbers = #tpu.dot_dimension_numbers<[1], [0], [0], [1], [0, 0, 1, 1], [], []>} : vector<84x120xf32>, vector<120x1xf32>, vector<84x1xf32> -> vector<84x1xf32>
    %132 = arith.addf %127, %131 : vector<84x1xf32>
    %c2 = arith.constant 2 : index
    %c0_31 = arith.constant 0 : index
    %c0_32 = arith.constant 0 : index
    %133 = vector.load %arg10[%c2, %c0_31, %c0_32] : memref<4x84x120xf32, #tpu.memory_space<vmem>>, vector<1x84x120xf32>
    %134 = vector.shape_cast %133 : vector<1x84x120xf32> to vector<84x120xf32>
    %135 = vector.extract_strided_slice %121 {offsets = [0, 6], sizes = [120, 1], strides = [1, 1]} : vector<120x12xf32> to vector<120x1xf32>
    %cst_33 = arith.constant dense<0.000000e+00> : vector<84x1xf32>
    %136 = tpu.matmul %134, %135, %cst_33 {dimension_numbers = #tpu.dot_dimension_numbers<[1], [0], [0], [1], [0, 0, 1, 1], [], []>} : vector<84x120xf32>, vector<120x1xf32>, vector<84x1xf32> -> vector<84x1xf32>
    %137 = arith.addf %132, %136 : vector<84x1xf32>
    %c3 = arith.constant 3 : index
    %c0_34 = arith.constant 0 : index
    %c0_35 = arith.constant 0 : index
    %138 = vector.load %arg10[%c3, %c0_34, %c0_35] : memref<4x84x120xf32, #tpu.memory_space<vmem>>, vector<1x84x120xf32>
    %139 = vector.shape_cast %138 : vector<1x84x120xf32> to vector<84x120xf32>
    %140 = vector.extract_strided_slice %121 {offsets = [0, 7], sizes = [120, 1], strides = [1, 1]} : vector<120x12xf32> to vector<120x1xf32>
    %cst_36 = arith.constant dense<0.000000e+00> : vector<84x1xf32>
    %141 = tpu.matmul %139, %140, %cst_36 {dimension_numbers = #tpu.dot_dimension_numbers<[1], [0], [0], [1], [0, 0, 1, 1], [], []>} : vector<84x120xf32>, vector<120x1xf32>, vector<84x1xf32> -> vector<84x1xf32>
    %142 = arith.addf %137, %141 : vector<84x1xf32>
    %143 = math.tanh %142 : vector<84x1xf32>
    %c0_37 = arith.constant 0 : index
    %c0_38 = arith.constant 0 : index
    %144 = vector.load %arg12[%c0_37, %c0_38] : memref<10x84xf32, #tpu.memory_space<vmem>>, vector<10x84xf32>
    %cst_39 = arith.constant dense<0.000000e+00> : vector<10x1xf32>
    %145 = tpu.matmul %144, %143, %cst_39 {dimension_numbers = #tpu.dot_dimension_numbers<[1], [0], [0], [1], [0, 0, 1, 1], [], []>} : vector<10x84xf32>, vector<84x1xf32>, vector<10x1xf32> -> vector<10x1xf32>
    %c0_40 = arith.constant 0 : index
    %c0_41 = arith.constant 0 : index
    %146 = vector.load %arg13[%c0_40, %c0_41] : memref<10x1xf32, #tpu.memory_space<vmem>>, vector<10x1xf32>
    %147 = arith.addf %145, %146 : vector<10x1xf32>
    %c0_42 = arith.constant 0 : index
    %c0_43 = arith.constant 0 : index
    %c0_44 = arith.constant 0 : index
    %148 = vector.load %arg14[%c0_42, %c0_43, %c0_44] : memref<1x10x1xf32, #tpu.memory_space<vmem>>, vector<1x10x1xf32>
    %149 = vector.shape_cast %148 : vector<1x10x1xf32> to vector<10x1xf32>
    %150 = vector.shape_cast %147 : vector<10x1xf32> to vector<1x10x1xf32>
    tpu.vector_store %arg14[%c0_42, %c0_43, %c0_44], %150 {strides = array<i32>} : memref<1x10x1xf32, #tpu.memory_space<vmem>>, vector<1x10x1xf32>,
    return
  }
  func.func @transform_0(%arg0: i32) -> (i32, i32, i32) {
    %c0_i32 = arith.constant 0 : i32
    %c0_i32_0 = arith.constant 0 : i32
    %c0_i32_1 = arith.constant 0 : i32
    return %arg0, %c0_i32, %c0_i32_0 : i32, i32, i32
  }
  func.func @transform_1(%arg0: i32) -> (i32, i32) {
    %c0_i32 = arith.constant 0 : i32
    %c0_i32_0 = arith.constant 0 : i32
    %c0_i32_1 = arith.constant 0 : i32
    return %c0_i32, %c0_i32_0 : i32, i32
  }
  func.func @transform_2(%arg0: i32) -> (i32, i32) {
    %c0_i32 = arith.constant 0 : i32
    %c0_i32_0 = arith.constant 0 : i32
    %c0_i32_1 = arith.constant 0 : i32
    return %c0_i32, %c0_i32_0 : i32, i32
  }
  func.func @transform_3(%arg0: i32) -> (i32, i32) {
    %c0_i32 = arith.constant 0 : i32
    %c0_i32_0 = arith.constant 0 : i32
    %c0_i32_1 = arith.constant 0 : i32
    return %c0_i32, %c0_i32_0 : i32, i32
  }
  func.func @transform_4(%arg0: i32) -> (i32, i32) {
    %c0_i32 = arith.constant 0 : i32
    %c0_i32_0 = arith.constant 0 : i32
    %c0_i32_1 = arith.constant 0 : i32
    return %c0_i32, %c0_i32_0 : i32, i32
  }
  func.func @transform_5(%arg0: i32) -> (i32, i32) {
    %c0_i32 = arith.constant 0 : i32
    %c0_i32_0 = arith.constant 0 : i32
    %c0_i32_1 = arith.constant 0 : i32
    return %c0_i32, %c0_i32_0 : i32, i32
  }
  func.func @transform_6(%arg0: i32) -> (i32, i32) {
    %c0_i32 = arith.constant 0 : i32
    %c0_i32_0 = arith.constant 0 : i32
    %c0_i32_1 = arith.constant 0 : i32
    return %c0_i32, %c0_i32_0 : i32, i32
  }
  func.func @transform_7(%arg0: i32) -> (i32, i32) {
    %c0_i32 = arith.constant 0 : i32
    %c0_i32_0 = arith.constant 0 : i32
    %c0_i32_1 = arith.constant 0 : i32
    return %c0_i32, %c0_i32_0 : i32, i32
  }
  func.func @transform_8(%arg0: i32) -> (i32, i32) {
    %c0_i32 = arith.constant 0 : i32
    %c0_i32_0 = arith.constant 0 : i32
    %c0_i32_1 = arith.constant 0 : i32
    return %c0_i32, %c0_i32_0 : i32, i32
  }
  func.func @transform_9(%arg0: i32) -> (i32, i32, i32) {
    %c0_i32 = arith.constant 0 : i32
    %c0_i32_0 = arith.constant 0 : i32
    %c0_i32_1 = arith.constant 0 : i32
    %c0_i32_2 = arith.constant 0 : i32
    return %c0_i32, %c0_i32_0, %c0_i32_1 : i32, i32, i32
  }
  func.func @transform_10(%arg0: i32) -> (i32, i32) {
    %c0_i32 = arith.constant 0 : i32
    %c0_i32_0 = arith.constant 0 : i32
    %c0_i32_1 = arith.constant 0 : i32
    return %c0_i32, %c0_i32_0 : i32, i32
  }
  func.func @transform_11(%arg0: i32) -> (i32, i32) {
    %c0_i32 = arith.constant 0 : i32
    %c0_i32_0 = arith.constant 0 : i32
    %c0_i32_1 = arith.constant 0 : i32
    return %c0_i32, %c0_i32_0 : i32, i32
  }
  func.func @transform_12(%arg0: i32) -> (i32, i32) {
    %c0_i32 = arith.constant 0 : i32
    %c0_i32_0 = arith.constant 0 : i32
    %c0_i32_1 = arith.constant 0 : i32
    return %c0_i32, %c0_i32_0 : i32, i32
  }
  func.func @transform_13(%arg0: i32) -> (i32, i32, i32) {
    %c0_i32 = arith.constant 0 : i32
    %c0_i32_0 = arith.constant 0 : i32
    %c0_i32_1 = arith.constant 0 : i32
    return %arg0, %c0_i32, %c0_i32_0 : i32, i32, i32
  }
}

</mosaic_0001>

<bundles_post_ra>
// kernel: lenet5_forward.1
= control target key start
LH: loop header
LB: loop body
LE: loop exit
PB: predicated region body
PF: predicated region fallthrough
CT: control target
= control target key end

     0   :  { %s6254_s25 = smov 0   ;;  %s10476_s0 = inlined_call_operand.vmem [shape: f32[2,1,1408], index: 0, kind: input, shape index: {}]   ;;  %s10477_s1 = inlined_call_operand.vmem [shape: f32[6,25], index: 1, kind: input, shape index: {}]   ;;  %s10478_s2 = inlined_call_operand.vmem [shape: f32[6,1], index: 2, kind: input, shape index: {}]   ;;  %s10479_s3 = inlined_call_operand.vmem [shape: f32[1112,264], index: 3, kind: input, shape index: {}]   ;;  %s10480_s4 = inlined_call_operand.vmem [shape: f32[16,150], index: 4, kind: input, shape index: {}]   ;;  %s10481_s5 = inlined_call_operand.vmem [shape: f32[16,1], index: 5, kind: input, shape index: {}]   ;;  %s10482_s6 = inlined_call_operand.vmem [shape: f32[172,40], index: 6, kind: input, shape index: {}]   ;;  %s10483_s7 = inlined_call_operand.vmem [shape: f32[120,400], index: 7, kind: input, shape index: {}]   ;;  %s10484_s8 = inlined_call_operand.vmem [shape: f32[120,1], index: 8, kind: input, shape index: {}]   ;;  %s10485_s9 = inlined_call_operand.vmem [shape: f32[4,84,120], index: 9, kind: input, shape index: {}]   ;;  %s10486_s10 = inlined_call_operand.vmem [shape: f32[84,1], index: 10, kind: input, shape index: {}]   ;;  %s10487_s11 = inlined_call_operand.vmem [shape: f32[10,84], index: 11, kind: input, shape index: {}]   ;;  %s10488_s12 = inlined_call_operand.vmem [shape: f32[10,1], index: 12, kind: input, shape index: {}]   ;;  %s10489_s13 = inlined_call_operand.vmem [shape: f32[2,10,1], index: 13, kind: output, shape index: {}]  }
   0x1 LB: > { %s5180_s26 = sadd.s32 4294967295, %s6142_s25   ;;  %p5184_p0 = scmp.ge.s32.totalorder %s6142_s25, 1  ;;  %s6142_s25 = sphi %s6254_s25, %s23_s25  }
   0x2   : > { %p386_p1 = scmp.lt.s32.totalorder %s6142_s25, 3 }
   0x4   : > { %p387_p2 = pnand %p5184_p0, %p386_p1 }
   0x6   : > { %390 = sbr.rel (%p387_p2) target bundleno = 3456 (0xd80), region = 72 }
   0xb   : > { %p429_p3 = scmp.lt.s32.totalorder %s5180_s26, 1  ;;  %v444_v0 = vlaneseq  ;;  %s10538_s14 = smov 127   ;;  %vm10536_vm0 = vcmask 728064   ;;  %vm10527_vm1 = vcmask 1039360   ;;  %vm10524_vm2 = vcmask 1031168  }
   0xc   : > { %s10510_s15 = smov 126   ;;  %s10508_s16 = smov 125   ;;  %vm10525_vm3 = vcmask 1022976   ;;  %vm1078_vm4 = vcmask 1040384   ;;  %vm10526_vm5 = vcmask 760832   ;;  %vm1088_vm6 = vcmask 1041408  }
   0xd   : > { %s10704_s26 = smov (!%p429_p3, %s5180_s26), 1  ;;  %v6264_v1 = vshrl.u32 %v444_v0, 7  ;;  %s10492_s17 = smov 93   ;;  %vm10528_vm7 = vcmask 752640   ;;  %vm1098_vm8 = vcmask 1042432   ;;  %vm10529_vm9 = vcmask 744448  }
   0xe   : > { %s5972_s27 = smul.u32 11, %s10704_s26  ;;  %s6148_s18 = smov 92   ;;  %vm1108_vm10 = vcmask 1043456   ;;  %vm10542_vm11 = vcmask 736256   ;;  %vm1118_vm12 = vcmask 1044480   ;;  %vm1128_vm13 = vcmask 1045504  }
   0xf   : > { %v458_v2 = vsub.s32 3, %v6264_v1  ;;  %v450_v3 = vsub.s32 1, %v6264_v1  ;;  %v10498_v4 = vsub.s32 2, %v6264_v1  ;;  %v446_v5 = vsub.s32 0, %v6264_v1  ;;  %s6149_s19 = smov 91   ;;  %s10490_s20 = smov 89  }
  0x10   : > { %s6273_s30 = scalar_lea.vmem %s10476_s0, %s5972_s27  ;;  %v470_v6 = vsub.s32 6, %v6264_v1  ;;  %v474_v7 = vsub.s32 7, %v6264_v1  ;;  %v462_v15 = vsub.s32 4, %v6264_v1  ;;  %s6151_s21 = smov 90   ;;  %v466_v17 = vsub.s32 5, %v6264_v1 }
  0x11   : > { %v438_v8 = vld [vmem:[%s6273_s30] sm:$0xff]  ;;  %s6152_s22 = smov 88   ;;  %s6153_s23 = smov 56   ;;  %vm10544_vm14 = vcmask 1046528   ;;  %vm10530_vm15 = vcmask 154624  }
  0x12   : > { %v6279_v9 = vrot.slane %v438_v8, %v458_v2  ;;  %v6283_v10 = vrot.slane %v438_v8, %v450_v3  ;;  %v6287_v11 = vrot.slane %v438_v8, %v10498_v4  ;;  %v6295_v12 = vrot.slane %v438_v8, %v446_v5  ;;  %s6154_s24 = smov 55   ;;  %s6155_s27 = smov 54  }
  0x13   : > { %v6297_v13 = vrot.slane %v438_v8, %v470_v6  ;;  %v6299_v14 = vrot.slane %v438_v8, %v474_v7  ;;  %v6350_v16 = vrot.slane %v438_v8, %v462_v15  ;;  %v6357_v18 = vrot.slane %v438_v8, %v466_v17  ;;  %s6156_s28 = smov 19   ;;  %s6157_s29 = smov 53  }
  0x14   : > { %499 = vrot.lane.b32.xlu1 %v6279_v9, %s10538_s14  ;;  %495 = vrot.lane.b32.xlu0 %v6283_v10, %s10538_s14 }
  0x15   : > { %10548 = vst [vmem:[#allocation2_spill] sm:$0xff] %v6299_v14 }
  0x18   : > { %497 = vrot.lane.b32.xlu0 %v6287_v11, %s10538_s14  ;;  %493 = vrot.lane.b32.xlu1 %v6295_v12, %s10538_s14 }
  0x1c   : > { %534 = vrot.lane.b32.xlu0 %v6283_v10, %s10510_s15  ;;  %536 = vrot.lane.b32.xlu1 %v6287_v11, %s10510_s15 }
  0x20   : > { %538 = vrot.lane.b32.xlu0 %v6279_v9, %s10510_s15  ;;  %532 = vrot.lane.b32.xlu1 %v6295_v12, %s10510_s15 }
  0x24   : > { %573 = vrot.lane.b32.xlu0 %v6283_v10, %s10508_s16  ;;  %575 = vrot.lane.b32.xlu1 %v6287_v11, %s10508_s16 }
  0x28   : > { %577 = vrot.lane.b32.xlu0 %v6279_v9, %s10508_s16  ;;  %571 = vrot.lane.b32.xlu1 %v6295_v12, %s10508_s16 }
  0x2c   : > { %1219 = vrot.lane.b32.xlu0 %v6283_v10, %s10492_s17  ;;  %1221 = vrot.lane.b32.xlu1 %v6287_v11, %s10492_s17 }
  0x30   : > { %1223 = vrot.lane.b32.xlu0 %v6279_v9, %s10492_s17  ;;  %651 = vrot.lane.b32.xlu1 %v6283_v10, %s6148_s18 }
  0x34   : > { %653 = vrot.lane.b32.xlu0 %v6287_v11, %s6148_s18  ;;  %655 = vrot.lane.b32.xlu1 %v6279_v9, %s6148_s18 }
  0x38   : > { %690 = vrot.lane.b32.xlu0 %v6283_v10, %s6149_s19  ;;  %692 = vrot.lane.b32.xlu1 %v6287_v11, %s6149_s19 }
  0x3c   : > { %694 = vrot.lane.b32.xlu0 %v6279_v9, %s6149_s19  ;;  %768 = vrot.lane.b32.xlu1 %v6283_v10, %s10490_s20 }
  0x40   : > { %770 = vrot.lane.b32.xlu0 %v6287_v11, %s10490_s20  ;;  %772 = vrot.lane.b32.xlu1 %v6279_v9, %s10490_s20 }
  0x44   : > { %729 = vrot.lane.b32.xlu0 %v6283_v10, %s6151_s21  ;;  %731 = vrot.lane.b32.xlu1 %v6287_v11, %s6151_s21 }
  0x48   : > { %733 = vrot.lane.b32.xlu0 %v6279_v9, %s6151_s21  ;;  %501 = vrot.lane.b32.xlu1 %v6350_v16, %s10538_s14 }
  0x4c   : > { %503 = vrot.lane.b32.xlu0 %v6357_v18, %s10538_s14  ;;  %540 = vrot.lane.b32.xlu1 %v6350_v16, %s10510_s15 }
  0x50   : > { %542 = vrot.lane.b32.xlu0 %v6357_v18, %s10510_s15  ;;  %579 = vrot.lane.b32.xlu1 %v6350_v16, %s10508_s16 }
  0x54   : > { %581 = vrot.lane.b32.xlu0 %v6357_v18, %s10508_s16  ;;  %1225 = vrot.lane.b32.xlu1 %v6350_v16, %s10492_s17 }
  0x58   : > { %1227 = vrot.lane.b32.xlu0 %v6357_v18, %s10492_s17  ;;  %657 = vrot.lane.b32.xlu1 %v6350_v16, %s6148_s18 }
  0x5c   : > { %659 = vrot.lane.b32.xlu0 %v6357_v18, %s6148_s18  ;;  %696 = vrot.lane.b32.xlu1 %v6350_v16, %s6149_s19 }
  0x60   : > { %698 = vrot.lane.b32.xlu0 %v6357_v18, %s6149_s19  ;;  %774 = vrot.lane.b32.xlu1 %v6350_v16, %s10490_s20 }
  0x64   : > { %776 = vrot.lane.b32.xlu0 %v6357_v18, %s10490_s20  ;;  %505 = vrot.lane.b32.xlu1 %v6297_v13, %s10538_s14 }
  0x68   : > { %507 = vrot.lane.b32.xlu0 %v6299_v14, %s10538_s14  ;;  %735 = vrot.lane.b32.xlu1 %v6350_v16, %s6151_s21 }
  0x6c   : > { %737 = vrot.lane.b32.xlu0 %v6357_v18, %s6151_s21  ;;  %544 = vrot.lane.b32.xlu1 %v6297_v13, %s10510_s15 }
  0x70   : > { %546 = vrot.lane.b32.xlu0 %v6299_v14, %s10510_s15  ;;  %583 = vrot.lane.b32.xlu1 %v6297_v13, %s10508_s16 }
  0x74   : > { %585 = vrot.lane.b32.xlu0 %v6299_v14, %s10508_s16  ;;  %1229 = vrot.lane.b32.xlu1 %v6297_v13, %s10492_s17 }
  0x78   : > { %1231 = vrot.lane.b32.xlu0 %v6299_v14, %s10492_s17  ;;  %661 = vrot.lane.b32.xlu1 %v6297_v13, %s6148_s18  ;;  %s6159_s17 = smov 52  }
  0x7c   : > { %663 = vrot.lane.b32.xlu0 %v6299_v14, %s6148_s18  ;;  %700 = vrot.lane.b32.xlu1 %v6297_v13, %s6149_s19 }
  0x80   : > { %702 = vrot.lane.b32.xlu0 %v6299_v14, %s6149_s19  ;;  %778 = vrot.lane.b32.xlu1 %v6297_v13, %s10490_s20 }
  0x84   : > { %780 = vrot.lane.b32.xlu0 %v6299_v14, %s10490_s20  ;;  %739 = vrot.lane.b32.xlu1 %v6297_v13, %s6151_s21 }
  0x86   : > { %v6419_v19 = vpop.permute.xlu1 %499  ;;  %v6421_v20 = vpop.permute.xlu0 %495 }
  0x88   : > { %741 = vrot.lane.b32.xlu0 %v6299_v14, %s6151_s21  ;;  %807 = vrot.lane.b32.xlu1 %v6283_v10, %s6152_s22 }
  0x8a   : > { %v6427_v21 = vpop.permute.xlu0 %497  ;;  %v6429_v22 = vpop.permute.xlu1 %493 }
  0x8b   : > { %v515_v49 = vsel %vm10527_vm1, %v6421_v20, %v6427_v21  ;;  %v516_v56 = vsel %vm10527_vm1, %v6427_v21, %v6419_v19 }
  0x8c   : > { %809 = vrot.lane.b32.xlu0 %v6287_v11, %s6152_s22  ;;  %766 = vrot.lane.b32.xlu1 %v6295_v12, %s10490_s20  ;;  %s10494_s20 = smov 124   ;;  %v1080_v54 = vsel %vm1078_vm4, %v6283_v10, %v515_v49  ;;  %v1081_v7 = vsel %vm1078_vm4, %v6287_v11, %v516_v56 }
  0x8e   : > { %v6435_v23 = vpop.permute.xlu0 %534  ;;  %v6437_v24 = vpop.permute.xlu1 %536 }
  0x8f   : > { %v554_v52 = vsel %vm10524_vm2, %v6435_v23, %v6437_v24 }
  0x90   : > { %805 = vrot.lane.b32.xlu0 %v6295_v12, %s6152_s22  ;;  %846 = vrot.lane.b32.xlu1 %v6283_v10, %s6153_s23  ;;  %v1090_v57 = vsel %vm1088_vm6, %v1080_v54, %v554_v52 }
  0x92   : > { %v6443_v25 = vpop.permute.xlu0 %538  ;;  %v6445_v26 = vpop.permute.xlu1 %532 }
  0x93   : > { %v555_v61 = vsel %vm10524_vm2, %v6437_v24, %v6443_v25 }
  0x94   : > { %848 = vrot.lane.b32.xlu0 %v6287_v11, %s6153_s23  ;;  %844 = vrot.lane.b32.xlu1 %v6295_v12, %s6153_s23  ;;  %v1091_v17 = vsel %vm1088_vm6, %v1081_v7, %v555_v61 }
  0x96   : > { %v6451_v27 = vpop.permute.xlu0 %573  ;;  %v6453_v28 = vpop.permute.xlu1 %575 }
  0x97   : > { %v593_v53 = vsel %vm10525_vm3, %v6451_v27, %v6453_v28 }
  0x98   : > { %885 = vrot.lane.b32.xlu0 %v6283_v10, %s6154_s24  ;;  %887 = vrot.lane.b32.xlu1 %v6287_v11, %s6154_s24  ;;  %v6556_v62 = vsel %vm1098_vm8, %v1090_v57, %v593_v53  ;;  %v553_v57 = vsel %vm10524_vm2, %v6445_v26, %v6435_v23 }
  0x9a   : > { %v6459_v29 = vpop.permute.xlu0 %577  ;;  %v6461_v30 = vpop.permute.xlu1 %571 }
  0x9b   : > { %v594_v0 = vsel %vm10525_vm3, %v6453_v28, %v6459_v29 }
  0x9c   : > { %883 = vrot.lane.b32.xlu0 %v6295_v12, %s6154_s24  ;;  %924 = vrot.lane.b32.xlu1 %v6283_v10, %s6155_s27  ;;  %v6596_v49 = vsel %vm1098_vm8, %v1091_v17, %v594_v0  ;;  %v592_v0 = vsel %vm10525_vm3, %v6461_v30, %v6451_v27 }
  0x9d   : > { %10551 = vst [vmem:[#allocation5_spill] sm:$0xff] %v6596_v49 }
  0x9e   : > { %v6467_v31 = vpop.permute.xlu0 %1219  ;;  %v6469_v32 = vpop.permute.xlu1 %1221 }
  0x9f   : > { %v1240_v55 = vsel %vm10526_vm5, %v6467_v31, %v6469_v32 }
  0xa0   : > { %926 = vrot.lane.b32.xlu0 %v6287_v11, %s6155_s27  ;;  %v1281_v2 = vsel %vm1108_vm10, %v6556_v62, %v1240_v55 }
  0xa2   : > { %v6473_v33 = vpop.permute.xlu0 %1223  ;;  %v6475_v34 = vpop.permute.xlu1 %651 }
  0xa3   : > { %v1241_v8 = vsel %vm10526_vm5, %v6469_v32, %v6473_v33 }
  0xa6   : > { %v6477_v35 = vpop.permute.xlu0 %653  ;;  %v6479_v36 = vpop.permute.xlu1 %655 }
  0xa7   : > { %v6546_v58 = vsel %vm10528_vm7, %v6475_v34, %v6477_v35  ;;  %v6587_v21 = vsel %vm10528_vm7, %v6477_v35, %v6479_v36  ;;  %v1282_v35 = vsel %vm1108_vm10, %v6596_v49, %v1241_v8 }
  0xa8   : > { %v1291_v15 = vsel %vm1118_vm12, %v1281_v2, %v6546_v58  ;;  %10550 = vst [vmem:[#allocation4_spill] sm:$0xff] %v6587_v21  ;;  %v1292_v54 = vsel %vm1118_vm12, %v1282_v35, %v6587_v21 }
  0xaa   : > { %v6481_v37 = vpop.permute.xlu0 %690  ;;  %v6483_v38 = vpop.permute.xlu1 %692 }
  0xab   : > { %v6561_v63 = vsel %vm10529_vm9, %v6481_v37, %v6483_v38 }
  0xae   : > { %v6485_v39 = vpop.permute.xlu0 %694  ;;  %v6487_v40 = vpop.permute.xlu1 %768 }
  0xaf   : > { %v6601_v32 = vsel %vm10529_vm9, %v6483_v38, %v6485_v39  ;;  %v514_v38 = vsel %vm10527_vm1, %v6429_v22, %v6421_v20 }
  0xb0   : > { %10552 = vst [vmem:[#allocation6_spill] sm:$0xff] %v6601_v32  ;;  %v1079_v20 = vsel %vm1078_vm4, %v6295_v12, %v514_v38 }
  0xb1   : > { %v1089_v22 = vsel %vm1088_vm6, %v1079_v20, %v553_v57  ;;  %v10496_v20 = vmov 0.0  }
  0xb2   : > { %v771_v41 = vpop.permute.xlu0 %770  ;;  %v6489_v42 = vpop.permute.xlu1 %772  ;;  %v6644_v26 = vsel %vm1098_vm8, %v1089_v22, %v592_v0  ;;  %1489 = vmatprep.mubr.f32.mxu1 %v10496_v20  ;;  %1631 = vmatprep.mubr.f32.mxu0 %v10496_v20 }
  0xb3   : > { %v6493_v43 = vsel %vm10536_vm0, %v6487_v40, %v771_v41  ;;  %v6497_v44 = vsel %vm10536_vm0, %v771_v41, %v6489_v42  ;;  %v1301_v41 = vsel %vm1128_vm13, %v1291_v15, %v6561_v63  ;;  %v1280_v27 = vsel %vm1108_vm10, %v6644_v26, %v6467_v31 }
  0xb4   : > { %10549 = vst [vmem:[#allocation3_spill] sm:$0xff] %v6497_v44  ;;  %1352 = vrot.lane.b32.xlu1 %v6493_v43, %s6156_s28  ;;  %1354 = vrot.lane.b32.xlu0 %v6497_v44, %s6156_s28  ;;  %v1290_v30 = vsel %vm1118_vm12, %v1280_v27, %v6475_v34 }
  0xb5   : > { %v1300_v15 = vsel %vm1128_vm13, %v1290_v30, %v6481_v37 }
  0xb6   : > { %v6503_v45 = vpop.permute.xlu0 %729  ;;  %v732_v46 = vpop.permute.xlu1 %731 }
  0xb7   : > { %v6570_v6 = vsel %vm10542_vm11, %v6503_v45, %v732_v46  ;;  %v1310_v17 = vsel %vm10544_vm14, %v1300_v15, %v6503_v45 }
  0xb8   : > { %922 = vrot.lane.b32.xlu1 %v6295_v12, %s6155_s27  ;;  %963 = vrot.lane.b32.xlu0 %v6283_v10, %s6157_s29  ;;  %v1311_v52 = vsel %vm10544_vm14, %v1301_v41, %v6570_v6 }
  0xba   : > { %v6509_v47 = vpop.permute.xlu0 %733  ;;  %v6511_v48 = vpop.permute.xlu1 %501 }
  0xbb   : > { %v6609_v53 = vsel %vm10542_vm11, %v732_v46, %v6509_v47  ;;  %v1302_v46 = vsel %vm1128_vm13, %v1292_v54, %v6601_v32 }
  0xbc   : > { %965 = vrot.lane.b32.xlu1 %v6287_v11, %s6157_s29  ;;  %1350 = vrot.lane.b32.xlu0 %v6487_v40, %s6156_s28  ;;  %10553 = vst [vmem:[#allocation7_spill] sm:$0xff] %v6609_v53  ;;  %v1312_v61 = vsel %vm10544_vm14, %v1302_v46, %v6609_v53  ;;  %v6697_v46 = vld [vmem:[%s6273_s30 + $0x8] sm:$0x7]  ;;  %s10561_s30 = smov 124  }
  0xbe   : > { %v6520_v50 = vpop.permute.xlu0 %503  ;;  %v6522_v51 = vpop.permute.xlu1 %540 }
  0xbf   : > { %v518_v20 = vsel %vm10527_vm1, %v6511_v48, %v6520_v50 }
  0xc0   : > { %612 = vrot.lane.b32.xlu1 %v6283_v10, %s10494_s20  ;;  %614 = vrot.lane.b32.xlu0 %v6287_v11, %s10494_s20 }
  0xc2   : > { %v6548_v59 = vpop.permute.xlu0 %542  ;;  %v6550_v60 = vpop.permute.xlu1 %579 }
  0xc3   : > { %v595_v44 = vsel %vm10525_vm3, %v6459_v29, %v6550_v60 }
  0xc4   : > { %961 = vrot.lane.b32.xlu1 %v6295_v12, %s6157_s29  ;;  %1002 = vrot.lane.b32.xlu0 %v6283_v10, %s6159_s17 }
  0xc6   : > { %v6589_v24 = vpop.permute.xlu0 %581  ;;  %v6591_v28 = vpop.permute.xlu1 %1225 }
  0xc7   : > { %v596_v32 = vsel %vm10525_vm3, %v6550_v60, %v6589_v24 }
  0xc8   : > { %1004 = vrot.lane.b32.xlu1 %v6287_v11, %s6159_s17  ;;  %1332 = vrot.lane.b32.xlu0 %v1311_v52, %s6156_s28 }
  0xca   : > { %v6619_v55 = vpop.permute.xlu0 %1227  ;;  %v6621_v56 = vpop.permute.xlu1 %657 }
  0xcc   : > { %1334 = vrot.lane.b32.xlu1 %v1312_v61, %s6156_s28  ;;  %610 = vrot.lane.b32.xlu0 %v6295_v12, %s10494_s20  ;;  %s10540_s20 = smov 20   ;;  %v6704_v61 = vrot.slane %v6697_v46, %v446_v5 }
  0xce   : > { %v6639_v2 = vpop.permute.xlu0 %659  ;;  %v6641_v23 = vpop.permute.xlu1 %696 }
  0xd0   : > { %1000 = vrot.lane.b32.xlu1 %v6295_v12, %s6159_s17  ;;  %1041 = vrot.lane.b32.xlu0 %v6283_v10, %s10540_s20 }
  0xd2   : > { %v6655_v7 = vpop.permute.xlu0 %698  ;;  %v775_v8 = vpop.permute.xlu1 %774 }
  0xd3   : > { %v6741_v15 = vsel %vm10536_vm0, %v6489_v42, %v775_v8 }
  0xd4   : > { %1043 = vrot.lane.b32.xlu1 %v6287_v11, %s10540_s20  ;;  %1330 = vrot.lane.b32.xlu0 %v1310_v17, %s6156_s28  ;;  %10558 = vst [vmem:[#allocation12_spill] sm:$0xff] %v6741_v15 }
  0xd6   : > { %v6664_v31 = vpop.permute.xlu0 %776  ;;  %v6666_v10 = vpop.permute.xlu1 %505 }
  0xd7   : > { %v6737_v30 = vsel %vm10536_vm0, %v775_v8, %v6664_v31  ;;  %v1083_v8 = vsel %vm1078_vm4, %v6350_v16, %v518_v20 }
  0xd8   : > { %649 = vrot.lane.b32.xlu1 %v6295_v12, %s6148_s18  ;;  %1039 = vrot.lane.b32.xlu0 %v6295_v12, %s10540_s20  ;;  %10557 = vst [vmem:[#allocation11_spill] sm:$0xff] %v6737_v30 }
  0xda   : > { %v6672_v41 = vpop.permute.xlu0 %507  ;;  %v6674_v52 = vpop.permute.xlu1 %735 }
  0xdb   : > { %10554 = vst [vmem:[#allocation8_spill] sm:$0xff] %v6672_v41 }
  0xdc   : > { %688 = vrot.lane.b32.xlu1 %v6295_v12, %s6149_s19  ;;  %811 = vrot.lane.b32.xlu0 %v6279_v9, %s6152_s22 }
  0xde   : > { %v6680_v11 = vpop.permute.xlu0 %737  ;;  %v6682_v35 = vpop.permute.xlu1 %544 }
  0xe0   : > { %813 = vrot.lane.b32.xlu1 %v6350_v16, %s6152_s22  ;;  %727 = vrot.lane.b32.xlu0 %v6295_v12, %s6151_s21  ;;  %v6709_v12 = vrot.slane %v6697_v46, %v450_v3 }
  0xe2   : > { %v6688_v54 = vpop.permute.xlu0 %546  ;;  %v6690_v38 = vpop.permute.xlu1 %583  ;;  %10556 = vst [vmem:[#allocation10_spill] sm:$0xff] %v6709_v12 }
  0xe3   : > { %10555 = vst [vmem:[#allocation9_spill] sm:$0xff] %v6688_v54 }
  0xe4   : > { %850 = vrot.lane.b32.xlu1 %v6279_v9, %s6153_s23  ;;  %852 = vrot.lane.b32.xlu0 %v6350_v16, %s6153_s23 }
  0xe6   : > { %v6699_v57 = vpop.permute.xlu0 %585  ;;  %v6711_v0 = vpop.permute.xlu1 %1229 }
  0xe8   : > { %889 = vrot.lane.b32.xlu1 %v6279_v9, %s6154_s24  ;;  %891 = vrot.lane.b32.xlu0 %v6350_v16, %s6154_s24 }
  0xea   : > { %v6719_v5 = vpop.permute.xlu0 %1231  ;;  %v6725_v3 = vpop.permute.xlu1 %661 }
  0xec   : > { %509 = vrot.lane.b32.xlu1 %v6704_v61, %s10538_s14  ;;  %511 = vrot.lane.b32.xlu0 %v6709_v12, %s10538_s14  ;;  %s10623_s14 = smov 20  }
  0xee   : > { %v6727_v22 = vpop.permute.xlu0 %663  ;;  %v6743_v17 = vpop.permute.xlu1 %700 }
  0xf0   : > { %928 = vrot.lane.b32.xlu1 %v6279_v9, %s6155_s27  ;;  %930 = vrot.lane.b32.xlu0 %v6350_v16, %s6155_s27 }
  0xf2   : > { %v6733_v27 = vpop.permute.xlu0 %702  ;;  %v6758_v42 = vpop.permute.xlu1 %778 }
  0xf4   : > { %1358 = vrot.lane.b32.xlu0 %v6737_v30, %s6156_s28  ;;  %1356 = vrot.lane.b32.xlu1 %v6741_v15, %s6156_s28  ;;  %v557_v30 = vsel %vm10524_vm2, %v6522_v51, %v6548_v59  ;;  %v556_v15 = vsel %vm10524_vm2, %v6443_v25, %v6522_v51  ;;  %v1242_v25 = vsel %vm10526_vm5, %v6473_v33, %v6591_v28 }
  0xf5   : > { %v1093_v53 = vsel %vm1088_vm6, %v1083_v8, %v557_v30  ;;  %v1243_v30 = vsel %vm10526_vm5, %v6591_v28, %v6619_v55  ;;  %v517_v8 = vsel %vm10527_vm1, %v6419_v19, %v6511_v48  ;;  %v6818_v48 = vsel %vm10528_vm7, %v6479_v36, %v6621_v56 }
  0xf6   : > { %v6752_v4 = vpop.permute.xlu0 %780  ;;  %v6775_v49 = vpop.permute.xlu1 %739  ;;  %v6782_v20 = vsel %vm1098_vm8, %v1093_v53, %v596_v32  ;;  %v6801_v53 = vsel %vm10528_vm7, %v6621_v56, %v6639_v2  ;;  %v1082_v19 = vsel %vm1078_vm4, %v6279_v9, %v517_v8  ;;  %10562 = vst [vmem:[#allocation15_spill] sm:$0xff] %v6818_v48  ;;  %v6830_v8 = vsel %vm10529_vm9, %v6485_v39, %v6641_v23 }
  0xf7   : > { %10559 = vst [vmem:[#allocation13_spill] sm:$0xff] %v6782_v20  ;;  %v1284_v32 = vsel %vm1108_vm10, %v6782_v20, %v1243_v30  ;;  %10560 = vst [vmem:[#allocation14_spill] sm:$0xff] %v6801_v53  ;;  %v1092_v29 = vsel %vm1088_vm6, %v1082_v19, %v556_v15  ;;  %v6835_v33 = vsel %vm10529_vm9, %v6641_v23, %v6655_v7 }
  0xf8   : > { %550 = vrot.lane.b32.xlu0 %v6709_v12, %s10510_s15  ;;  %548 = vrot.lane.b32.xlu1 %v6704_v61, %s10510_s15  ;;  %v6823_v60 = vsel %vm1098_vm8, %v1092_v29, %v595_v44  ;;  %v1294_v30 = vsel %vm1118_vm12, %v1284_v32, %v6801_v53  ;;  %10563 = vst [vmem:[#allocation16_spill] sm:$0xff] %v6830_v8  ;;  %10564 = vst [vmem:[#allocation17_spill] sm:$0xff] %v6835_v33  ;;  %s10568_s15 = smov 89  }
  0xf9   : > { %v1283_v36 = vsel %vm1108_vm10, %v6823_v60, %v1242_v25  ;;  %v6842_v44 = vsel %vm10542_vm11, %v6509_v47, %v6674_v52  ;;  %v6847_v28 = vsel %vm10542_vm11, %v6674_v52, %v6680_v11  ;;  %v1304_v47 = vsel %vm1128_vm13, %v1294_v30, %v6835_v33 }
  0xfa   : > { %v6773_v21 = vpop.permute.xlu0 %741  ;;  %v6820_v51 = vpop.permute.xlu1 %807  ;;  %10565 = vst [vmem:[#allocation18_spill] sm:$0xff] %v6842_v44  ;;  %10566 = vst [vmem:[#allocation19_spill] sm:$0xff] %v6847_v28  ;;  %v1293_v39 = vsel %vm1118_vm12, %v1283_v36, %v6818_v48  ;;  %v1314_v52 = vsel %vm10544_vm14, %v1304_v47, %v6847_v28 }
  0xfb   : > { %v1303_v23 = vsel %vm1128_vm13, %v1293_v39, %v6830_v8 }
  0xfc   : > { %969 = vrot.lane.b32.xlu0 %v6350_v16, %s6157_s29  ;;  %967 = vrot.lane.b32.xlu1 %v6279_v9, %s6157_s29  ;;  %v1313_v15 = vsel %vm10544_vm14, %v1303_v23, %v6842_v44  ;;  %v520_v44 = vsel %vm10527_vm1, %v6666_v10, %v6672_v41 }
  0xfd   : > { %v1085_v48 = vsel %vm1078_vm4, %v6297_v13, %v520_v44  ;;  %v519_v44 = vsel %vm10527_vm1, %v6520_v50, %v6666_v10  ;;  %v1245_v10 = vsel %vm10526_vm5, %v6711_v0, %v6719_v5  ;;  %vm630_vm1 = vcmask 1014784  }
  0xfe   : > { %v6803_v14 = vpop.permute.xlu0 %809  ;;  %v6865_v32 = vpop.permute.xlu1 %766 }
 0x100   : > { %589 = vrot.lane.b32.xlu0 %v6709_v12, %s10508_s16  ;;  %587 = vrot.lane.b32.xlu1 %v6704_v61, %s10508_s16  ;;  %s10567_s16 = smov 93  }
 0x102   : > { %v6855_v56 = vpop.permute.xlu0 %805  ;;  %v6875_v25 = vpop.permute.xlu1 %846 }
 0x104   : > { %618 = vrot.lane.b32.xlu0 %v6350_v16, %s10561_s30  ;;  %616 = vrot.lane.b32.xlu1 %v6279_v9, %s10561_s30 }
 0x106   : > { %v6869_v19 = vpop.permute.xlu0 %848  ;;  %v6883_v30 = vpop.permute.xlu1 %844 }
 0x108   : > { %1008 = vrot.lane.b32.xlu0 %v6350_v16, %s6159_s17  ;;  %1006 = vrot.lane.b32.xlu1 %v6279_v9, %s6159_s17 }
 0x10a   : > { %v6881_v29 = vpop.permute.xlu0 %885 }
 0x10c   : > { %1338 = vrot.lane.b32.xlu0 %v1314_v52, %s6156_s28  ;;  %1336 = vrot.lane.b32.xlu1 %v1313_v15, %s6156_s28 }
 0x10e   : > { %v6889_v36 = vpop.permute.xlu0 %883 }
 0x110   : > { %817 = vrot.lane.b32.xlu0 %v6297_v13, %s6152_s22  ;;  %815 = vrot.lane.b32.xlu1 %v6357_v18, %s6152_s22 }
 0x114   : > { %1047 = vrot.lane.b32.xlu0 %v6350_v16, %s10540_s20  ;;  %1045 = vrot.lane.b32.xlu1 %v6279_v9, %s10540_s20  ;;  %v6895_v16 = vpop.permute.xlu1 %887  ;;  %v6901_v9 = vpop.permute.xlu0 %926 }
 0x118   : > { %1235 = vrot.lane.b32.xlu0 %v6709_v12, %s10567_s16  ;;  %1233 = vrot.lane.b32.xlu1 %v6704_v61, %s10567_s16  ;;  %v6903_v39 = vpop.permute.xlu1 %924 }
 0x11c   : > { %667 = vrot.lane.b32.xlu0 %v6709_v12, %s6148_s18  ;;  %665 = vrot.lane.b32.xlu1 %v6704_v61, %s6148_s18 }
 0x120   : > { %856 = vrot.lane.b32.xlu0 %v6297_v13, %s6153_s23  ;;  %854 = vrot.lane.b32.xlu1 %v6357_v18, %s6153_s23 }
 0x124   : > { %706 = vrot.lane.b32.xlu0 %v6709_v12, %s6149_s19  ;;  %704 = vrot.lane.b32.xlu1 %v6704_v61, %s6149_s19 }
 0x126   : > { %v6909_v47 = vpop.permute.xlu0 %1354  ;;  %v1353_v23 = vpop.permute.xlu1 %1352 }
 0x127   : > { %v1381_v52 = vsel %vm10530_vm15, %v1353_v23, %v6909_v47 }
 0x128   : > { %784 = vrot.lane.b32.xlu0 %v6709_v12, %s10568_s15  ;;  %782 = vrot.lane.b32.xlu1 %v6704_v61, %s10568_s15 }
 0x129   : > { %5187 = vmatprep.subr.msk.mxu1 %vm1078_vm4, %v1381_v52 }
 0x12a   : > { %v6918_v15 = vpop.permute.xlu0 %963  ;;  %v6920_v28 = vpop.permute.xlu1 %922 }
 0x12c   : > { %895 = vrot.lane.b32.xlu0 %v6297_v13, %s6154_s24  ;;  %893 = vrot.lane.b32.xlu1 %v6357_v18, %s6154_s24 }
 0x12e   : > { %v1351_v33 = vpop.permute.xlu0 %1350  ;;  %v6926_v53 = vpop.permute.xlu1 %965 }
 0x12f   : > { %v1380_v20 = vsel %vm10530_vm15, %v1351_v33, %v1353_v23  ;;  %v559_v33 = vsel %vm10524_vm2, %v6682_v35, %v6688_v54  ;;  %v6964_v54 = vsel %vm10536_vm0, %v6758_v42, %v6752_v4 }
 0x130   : > { %745 = vrot.lane.b32.xlu0 %v6709_v12, %s6151_s21  ;;  %743 = vrot.lane.b32.xlu1 %v6704_v61, %s6151_s21  ;;  %v1095_v23 = vsel %vm1088_vm6, %v1085_v48, %v559_v33  ;;  %10569 = vst [vmem:[#allocation20_spill] sm:$0xff] %v6964_v54  ;;  %v6969_v48 = vsel %vm10536_vm0, %v6664_v31, %v6758_v42 }
 0x131   : > { %5188 = vmatpush1.msk.msra.mxu1 %vm1078_vm4, %v1380_v20  ;;  %v598_v20 = vsel %vm10525_vm3, %v6690_v38, %v6699_v57  ;;  %v558_v33 = vsel %vm10524_vm2, %v6548_v59, %v6682_v35  ;;  %v1084_v31 = vsel %vm1078_vm4, %v6357_v18, %v519_v44  ;;  %v597_v59 = vsel %vm10525_vm3, %v6589_v24, %v6690_v38 }
 0x132   : > { %v6937_v52 = vpop.permute.xlu0 %614  ;;  %v6939_v8 = vpop.permute.xlu1 %612  ;;  %v6979_v50 = vsel %vm1098_vm8, %v1095_v23, %v598_v20  ;;  %v1244_v23 = vsel %vm10526_vm5, %v6619_v55, %v6711_v0  ;;  %vm825_vm2 = vcmask 719872   ;;  %v7002_v44 = vsel %vm10528_vm7, %v6639_v2, %v6725_v3 }
 0x133   : > { %10570 = vst [vmem:[#allocation21_spill] sm:$0xff] %v6979_v50  ;;  %v1286_v20 = vsel %vm1108_vm10, %v6979_v50, %v1245_v10  ;;  %v7007_v24 = vsel %vm10528_vm7, %v6725_v3, %v6727_v22  ;;  %vm10535_vm3 = vcmask 457728   ;;  %v7019_v2 = vsel %vm10529_vm9, %v6655_v7, %v6743_v17 }
 0x134   : > { %934 = vrot.lane.b32.xlu0 %v6297_v13, %s6155_s27  ;;  %932 = vrot.lane.b32.xlu1 %v6357_v18, %s6155_s27  ;;  %10571 = vst [vmem:[#allocation22_spill] sm:$0xff] %v7007_v24  ;;  %10572 = vst [vmem:[#allocation23_spill] sm:$0xff] %v7019_v2  ;;  %vm903_vm5 = vcmask 449536   ;;  %v7026_v0 = vsel %vm10529_vm9, %v6743_v17, %v6733_v27  ;;  %vm942_vm7 = vcmask 441344   ;;  %v1296_v10 = vsel %vm1118_vm12, %v1286_v20, %v7007_v24 }
 0x135   : > { %10573 = vst [vmem:[#allocation24_spill] sm:$0xff] %v7026_v0  ;;  %v827_v17 = vsel %vm825_vm2, %v6820_v51, %v6803_v14  ;;  %vm981_vm9 = vcmask 433152   ;;  %v905_v20 = vsel %vm903_vm5, %v6881_v29, %v6895_v16  ;;  %v7069_v50 = vsel %vm10542_vm11, %v6775_v49, %v6773_v21 }
 0x136   : > { %v6954_v12 = vpop.permute.xlu0 %1002  ;;  %v6956_v41 = vpop.permute.xlu1 %961 }
 0x138   : > { %1362 = vrot.lane.b32.xlu0 %v6964_v54, %s6156_s28  ;;  %1360 = vrot.lane.b32.xlu1 %v6969_v48, %s6156_s28  ;;  %v1094_v54 = vsel %vm1088_vm6, %v1084_v31, %v558_v33  ;;  %v866_v31 = vsel %vm10535_vm3, %v6875_v25, %v6869_v19 }
 0x139   : > { %v7014_v55 = vsel %vm1098_vm8, %v1094_v54, %v597_v59  ;;  %v7031_v54 = vsel %vm10542_vm11, %v6680_v11, %v6775_v49  ;;  %v632_v59 = vsel %vm630_vm1, %v6939_v8, %v6937_v52  ;;  %v865_v49 = vsel %vm10535_vm3, %v6883_v30, %v6875_v25 }
 0x13a   : > { %v6989_v35 = vpop.permute.xlu0 %1332  ;;  %v6991_v42 = vpop.permute.xlu1 %1004  ;;  %v1285_v38 = vsel %vm1108_vm10, %v7014_v55, %v1244_v23  ;;  %vm10537_vm3 = vcmask 162816  }
 0x13b   : > { %v1295_v33 = vsel %vm1118_vm12, %v1285_v38, %v7002_v44  ;;  %v1306_v38 = vsel %vm1128_vm13, %v1296_v10, %v7026_v0 }
 0x13c   : > { %973 = vrot.lane.b32.xlu0 %v6297_v13, %s6157_s29  ;;  %971 = vrot.lane.b32.xlu1 %v6357_v18, %s6157_s29  ;;  %v1305_v23 = vsel %vm1128_vm13, %v1295_v33, %v7019_v2  ;;  %v1149_v33 = vsel %vm1078_vm4, %v6493_v43, %v827_v17  ;;  %v826_v2 = vsel %vm825_vm2, %v6855_v56, %v6820_v51 }
 0x13d   : > { %v1315_v24 = vsel %vm10544_vm14, %v1305_v23, %v7031_v54  ;;  %v1158_v23 = vsel %vm1088_vm6, %v1149_v33, %v866_v31  ;;  %v983_v43 = vsel %vm981_vm9, %v6918_v15, %v6926_v53  ;;  %v1110_v17 = vsel %vm1108_vm10, %v6556_v62, %v632_v59 }
 0x13e   : > { %v7033_v3 = vpop.permute.xlu0 %610  ;;  %v7035_v7 = vpop.permute.xlu1 %1334  ;;  %v787_v51 = vsel %vm10536_vm0, %v6865_v32, %v6487_v40  ;;  %v1167_v56 = vsel %vm1098_vm8, %v1158_v23, %v905_v20  ;;  %v904_v62 = vsel %vm903_vm5, %v6889_v36, %v6881_v29  ;;  %v1316_v32 = vsel %vm10544_vm14, %v1306_v38, %v7069_v50 }
 0x13f   : > { %v1372_v11 = vsel %vm10530_vm15, %v6989_v35, %v7035_v7  ;;  %vm10545_vm15 = vcmask 424960   ;;  %v1148_v25 = vsel %vm1078_vm4, %v787_v51, %v826_v2  ;;  %v943_v59 = vsel %vm942_vm7, %v6920_v28, %v6903_v39 }
 0x140   : > { %622 = vrot.lane.b32.xlu0 %v6297_v13, %s10561_s30  ;;  %620 = vrot.lane.b32.xlu1 %v6357_v18, %s10561_s30  ;;  %v1022_v31 = vsel %vm10545_vm15, %v6954_v12, %v6991_v42  ;;  %v1157_v30 = vsel %vm1088_vm6, %v1148_v25, %v865_v49  ;;  %v1120_v2 = vsel %vm1118_vm12, %v1110_v17, %v6546_v58  ;;  %vm10574_vm0 = vcmask 154624  }
 0x141   : > { %1451 = vmatprep.subr.mxu1 %v1372_v11  ;;  %v944_v11 = vsel %vm942_vm7, %v6903_v39, %v6901_v9  ;;  %v982_v29 = vsel %vm981_vm9, %v6956_v41, %v6918_v15  ;;  %v1166_v39 = vsel %vm1098_vm8, %v1157_v30, %v904_v62  ;;  %v6162_v25 = vmov 0  }
 0x142   : > { %v1042_v10 = vpop.permute.xlu0 %1041  ;;  %v1001_v0 = vpop.permute.xlu1 %1000  ;;  %v1176_v40 = vsel %vm1108_vm10, %v1167_v56, %v944_v11  ;;  %v1175_v41 = vsel %vm1108_vm10, %v1166_v39, %v943_v59  ;;  %6021 = vset.pattern.permute.xlu0 %v6162_v25  ;;  %6057 = vset.pattern.permute.xlu1 %v6162_v25  ;;  %v10587_v25 = vld [vmem:[#allocation5_spill] sm:$0xff] }
 0x143   : > { %v1185_v20 = vsel %vm1118_vm12, %v1176_v40, %v983_v43  ;;  %v1021_v11 = vsel %vm10545_vm15, %v1001_v0, %v6954_v12  ;;  %v1184_v15 = vsel %vm1118_vm12, %v1175_v41, %v982_v29  ;;  %v1130_v43 = vsel %vm1128_vm13, %v1120_v2, %v6561_v63 }
 0x144   : > { %1012 = vrot.lane.b32.xlu0 %v6297_v13, %s6159_s17  ;;  %1010 = vrot.lane.b32.xlu1 %v6357_v18, %s6159_s17  ;;  %v1194_v28 = vsel %vm1128_vm13, %v1185_v20, %v1022_v31  ;;  %v1193_v12 = vsel %vm1128_vm13, %v1184_v15, %v1021_v11  ;;  %v10575_v0 = vsub.s32 2, %v6264_v1  ;;  %v1140_v63 = vsel %vm10544_vm14, %v1130_v43, %v6570_v6 }
 0x145   : > { %v10578_v40 = vmov 0.0  }
 0x146   : > { %v1331_v33 = vpop.permute.xlu0 %1330  ;;  %v7111_v23 = vpop.permute.xlu1 %1043  ;;  %v1218_v51 = vrot.slane %v6697_v46, %v10575_v0 }
 0x147   : > { %v1061_v36 = vsel %vm10537_vm3, %v1042_v10, %v7111_v23  ;;  %v1371_v38 = vsel %vm10574_vm0, %v1331_v33, %v6989_v35  ;;  %vm10576_vm0 = vcmask 752640  }
 0x148   : > { %1342 = vrot.lane.b32.xlu0 %v1316_v32, %s6156_s28  ;;  %1340 = vrot.lane.b32.xlu1 %v1315_v24, %s6156_s28  ;;  %v1203_v58 = vsel %vm10544_vm14, %v1194_v28, %v1061_v36  ;;  %v10579_v32 = vld [vmem:[#allocation2_spill] sm:$0xff] }
 0x149   : > { %1452 = vmatpush1.msra.mxu1 %v1371_v38 }
 0x14a   : > { %1453 = vmatprep.subr.mxu1 %v1203_v58  ;;  %v1040_v35 = vpop.permute.xlu0 %1039  ;;  %v650_v49 = vpop.permute.xlu1 %649 }
 0x14b   : > { %v1060_v17 = vsel %vm10537_vm3, %v1040_v35, %v1042_v10  ;;  %v631_v10 = vsel %vm630_vm1, %v7033_v3, %v6939_v8  ;;  %vm10577_vm3 = vcmask 744448  }
 0x14c   : > { %1051 = vrot.lane.b32.xlu0 %v6297_v13, %s10540_s20  ;;  %1049 = vrot.lane.b32.xlu1 %v6357_v18, %s10540_s20  ;;  %v1202_v24 = vsel %vm10544_vm14, %v1193_v12, %v1060_v17  ;;  %v670_v18 = vsel %vm10576_vm0, %v650_v49, %v6475_v34  ;;  %v1109_v1 = vsel %vm1108_vm10, %v6644_v26, %v631_v10  ;;  %vm10580_vm0 = vcmask 154624   ;;  %s10694_s20 = smov 126  }
 0x14d   : > { %1454 = vmatpush1.msra.mxu1 %v1202_v24  ;;  %v1119_v6 = vsel %vm1118_vm12, %v1109_v1, %v670_v18 }
 0x14e   : > { %v812_v56 = vpop.permute.xlu0 %811  ;;  %1455 = vmatprep.subr.mxu1 %v1140_v63  ;;  %v689_v13 = vpop.permute.xlu1 %688 }
 0x14f   : > { %v709_v31 = vsel %vm10577_vm3, %v689_v13, %v6481_v37  ;;  %v7165_v37 = vld [vmem:[%s10477_s1] sm:$0x3f]  ;;  %vm10543_vm3 = vcmask 203776   ;;  %v828_v0 = vsel %vm825_vm2, %v6803_v14, %v812_v56 }
 0x150   : > { %1259 = vrot.lane.b32.xlu0 %v1218_v51, %s6148_s18  ;;  %1237 = vrot.lane.b32.xlu1 %v1218_v51, %s10567_s16  ;;  %v1129_v34 = vsel %vm1128_vm13, %v1119_v6, %v709_v31  ;;  %v10585_v6 = vld [vmem:[#allocation3_spill] sm:$0xff] }
 0x152   : > { %v728_v46 = vpop.permute.xlu0 %727  ;;  %v7157_v8 = vpop.permute.xlu1 %813 }
 0x153   : > { %v748_v3 = vsel %vm10542_vm11, %v728_v46, %v6503_v45  ;;  %vm10581_vm11 = vmmov %vm10580_vm0  ;;  %v1150_v46 = vsel %vm1078_vm4, %v10585_v6, %v828_v0 }
 0x154   : > { %1274 = vrot.lane.b32.xlu0 %v1218_v51, %s10568_s15  ;;  %1264 = vrot.lane.b32.xlu1 %v1218_v51, %s6149_s19  ;;  %v1139_v26 = vsel %vm10544_vm14, %v1129_v34, %v748_v3  ;;  %s10676_s19 = smov 127   ;;  %s6164_s15 = smov 113  }
 0x155   : > { %1456 = vmatpush1.msra.mxu1 %v1139_v26 }
 0x156   : > { %v7170_v62 = vpop.permute.xlu0 %852  ;;  %v851_v45 = vpop.permute.xlu1 %850  ;;  %5189 = vmatmul.mubr.msk.f32.vlgmr.msra.gmra.mxu1 %vm10543_vm3, %v7165_v37  ;;  %vm10583_vm3 = vmmov %vm10580_vm0 }
 0x157   : > { %1560 = vmatprep.mubr.f32.mxu1 %v10578_v40 }
 0x158   : > { %819 = vrot.lane.b32.xlu0 %v10579_v32, %s6152_s22  ;;  %1269 = vrot.lane.b32.xlu1 %v1218_v51, %s6151_s21  ;;  %v829_v51 = vsel %vm825_vm2, %v812_v56, %v7157_v8  ;;  %s10695_s21 = smov 125  }
 0x15a   : > { %v7178_v30 = vpop.permute.xlu0 %891  ;;  %v890_v59 = vpop.permute.xlu1 %889 }
 0x15b   : > { %v907_v34 = vsel %vm903_vm5, %v890_v59, %v7178_v30 }
 0x15c   : > { %858 = vrot.lane.b32.xlu0 %v10579_v32, %s6153_s23  ;;  %821 = vrot.lane.b32.xlu1 %v6704_v61, %s6152_s22 }
 0x15e   : > { %v7184_v20 = vpop.permute.xlu0 %511  ;;  %v7186_v33 = vpop.permute.xlu1 %509 }
 0x160   : > { %897 = vrot.lane.b32.xlu0 %v10579_v32, %s6154_s24  ;;  %860 = vrot.lane.b32.xlu1 %v6704_v61, %s6153_s23 }
 0x162   : > { %v7192_v2 = vpop.permute.xlu0 %930  ;;  %v929_v29 = vpop.permute.xlu1 %928 }
 0x163   : > { %v945_v26 = vsel %vm942_vm7, %v6901_v9, %v929_v29 }
 0x164   : > { %936 = vrot.lane.b32.xlu0 %v10579_v32, %s6155_s27  ;;  %899 = vrot.lane.b32.xlu1 %v6704_v61, %s6154_s24 }
 0x166   : > { %v7198_v36 = vpop.permute.xlu0 %1358  ;;  %v1357_v38 = vpop.permute.xlu1 %1356 }
 0x167   : > { %v1382_v28 = vsel %vm10580_vm0, %v6909_v47, %v1357_v38  ;;  %v1383_v39 = vsel %vm10581_vm11, %v1357_v38, %v7198_v36  ;;  %vm10582_vm11 = vcmask 457728  }
 0x168   : > { %938 = vrot.lane.b32.xlu1 %v6704_v61, %s6155_s27  ;;  %5190 = vmatprep.subr.msk.mxu1 %vm1078_vm4, %v1383_v39  ;;  %v867_v13 = vsel %vm10582_vm11, %v6869_v19, %v851_v45  ;;  %vm10584_vm14 = vmmov %vm10582_vm11  ;;  %v10586_v19 = vld [vmem:[#allocation12_spill] sm:$0xff]  ;;  %vm10593_vm11 = vcmask 1046528  }
 0x169   : > { %5191 = vmatpush1.msk.msra.mxu1 %vm1078_vm4, %v1382_v28  ;;  %v868_v14 = vsel %vm10584_vm14, %v851_v45, %v7170_v62  ;;  %v1151_v3 = vsel %vm1078_vm4, %v10586_v19, %v829_v51  ;;  %vm10591_vm14 = vcmask 162816  }
 0x16a   : > { %v7208_v11 = vpop.permute.xlu0 %550  ;;  %v7210_v58 = vpop.permute.xlu1 %548 }
 0x16e   : > { %v7212_v41 = vpop.permute.xlu0 %969  ;;  %v968_v15 = vpop.permute.xlu1 %967 }
 0x16f   : > { %v985_v39 = vsel %vm981_vm9, %v968_v15, %v7212_v41 }
 0x172   : > { %v7214_v35 = vpop.permute.xlu0 %589  ;;  %v7216_v47 = vpop.permute.xlu1 %587 }
 0x176   : > { %v7218_v49 = vpop.permute.xlu0 %618  ;;  %v617_v43 = vpop.permute.xlu1 %616 }
 0x177   : > { %v634_v24 = vsel %vm630_vm1, %v617_v43, %v7218_v49  ;;  %v633_v18 = vsel %vm630_vm1, %v6937_v52, %v617_v43  ;;  %v906_v52 = vsel %vm903_vm5, %v6895_v16, %v890_v59  ;;  %v1160_v16 = vsel %vm1088_vm6, %v1151_v3, %v868_v14  ;;  %v10588_v43 = vld [vmem:[#allocation15_spill] sm:$0xff] }
 0x178   : > { %v1112_v56 = vsel %vm1108_vm10, %v6823_v60, %v634_v24  ;;  %v946_v60 = vsel %vm942_vm7, %v929_v29, %v7192_v2  ;;  %v1111_v45 = vsel %vm1108_vm10, %v10587_v25, %v633_v18  ;;  %v984_v59 = vsel %vm981_vm9, %v6926_v53, %v968_v15 }
 0x179   : > { %v1122_v9 = vsel %vm1118_vm12, %v1112_v56, %v10588_v43  ;;  %v1169_v24 = vsel %vm1098_vm8, %v1160_v16, %v907_v34  ;;  %v10590_v56 = vld [vmem:[#allocation16_spill] sm:$0xff]  ;;  %v10595_v34 = vld [vmem:[#allocation6_spill] sm:$0xff] }
 0x17a   : > { %v7220_v17 = vpop.permute.xlu0 %1008  ;;  %v1007_v12 = vpop.permute.xlu1 %1006  ;;  %v1178_v53 = vsel %vm1108_vm10, %v1169_v24, %v946_v60 }
 0x17b   : > { %v1023_v0 = vsel %vm10545_vm15, %v6991_v42, %v1007_v12  ;;  %v1024_v51 = vsel %vm10545_vm15, %v1007_v12, %v7220_v17  ;;  %v1132_v42 = vsel %vm1128_vm13, %v1122_v9, %v10590_v56  ;;  %vm10609_vm15 = vcmask 1022976  }
 0x17e   : > { %v7228_v63 = vpop.permute.xlu0 %1338  ;;  %v1337_v10 = vpop.permute.xlu1 %1336 }
 0x17f   : > { %v1374_v31 = vsel %vm10580_vm0, %v1337_v10, %v7228_v63  ;;  %v1373_v1 = vsel %vm10583_vm3, %v7035_v7, %v1337_v10  ;;  %v1159_v7 = vsel %vm1088_vm6, %v1150_v46, %v867_v13  ;;  %v10589_v13 = vld [vmem:[#allocation4_spill] sm:$0xff]  ;;  %vm10592_vm3 = vmmov %vm10591_vm14 }
 0x180   : > { %1522 = vmatprep.subr.mxu1 %v1374_v31  ;;  %v1168_v29 = vsel %vm1098_vm8, %v1159_v7, %v906_v52  ;;  %v1121_v15 = vsel %vm1118_vm12, %v1111_v45, %v10589_v13  ;;  %v1187_v31 = vsel %vm1118_vm12, %v1178_v53, %v985_v39  ;;  %vm10594_vm0 = vmmov %vm10593_vm11  ;;  %v10598_v45 = vld [vmem:[#allocation7_spill] sm:$0xff] }
 0x181   : > { %1523 = vmatpush1.msra.mxu1 %v1373_v1  ;;  %v1177_v10 = vsel %vm1108_vm10, %v1168_v29, %v945_v26  ;;  %v1196_v46 = vsel %vm1128_vm13, %v1187_v31, %v1024_v51  ;;  %v1131_v7 = vsel %vm1128_vm13, %v1121_v15, %v10595_v34 }
 0x182   : > { %v7257_v38 = vpop.permute.xlu0 %817  ;;  %v7259_v28 = vpop.permute.xlu1 %815  ;;  %v1186_v18 = vsel %vm1118_vm12, %v1177_v10, %v984_v59 }
 0x183   : > { %v1195_v19 = vsel %vm1128_vm13, %v1186_v18, %v1023_v0  ;;  %v10603_v18 = vld [vmem:[#allocation8_spill] sm:$0xff] }
 0x186   : > { %v7280_v1 = vpop.permute.xlu0 %1047  ;;  %v1046_v14 = vpop.permute.xlu1 %1045 }
 0x187   : > { %v1062_v12 = vsel %vm10591_vm14, %v7111_v23, %v1046_v14  ;;  %v1063_v6 = vsel %vm10592_vm3, %v1046_v14, %v7280_v1  ;;  %v10596_v23 = vld [vmem:[#allocation18_spill] sm:$0xff]  ;;  %vm10597_vm14 = vmmov %vm10594_vm0  ;;  %v10606_v14 = vld [vmem:[#allocation9_spill] sm:$0xff] }
 0x188   : > { %v1205_v3 = vsel %vm10593_vm11, %v1196_v46, %v1063_v6  ;;  %v1204_v52 = vsel %vm10594_vm0, %v1195_v19, %v1062_v12  ;;  %v1142_v25 = vsel %vm10597_vm14, %v1132_v42, %v10596_v23  ;;  %vm10599_vm3 = vmmov %vm10594_vm0  ;;  %vm10600_vm11 = vcmask 203776  }
 0x189   : > { %1524 = vmatprep.subr.mxu1 %v1205_v3  ;;  %v1141_v16 = vsel %vm10599_vm3, %v1131_v7, %v10598_v45  ;;  %vm10601_vm0 = vcmask 728064   ;;  %vm10604_vm3 = vcmask 1039360   ;;  %v599_v46 = vsel %vm10609_vm15, %v6699_v57, %v7216_v47 }
 0x18a   : > { %v7294_v26 = vpop.permute.xlu0 %1235  ;;  %1525 = vmatpush1.msra.mxu1 %v1204_v52  ;;  %v1234_v60 = vpop.permute.xlu1 %1233  ;;  %vm10602_vm14 = vmmov %vm10601_vm0 }
 0x18b   : > { %1526 = vmatprep.subr.mxu1 %v1142_v25 }
 0x18c   : > { %1527 = vmatpush1.msra.mxu1 %v1141_v16 }
 0x18d   : > { %5192 = vmatmul.mubr.msk.f32.vlgmr.msra.gmra.mxu1 %vm10600_vm11, %v7165_v37  ;;  %vm10605_vm11 = vmmov %vm10604_vm3 }
 0x18e   : > { %v7302_v59 = vpop.permute.xlu0 %667  ;;  %v666_v39 = vpop.permute.xlu1 %665  ;;  %1702 = vmatprep.mubr.f32.mxu1 %v10578_v40  ;;  %v522_v31 = vsel %vm10605_vm11, %v7186_v33, %v7184_v20  ;;  %vm10611_vm11 = vcmask 760832  }
 0x18f   : > { %v1246_v3 = vsel %vm10611_vm11, %v6719_v5, %v1234_v60 }
 0x192   : > { %v7305_v43 = vpop.permute.xlu0 %856  ;;  %v7307_v9 = vpop.permute.xlu1 %854 }
 0x196   : > { %v7309_v29 = vpop.permute.xlu0 %706  ;;  %v705_v24 = vpop.permute.xlu1 %704 }
 0x19a   : > { %v7311_v0 = vpop.permute.xlu0 %784  ;;  %v783_v51 = vpop.permute.xlu1 %782 }
 0x19b   : > { %v7315_v10 = vsel %vm10601_vm0, %v783_v51, %v7311_v0  ;;  %v7319_v53 = vsel %vm10602_vm14, %v6752_v4, %v783_v51  ;;  %v521_v4 = vsel %vm10604_vm3, %v10603_v18, %v7186_v33  ;;  %vm10607_vm0 = vcmask 1031168   ;;  %vm10610_vm3 = vmmov %vm10609_vm15 }
 0x19c   : > { %1366 = vrot.lane.b32.xlu1 %v7315_v10, %s6156_s28  ;;  %1364 = vrot.lane.b32.xlu0 %v7319_v53, %s6156_s28  ;;  %v560_v56 = vsel %vm10607_vm0, %v10606_v14, %v7210_v58  ;;  %vm10608_vm14 = vmmov %vm10607_vm0  ;;  %v1086_v19 = vsel %vm1078_vm4, %v10579_v32, %v521_v4  ;;  %v600_v33 = vsel %vm10610_vm3, %v7216_v47, %v7214_v35  ;;  %vm10613_vm0 = vcmask 752640  }
 0x19d   : > { %v561_v6 = vsel %vm10608_vm14, %v7210_v58, %v7208_v11  ;;  %v1087_v58 = vsel %vm1078_vm4, %v6704_v61, %v522_v31  ;;  %v1096_v57 = vsel %vm1088_vm6, %v1086_v19, %v560_v56  ;;  %vm10612_vm15 = vmmov %vm10611_vm11  ;;  %v7372_v5 = vsel %vm10613_vm0, %v6727_v22, %v666_v39 }
 0x19e   : > { %v7325_v13 = vpop.permute.xlu0 %895  ;;  %v7327_v15 = vpop.permute.xlu1 %893  ;;  %v1247_v52 = vsel %vm10612_vm15, %v1234_v60, %v7294_v26  ;;  %v1097_v34 = vsel %vm1088_vm6, %v1087_v58, %v561_v6  ;;  %v7368_v47 = vsel %vm1098_vm8, %v1096_v57, %v599_v46  ;;  %vm10614_vm14 = vmmov %vm10613_vm0  ;;  %vm10615_vm3 = vcmask 744448   ;;  %v10624_v57 = vld [vmem:[#allocation10_spill] sm:$0xff] }
 0x19f   : > { %v7376_v7 = vsel %vm10614_vm14, %v666_v39, %v7302_v59  ;;  %v7381_v45 = vsel %vm1098_vm8, %v1097_v34, %v600_v33  ;;  %v1287_v60 = vsel %vm1108_vm10, %v7368_v47, %v1246_v3  ;;  %v7387_v16 = vsel %vm10615_vm3, %v6733_v27, %v705_v24  ;;  %vm10616_vm11 = vmmov %vm10615_vm3 }
 0x1a0   : > { %977 = vrot.lane.b32.xlu1 %v6704_v61, %s6157_s29  ;;  %975 = vrot.lane.b32.xlu0 %v10579_v32, %s6157_s29  ;;  %v7391_v22 = vsel %vm10616_vm11, %v705_v24, %v7309_v29  ;;  %v1288_v39 = vsel %vm1108_vm10, %v7381_v45, %v1247_v52  ;;  %vm10617_vm15 = vcmask 736256   ;;  %v1297_v27 = vsel %vm1118_vm12, %v1287_v60, %v7372_v5 }
 0x1a1   : > { %vm10618_vm0 = vmmov %vm10617_vm15  ;;  %v1298_v24 = vsel %vm1118_vm12, %v1288_v39, %v7376_v7  ;;  %v1307_v14 = vsel %vm1128_vm13, %v1297_v27, %v7387_v16  ;;  %vm10619_vm14 = vcmask 1046528   ;;  %vm10621_vm11 = vcmask 154624   ;;  %v10627_v27 = vld [vmem:[#allocation11_spill] sm:$0xff] }
 0x1a2   : > { %v7342_v42 = vpop.permute.xlu0 %745  ;;  %v744_v12 = vpop.permute.xlu1 %743  ;;  %v1308_v31 = vsel %vm1128_vm13, %v1298_v24, %v7391_v22  ;;  %vm10620_vm3 = vmmov %vm10619_vm14  ;;  %v830_v58 = vsel %vm825_vm2, %v7157_v8, %v7259_v28  ;;  %v908_v34 = vsel %vm903_vm5, %v7178_v30, %v7327_v15 }
 0x1a3   : > { %v7397_v51 = vsel %vm10617_vm15, %v6773_v21, %v744_v12  ;;  %v7401_v18 = vsel %vm10618_vm0, %v744_v12, %v7342_v42  ;;  %vm10622_vm15 = vmmov %vm10621_vm11  ;;  %vm10625_vm0 = vcmask 457728  }
 0x1a4   : > { %626 = vrot.lane.b32.xlu1 %v6704_v61, %s10561_s30  ;;  %624 = vrot.lane.b32.xlu0 %v10579_v32, %s10561_s30  ;;  %v1318_v56 = vsel %vm10619_vm14, %v1308_v31, %v7401_v18  ;;  %v1317_v12 = vsel %vm10620_vm3, %v1307_v14, %v7397_v51  ;;  %vm10626_vm14 = vmmov %vm10625_vm0 }
 0x1a5   : > { %v870_v8 = vsel %vm10626_vm14, %v7307_v9, %v7305_v43  ;;  %vm10629_vm3 = vmmov %vm10621_vm11  ;;  %vm10635_vm14 = vcmask 162816  }
 0x1a6   : > { %v7378_v23 = vpop.permute.xlu0 %934  ;;  %v933_v25 = vpop.permute.xlu1 %932 }
 0x1a8   : > { %1016 = vrot.lane.b32.xlu1 %v6704_v61, %s6159_s17  ;;  %1014 = vrot.lane.b32.xlu0 %v10579_v32, %s6159_s17 }
 0x1aa   : > { %v7411_v4 = vpop.permute.xlu0 %1362  ;;  %v1361_v21 = vpop.permute.xlu1 %1360 }
 0x1ab   : > { %v1385_v6 = vsel %vm10621_vm11, %v1361_v21, %v7411_v4  ;;  %v1384_v46 = vsel %vm10622_vm15, %v7198_v36, %v1361_v21  ;;  %vm10630_vm11 = vmmov %vm10629_vm3  ;;  %vm10631_vm15 = vcmask 424960  }
 0x1ac   : > { %1346 = vrot.lane.b32.xlu1 %v1318_v56, %s6156_s28  ;;  %1344 = vrot.lane.b32.xlu0 %v1317_v12, %s6156_s28  ;;  %v10628_v56 = vld [vmem:[#allocation13_spill] sm:$0xff] }
 0x1ad   : > { %5193 = vmatprep.subr.msk.mxu0 %vm1078_vm4, %v1385_v6 }
 0x1ae   : > { %5194 = vmatpush1.msk.msra.mxu0 %vm1078_vm4, %v1384_v46  ;;  %v7429_v19 = vpop.permute.xlu0 %973  ;;  %v972_v33 = vpop.permute.xlu1 %971 }
 0x1af   : > { %v986_v14 = vsel %vm981_vm9, %v7212_v41, %v972_v33 }
 0x1b0   : > { %1055 = vrot.lane.b32.xlu1 %v6704_v61, %s10623_s14  ;;  %1053 = vrot.lane.b32.xlu0 %v10579_v32, %s10623_s14  ;;  %v831_v61 = vsel %vm825_vm2, %v7259_v28, %v7257_v38  ;;  %v869_v32 = vsel %vm10625_vm0, %v7170_v62, %v7307_v9  ;;  %v1152_v28 = vsel %vm1078_vm4, %v10627_v27, %v830_v58  ;;  %vm10632_vm0 = vmmov %vm10631_vm15 }
 0x1b1   : > { %v1153_v24 = vsel %vm1078_vm4, %v6969_v48, %v831_v61  ;;  %v1161_v21 = vsel %vm1088_vm6, %v1152_v28, %v869_v32  ;;  %v947_v48 = vsel %vm942_vm7, %v7192_v2, %v933_v25 }
 0x1b2   : > { %v7435_v3 = vpop.permute.xlu0 %622  ;;  %v621_v36 = vpop.permute.xlu1 %620  ;;  %v1162_v30 = vsel %vm1088_vm6, %v1153_v24, %v870_v8  ;;  %v1170_v31 = vsel %vm1098_vm8, %v1161_v21, %v908_v34 }
 0x1b3   : > { %v636_v52 = vsel %vm630_vm1, %v621_v36, %v7435_v3  ;;  %v635_v62 = vsel %vm630_vm1, %v7218_v49, %v621_v36  ;;  %v909_v49 = vsel %vm903_vm5, %v7327_v15, %v7325_v13  ;;  %v987_v15 = vsel %vm981_vm9, %v972_v33, %v7429_v19 }
 0x1b4   : > { %862 = vrot.lane.b32.xlu1 %v10624_v57, %s6153_s23  ;;  %823 = vrot.lane.b32.xlu0 %v10624_v57, %s6152_s22  ;;  %v1114_v9 = vsel %vm1108_vm10, %v7014_v55, %v636_v52  ;;  %v948_v55 = vsel %vm942_vm7, %v933_v25, %v7378_v23  ;;  %v1113_v12 = vsel %vm1108_vm10, %v10628_v56, %v635_v62  ;;  %s6166_s22 = smov 109   ;;  %s6167_s23 = smov 111  }
 0x1b5   : > { %v1124_v25 = vsel %vm1118_vm12, %v1114_v9, %v7002_v44  ;;  %v1171_v41 = vsel %vm1098_vm8, %v1162_v30, %v909_v49  ;;  %v1179_v33 = vsel %vm1108_vm10, %v1170_v31, %v947_v48  ;;  %v10639_v49 = vld [vmem:[#allocation17_spill] sm:$0xff] }
 0x1b6   : > { %v7458_v60 = vpop.permute.xlu0 %1012  ;;  %v1011_v39 = vpop.permute.xlu1 %1010  ;;  %v1180_v32 = vsel %vm1108_vm10, %v1171_v41, %v948_v55  ;;  %v1188_v52 = vsel %vm1118_vm12, %v1179_v33, %v986_v14  ;;  %v10641_v14 = vld [vmem:[#allocation19_spill] sm:$0xff] }
 0x1b7   : > { %v1025_v58 = vsel %vm10631_vm15, %v7220_v17, %v1011_v39  ;;  %v1026_v61 = vsel %vm10632_vm0, %v1011_v39, %v7458_v60  ;;  %v1189_v8 = vsel %vm1118_vm12, %v1180_v32, %v987_v15  ;;  %v10634_v39 = vld [vmem:[#allocation23_spill] sm:$0xff]  ;;  %v1277_v15 = vsel %vm1078_vm4, %v10624_v57, %v7184_v20 }
 0x1b8   : > { %940 = vrot.lane.b32.xlu1 %v10624_v57, %s6155_s27  ;;  %901 = vrot.lane.b32.xlu0 %v10624_v57, %s6154_s24  ;;  %v1134_v27 = vsel %vm1128_vm13, %v1124_v25, %v10634_v39  ;;  %v1198_v24 = vsel %vm1128_vm13, %v1189_v8, %v1026_v61  ;;  %v1197_v21 = vsel %vm1128_vm13, %v1188_v52, %v1025_v58  ;;  %s6168_s24 = smov 110   ;;  %s6169_s27 = smov 80  }
 0x1ba   : > { %v7486_v6 = vpop.permute.xlu0 %1342  ;;  %v1341_v46 = vpop.permute.xlu1 %1340 }
 0x1bb   : > { %v1376_v36 = vsel %vm10629_vm3, %v1341_v46, %v7486_v6  ;;  %v1375_v2 = vsel %vm10630_vm11, %v7228_v63, %v1341_v46  ;;  %v10633_v63 = vld [vmem:[#allocation14_spill] sm:$0xff]  ;;  %vm10636_vm3 = vmmov %vm10635_vm14  ;;  %vm10637_vm11 = vcmask 1046528  }
 0x1bc   : > { %979 = vrot.lane.b32.xlu1 %v10624_v57, %s6157_s29  ;;  %1593 = vmatprep.subr.mxu0 %v1376_v36  ;;  %v1123_v44 = vsel %vm1118_vm12, %v1113_v12, %v10633_v63  ;;  %vm10638_vm15 = vmmov %vm10637_vm11  ;;  %s6173_s29 = smov 95  }
 0x1bd   : > { %1594 = vmatpush1.msra.mxu0 %v1375_v2  ;;  %v1133_v31 = vsel %vm1128_vm13, %v1123_v44, %v10639_v49  ;;  %vm10640_vm0 = vmmov %vm10637_vm11  ;;  %v1278_v2 = vsel %vm1088_vm6, %v1277_v15, %v7208_v11 }
 0x1be   : > { %v7509_v17 = vpop.permute.xlu0 %1051  ;;  %v1050_v34 = vpop.permute.xlu1 %1049  ;;  %v1144_v55 = vsel %vm10640_vm0, %v1134_v27, %v7031_v54  ;;  %v1279_v25 = vsel %vm1098_vm8, %v1278_v2, %v7214_v35 }
 0x1bf   : > { %v1064_v28 = vsel %vm10635_vm14, %v7280_v1, %v1050_v34  ;;  %v1065_v62 = vsel %vm10636_vm3, %v1050_v34, %v7509_v17  ;;  %vm10642_vm14 = vmmov %vm10640_vm0  ;;  %vm10643_vm3 = vcmask 203776   ;;  %vm10546_vm0 = vmmov 0  }
 0x1c0   : > { %1018 = vrot.lane.b32.xlu1 %v10624_v57, %s6159_s17  ;;  %v1207_v9 = vsel %vm10637_vm11, %v1198_v24, %v1065_v62  ;;  %v1206_v30 = vsel %vm10638_vm15, %v1197_v21, %v1064_v28  ;;  %v1143_v56 = vsel %vm10642_vm14, %v1133_v31, %v10641_v14  ;;  %vm10644_vm11 = vcmask 760832   ;;  %v10654_v14 = vld [vmem:[#allocation20_spill] sm:$0xff]  ;;  %s6165_s17 = smov 112  }
 0x1c1   : > { %1595 = vmatprep.subr.mxu0 %v1207_v9  ;;  %vm10645_vm15 = vcmask 728064   ;;  %vm10646_vm14 = vcmask 752640  }
 0x1c2   : > { %v1260_v48 = vpop.permute.xlu0 %1259  ;;  %1596 = vmatpush1.msra.mxu0 %v1206_v30  ;;  %v1238_v1 = vpop.permute.xlu1 %1237 }
 0x1c3   : > { %1597 = vmatprep.subr.mxu0 %v1144_v55  ;;  %v1248_v54 = vsel %vm10644_vm11, %v7294_v26, %v1238_v1  ;;  %v1261_v20 = vsel %vm10646_vm14, %v7302_v59, %v1260_v48  ;;  %vm10648_vm11 = vcmask 736256   ;;  %v441_v59 = vld [vmem:[%s10478_s2] sm:$0x3f]  ;;  %vm10650_vm14 = vcmask 154624  }
 0x1c4   : > { %1057 = vrot.lane.b32.xlu1 %v10624_v57, %s10623_s14  ;;  %1598 = vmatpush1.msra.mxu0 %v1143_v56  ;;  %v1289_v26 = vsel %vm1108_vm10, %v1279_v25, %v1248_v54  ;;  %s6174_s14 = smov 108  }
 0x1c5   : > { %5195 = vmatmul.mubr.msk.f32.vlgmr.msra.gmra.mxu0 %vm10643_vm3, %v7165_v37  ;;  %5659 = vmatprep.subr.mxu0 %v10578_v40  ;;  %vm10647_vm3 = vcmask 744448   ;;  %v1299_v35 = vsel %vm1118_vm12, %v1289_v26, %v1261_v20 }
 0x1c6   : > { %v1275_v12 = vpop.permute.xlu0 %1274  ;;  %v1265_v46 = vpop.permute.xlu1 %1264  ;;  %5667 = vmatprep.mubr.msk.f32.mxu0 %vm10546_vm0, %v10578_v40 }
 0x1c7   : > { %v1276_v36 = vsel %vm10645_vm15, %v7311_v0, %v1275_v12  ;;  %v1266_v0 = vsel %vm10647_vm3, %v7309_v29, %v1265_v46  ;;  %vm10649_vm15 = vcmask 1046528   ;;  %vm10651_vm3 = vmmov %vm10650_vm14 }
 0x1c8   : > { %1368 = vrot.lane.b32.xlu0 %v1276_v36, %s6156_s28  ;;  %v1309_v58 = vsel %vm1128_vm13, %v1299_v35, %v1266_v0 }
 0x1ca   : > { %v1270_v41 = vpop.permute.xlu1 %1269  ;;  %v820_v29 = vpop.permute.xlu0 %819 }
 0x1cb   : > { %v1271_v11 = vsel %vm10648_vm11, %v7342_v42, %v1270_v41  ;;  %v832_v9 = vsel %vm825_vm2, %v7257_v38, %v820_v29  ;;  %vm10652_vm11 = vcmask 457728  }
 0x1cc   : > { %628 = vrot.lane.b32.xlu0 %v10624_v57, %s10561_s30  ;;  %v1319_v61 = vsel %vm10649_vm15, %v1309_v58, %v1271_v11  ;;  %vm10653_vm15 = vmmov %vm10652_vm11  ;;  %v1154_v38 = vsel %vm1078_vm4, %v10654_v14, %v832_v9  ;;  %v10664_v9 = vld [vmem:[#allocation24_spill] sm:$0xff] }
 0x1ce   : > { %v7564_v33 = vpop.permute.xlu1 %821  ;;  %v859_v42 = vpop.permute.xlu0 %858 }
 0x1cf   : > { %v833_v30 = vsel %vm825_vm2, %v820_v29, %v7564_v33  ;;  %v871_v49 = vsel %vm10652_vm11, %v7305_v43, %v859_v42  ;;  %vm10657_vm11 = vcmask 424960  }
 0x1d0   : > { %1348 = vrot.lane.b32.xlu0 %v1319_v61, %s6156_s28  ;;  %v1155_v56 = vsel %vm1078_vm4, %v7319_v53, %v833_v30  ;;  %v1163_v43 = vsel %vm1088_vm6, %v1154_v38, %v871_v49  ;;  %s6170_s28 = smov 94  }
 0x1d2   : > { %v7566_v32 = vpop.permute.xlu1 %860  ;;  %v898_v57 = vpop.permute.xlu0 %897 }
 0x1d3   : > { %v872_v31 = vsel %vm10653_vm15, %v859_v42, %v7566_v32  ;;  %v910_v46 = vsel %vm903_vm5, %v7325_v13, %v898_v57  ;;  %vm10658_vm15 = vmmov %vm10657_vm11 }
 0x1d4   : > { %1400 = vperm.xlu0 %6021, %v441_v59   ;;  %v1164_v15 = vsel %vm1088_vm6, %v1155_v56, %v872_v31  ;;  %v1172_v0 = vsel %vm1098_vm8, %v1163_v43, %v910_v46 }
 0x1d6   : > { %v7568_v63 = vpop.permute.xlu1 %899  ;;  %v937_v44 = vpop.permute.xlu0 %936 }
 0x1d7   : > { %v911_v54 = vsel %vm903_vm5, %v898_v57, %v7568_v63 }
 0x1da   : > { %v7570_v52 = vpop.permute.xlu1 %938 }
 0x1db   : > { %v950_v36 = vsel %vm942_vm7, %v937_v44, %v7570_v52 }
 0x20e   : > { %v1365_v8 = vpop.permute.xlu0 %1364  ;;  %v7572_v34 = vpop.permute.xlu1 %1366 }
 0x20f   : > { %v1386_v39 = vsel %vm10650_vm14, %v7411_v4, %v1365_v8  ;;  %v1387_v27 = vsel %vm10651_vm3, %v1365_v8, %v7572_v34  ;;  %vm10656_vm14 = vmmov %vm10651_vm3 }
 0x210   : > { %5196 = vmatprep.subr.msk.mxu1 %vm1078_vm4, %v1387_v27 }
 0x211   : > { %5197 = vmatpush1.msk.msra.mxu1 %vm1078_vm4, %v1386_v39 }
 0x212   : > { %v976_v28 = vpop.permute.xlu0 %975  ;;  %v7580_v62 = vpop.permute.xlu1 %977 }
 0x213   : > { %v988_v53 = vsel %vm981_vm9, %v7429_v19, %v976_v28  ;;  %v989_v13 = vsel %vm981_vm9, %v976_v28, %v7580_v62  ;;  %v1173_v19 = vsel %vm1098_vm8, %v1164_v15, %v911_v54 }
 0x214   : > { %v1182_v61 = vsel %vm1108_vm10, %v1173_v19, %v950_v36 }
 0x215   : > { %v1191_v29 = vsel %vm1118_vm12, %v1182_v61, %v989_v13 }
 0x216   : > { %v625_v24 = vpop.permute.xlu0 %624  ;;  %v7582_v21 = vpop.permute.xlu1 %626 }
 0x217   : > { %v638_v4 = vsel %vm630_vm1, %v625_v24, %v7582_v21  ;;  %v637_v55 = vsel %vm630_vm1, %v7435_v3, %v625_v24  ;;  %v949_v3 = vsel %vm942_vm7, %v7378_v23, %v937_v44 }
 0x218   : > { %v1116_v12 = vsel %vm1108_vm10, %v7368_v47, %v638_v4  ;;  %v10655_v47 = vld [vmem:[#allocation21_spill] sm:$0xff]  ;;  %v1181_v58 = vsel %vm1108_vm10, %v1172_v0, %v949_v3 }
 0x219   : > { %v1115_v2 = vsel %vm1108_vm10, %v10655_v47, %v637_v55  ;;  %v1126_v23 = vsel %vm1118_vm12, %v1116_v12, %v7372_v5  ;;  %v1190_v5 = vsel %vm1118_vm12, %v1181_v58, %v988_v53 }
 0x21a   : > { %v1015_v48 = vpop.permute.xlu0 %1014  ;;  %v7594_v1 = vpop.permute.xlu1 %1016 }
 0x21b   : > { %v1027_v11 = vsel %vm10657_vm11, %v7458_v60, %v1015_v48  ;;  %v1028_v35 = vsel %vm10658_vm15, %v1015_v48, %v7594_v1  ;;  %v1136_v60 = vsel %vm1128_vm13, %v1126_v23, %v7387_v16  ;;  %vm10662_vm11 = vcmask 1046528  }
 0x21c   : > { %v1200_v39 = vsel %vm1128_vm13, %v1191_v29, %v1028_v35  ;;  %v1199_v27 = vsel %vm1128_vm13, %v1190_v5, %v1027_v11  ;;  %vm10663_vm15 = vmmov %vm10662_vm11 }
 0x21d   : > { %vm10665_vm0 = vmmov %vm10662_vm11 }
 0x21e   : > { %v1345_v25 = vpop.permute.xlu0 %1344  ;;  %v1347_v20 = vpop.permute.xlu1 %1346  ;;  %v1146_v16 = vsel %vm10665_vm0, %v1136_v60, %v7397_v51 }
 0x21f   : > { %v1378_v26 = vsel %vm10656_vm14, %v1345_v25, %v1347_v20  ;;  %v1377_v41 = vsel %vm10651_vm3, %v7486_v6, %v1345_v25  ;;  %v10659_v6 = vld [vmem:[#allocation22_spill] sm:$0xff]  ;;  %vm10660_vm14 = vcmask 162816  }
 0x220   : > { %1664 = vmatprep.subr.mxu1 %v1378_v26  ;;  %v1125_v59 = vsel %vm1118_vm12, %v1115_v2, %v10659_v6  ;;  %vm10661_vm3 = vmmov %vm10660_vm14 }
 0x221   : > { %1665 = vmatpush1.msra.mxu1 %v1377_v41  ;;  %v1135_v30 = vsel %vm1128_vm13, %v1125_v59, %v10664_v9  ;;  %v1825_v9 = vld [vmem:[%s10479_s3 + $0x128] sm:$0xff] }
 0x222   : > { %v1054_v42 = vpop.permute.xlu0 %1053  ;;  %v1056_v57 = vpop.permute.xlu1 %1055 }
 0x223   : > { %v1066_v44 = vsel %vm10660_vm14, %v7509_v17, %v1054_v42  ;;  %v1067_v8 = vsel %vm10661_vm3, %v1054_v42, %v1056_v57  ;;  %vm10666_vm14 = vmmov %vm10665_vm0  ;;  %vm10667_vm3 = vcmask 203776   ;;  %vm10668_vm0 = vcmask 457728   ;;  %v1834_v42 = vld [vmem:[%s10479_s3 + $0x170] sm:$0xff] }
 0x224   : > { %v1209_v28 = vsel %vm10662_vm11, %v1200_v39, %v1067_v8  ;;  %v1208_v24 = vsel %vm10663_vm15, %v1199_v27, %v1066_v44  ;;  %v1145_v17 = vsel %vm10666_vm14, %v1135_v30, %v7069_v50  ;;  %vm10669_vm11 = vcmask 154624   ;;  %v1831_v39 = vld [vmem:[%s10479_s3 + $0x158] sm:$0xff]  ;;  %v1830_v27 = vld [vmem:[%s10479_s3 + $0x150] sm:$0xff]  ;;  %v1824_v30 = vld [vmem:[%s10479_s3 + $0x120] sm:$0xff] }
 0x225   : > { %1666 = vmatprep.subr.mxu1 %v1209_v28  ;;  %v1828_v28 = vld [vmem:[%s10479_s3 + $0x140] sm:$0xff]  ;;  %vm10677_vm15 = vcmask 1039360  }
 0x226   : > { %1667 = vmatpush1.msra.mxu1 %v1208_v24  ;;  %v863_v4 = vpop.permute.xlu1 %862  ;;  %v824_v31 = vpop.permute.xlu0 %823  ;;  %v1827_v24 = vld [vmem:[%s10479_s3 + $0x138] sm:$0xff] }
 0x227   : > { %1668 = vmatprep.subr.mxu1 %v1146_v16  ;;  %v834_v14 = vsel %vm825_vm2, %v7564_v33, %v824_v31  ;;  %v873_v12 = vsel %vm10668_vm0, %v7566_v32, %v863_v4  ;;  %v1822_v16 = vld [vmem:[%s10479_s3 + $0x110] sm:$0xff]  ;;  %v1821_v4 = vld [vmem:[%s10479_s3 + $0x108] sm:$0xff]  ;;  %v1816_v31 = vld [vmem:[%s10479_s3 + $0xe0] sm:$0xff] }
 0x228   : > { %1669 = vmatpush1.msra.mxu1 %v1145_v17  ;;  %v1156_v51 = vsel %vm1078_vm4, %v7315_v10, %v834_v14  ;;  %v1819_v17 = vld [vmem:[%s10479_s3 + $0xf8] sm:$0xff]  ;;  %v1812_v14 = vld [vmem:[%s10479_s3 + $0xc0] sm:$0xff] }
 0x229   : > { %5198 = vmatmul.mubr.msk.f32.vlgmr.msra.gmra.mxu1 %vm10667_vm3, %v7165_v37  ;;  %v1165_v33 = vsel %vm1088_vm6, %v1156_v51, %v873_v12  ;;  %2314 = vmatprep.subr.mxu1 %v1834_v42  ;;  %v1807_v51 = vld [vmem:[%s10479_s3 + $0x98] sm:$0xff]  ;;  %v1806_v12 = vld [vmem:[%s10479_s3 + $0x90] sm:$0xff] }
 0x22a   : > { %v941_v49 = vpop.permute.xlu1 %940  ;;  %v902_v55 = vpop.permute.xlu0 %901  ;;  %v1854_v42 = vld [vmem:[%s10479_s3 + $0x210] sm:$0xff] }
 0x22b   : > { %v912_v43 = vsel %vm903_vm5, %v7568_v63, %v902_v55  ;;  %v951_v10 = vsel %vm942_vm7, %v7570_v52, %v941_v49  ;;  %vm10671_vm5 = vcmask 162816   ;;  %vm10672_vm7 = vmmov %vm10669_vm11  ;;  %v1818_v49 = vld [vmem:[%s10479_s3 + $0xf0] sm:$0xff]  ;;  %v1813_v55 = vld [vmem:[%s10479_s3 + $0xc8] sm:$0xff] }
 0x22c   : > { %v1174_v15 = vsel %vm1098_vm8, %v1165_v33, %v912_v43  ;;  %vm10673_vm8 = vmmov %vm10666_vm14  ;;  %v1803_v43 = vld [vmem:[%s10479_s3 + $0x78] sm:$0xff]  ;;  %v1930_v33 = vld [vmem:[%s10479_s3 + $0x470] sm:$0xff] }
 0x22d   : > { %v1183_v53 = vsel %vm1108_vm10, %v1174_v15, %v951_v10  ;;  %v1801_v15 = vld [vmem:[%s10479_s3 + $0x68] sm:$0xff]  ;;  %v1927_v10 = vld [vmem:[%s10479_s3 + $0x458] sm:$0xff]  ;;  %vm10678_vm14 = vmmov %vm10677_vm15 }
 0x22e   : > { %v980_v48 = vpop.permute.xlu1 %979 }
 0x232   : > { %v1019_v38 = vpop.permute.xlu1 %1018 }
 0x236   : > { %v1058_v54 = vpop.permute.xlu1 %1057 }
 0x237   : > { %v1068_v52 = vsel %vm10671_vm5, %v1056_v57, %v1058_v54  ;;  %v1833_v57 = vld [vmem:[%s10479_s3 + $0x168] sm:$0xff]  ;;  %v1800_v54 = vld [vmem:[%s10479_s3 + $0x60] sm:$0xff] }
 0x238   : > { %2315 = vmatpush1.msra.mxu1 %v1833_v57  ;;  %v1852_v57 = vld [vmem:[%s10479_s3 + $0x200] sm:$0xff] }
 0x239   : > { %2316 = vmatprep.subr.mxu1 %v1831_v39  ;;  %v1849_v39 = vld [vmem:[%s10479_s3 + $0x1e8] sm:$0xff] }
 0x23a   : > { %v1369_v56 = vpop.permute.xlu0 %1368  ;;  %2317 = vmatpush1.msra.mxu1 %v1830_v27  ;;  %v1848_v27 = vld [vmem:[%s10479_s3 + $0x1e0] sm:$0xff] }
 0x23b   : > { %v1388_v50 = vsel %vm10669_vm11, %v7572_v34, %v1369_v56  ;;  %v990_v34 = vsel %vm981_vm9, %v7580_v62, %v980_v48  ;;  %vm10674_vm9 = vmmov %vm10673_vm8  ;;  %2318 = vmatprep.subr.mxu1 %v1828_v28  ;;  %v1815_v48 = vld [vmem:[%s10479_s3 + $0xd8] sm:$0xff]  ;;  %v1809_v56 = vld [vmem:[%s10479_s3 + $0xa8] sm:$0xff] }
 0x23c   : > { %5660 = vmatpush3.msk.msra.mxu0 %vm1078_vm4, %v1388_v50  ;;  %vm10670_vm4 = vcmask 424960   ;;  %v1192_v2 = vsel %vm1118_vm12, %v1183_v53, %v990_v34  ;;  %2319 = vmatpush1.msra.mxu1 %v1827_v24  ;;  %v1804_v50 = vld [vmem:[%s10479_s3 + $0x80] sm:$0xff]  ;;  %v1798_v34 = vld [vmem:[%s10479_s3 + $0x50] sm:$0xff] }
 0x23d   : > { %5661 = vmatprep.subr.mxu0 %v10578_v40  ;;  %v1029_v3 = vsel %vm10670_vm4, %v7594_v1, %v1019_v38  ;;  %2320 = vmatprep.subr.mxu1 %v1825_v9  ;;  %v1810_v38 = vld [vmem:[%s10479_s3 + $0xb0] sm:$0xff]  ;;  %v1792_v53 = vld [vmem:[%s10479_s3 + $0x20] sm:$0xff]  ;;  %v1845_v9 = vld [vmem:[%s10479_s3 + $0x1c8] sm:$0xff]  ;;  %vm10682_vm4 = vcmask 752640  }
 0x23e   : > { %v629_v46 = vpop.permute.xlu0 %628  ;;  %v1201_v62 = vsel %vm1128_vm13, %v1192_v2, %v1029_v3  ;;  %2321 = vmatpush1.msra.mxu1 %v1824_v30  ;;  %v1795_v3 = vld [vmem:[%s10479_s3 + $0x38] sm:$0xff]  ;;  %v1788_v2 = vld [vmem:[%s10479_s3] sm:$0xff]  ;;  %v1846_v28 = vld [vmem:[%s10479_s3 + $0x1d0] sm:$0xff] }
 0x23f   : > { %v639_v32 = vsel %vm630_vm1, %v7582_v21, %v629_v46  ;;  %v1210_v1 = vsel %vm10673_vm8, %v1201_v62, %v1068_v52  ;;  %2322 = vmatprep.subr.mxu1 %v1822_v16  ;;  %v1929_v46 = vld [vmem:[%s10479_s3 + $0x468] sm:$0xff]  ;;  %v1791_v52 = vld [vmem:[%s10479_s3 + $0x18] sm:$0xff]  ;;  %v1924_v24 = vld [vmem:[%s10479_s3 + $0x440] sm:$0xff] }
 0x240   : > { %v1117_v63 = vsel %vm1108_vm10, %v7381_v45, %v639_v32  ;;  %2323 = vmatpush1.msra.mxu1 %v1821_v4  ;;  %v1926_v32 = vld [vmem:[%s10479_s3 + $0x450] sm:$0xff]  ;;  %v1881_v62 = vld [vmem:[%s10479_s3 + $0x2e8] sm:$0xff]  ;;  %v1923_v30 = vld [vmem:[%s10479_s3 + $0x438] sm:$0xff] }
 0x241   : > { %v1127_v36 = vsel %vm1118_vm12, %v1117_v63, %v7376_v7  ;;  %v1491_v7 = vpop.f32.mrf.mxu1  ;;  %vm10675_vm12 = vmmov %vm10667_vm3  ;;  %2324 = vmatprep.subr.mxu1 %v1819_v17  ;;  %v1797_v63 = vld [vmem:[%s10479_s3 + $0x48] sm:$0xff]  ;;  %v1843_v16 = vld [vmem:[%s10479_s3 + $0x1b8] sm:$0xff] }
 0x242   : > { %v1349_v47 = vpop.permute.xlu0 %1348  ;;  %v1137_v45 = vsel %vm1128_vm13, %v1127_v36, %v7391_v22  ;;  %2325 = vmatpush1.msra.mxu1 %v1818_v49  ;;  %v1794_v36 = vld [vmem:[%s10479_s3 + $0x30] sm:$0xff]  ;;  %v1921_v4 = vld [vmem:[%s10479_s3 + $0x428] sm:$0xff]  ;;  %v1920_v49 = vld [vmem:[%s10479_s3 + $0x420] sm:$0xff] }
 0x243   : > { %v1379_v21 = vsel %vm10672_vm7, %v1347_v20, %v1349_v47  ;;  %v1147_v25 = vsel %vm10674_vm9, %v1137_v45, %v7401_v18  ;;  %v1493_v20 = vpop.f32.mrf.mxu1  ;;  %2326 = vmatprep.subr.mxu1 %v1816_v31  ;;  %v1789_v47 = vld [vmem:[%s10479_s3 + $0x8] sm:$0xff]  ;;  %v1879_v45 = vld [vmem:[%s10479_s3 + $0x2d8] sm:$0xff]  ;;  %v1842_v17 = vld [vmem:[%s10479_s3 + $0x1b0] sm:$0xff] }
 0x244   : > { %5662 = vmatpush3.msra.mxu0 %v1379_v21  ;;  %2327 = vmatpush1.msra.mxu1 %v1815_v48  ;;  %v1882_v21 = vld [vmem:[%s10479_s3 + $0x2f0] sm:$0xff]  ;;  %v1840_v48 = vld [vmem:[%s10479_s3 + $0x1a0] sm:$0xff]  ;;  %vm10679_vm3 = vmmov %vm10678_vm14 }
 0x245   : > { %5663 = vmatprep.subr.mxu0 %v10578_v40  ;;  %2328 = vmatprep.subr.mxu1 %v1813_v55  ;;  %v1918_v55 = vld [vmem:[%s10479_s3 + $0x410] sm:$0xff]  ;;  %vm10680_vm0 = vmmov %vm10679_vm3 }
 0x246   : > { %5664 = vmatpush3.msra.mxu0 %v1210_v1  ;;  %2329 = vmatpush1.msra.mxu1 %v1812_v14  ;;  %v1878_v1 = vld [vmem:[%s10479_s3 + $0x2d0] sm:$0xff]  ;;  %vm10681_vm11 = vmmov %vm10680_vm0 }
 0x247   : > { %5665 = vmatprep.subr.mxu0 %v10578_v40  ;;  %2330 = vmatprep.subr.mxu1 %v1810_v38  ;;  %vm10683_vm5 = vmmov %vm10682_vm4 }
 0x248   : > { %5666 = vmatpush3.msra.mxu0 %v1147_v25  ;;  %2331 = vmatpush1.msra.mxu1 %v1809_v56  ;;  %v1875_v25 = vld [vmem:[%s10479_s3 + $0x2b8] sm:$0xff]  ;;  %vm10684_vm7 = vmmov %vm10680_vm0 }
 0x249   : > { %5668 = vmatmul.mubr.msk.f32.vlgmr.msra.gmra.mxu0 %vm10675_vm12, %v7165_v37  ;;  %2332 = vmatprep.subr.mxu1 %v1807_v51  ;;  %v1839_v56 = vld [vmem:[%s10479_s3 + $0x198] sm:$0xff]  ;;  %v1917_v51 = vld [vmem:[%s10479_s3 + $0x408] sm:$0xff]  ;;  %vm10685_vm8 = vmmov %vm10680_vm0 }
 0x24a   : > { %2333 = vmatpush1.msra.mxu1 %v1806_v12  ;;  %2385 = vmatprep.subr.mxu0 %v1930_v33  ;;  %v1837_v12 = vld [vmem:[%s10479_s3 + $0x188] sm:$0xff]  ;;  %v1914_v33 = vld [vmem:[%s10479_s3 + $0x3f0] sm:$0xff]  ;;  %vm10686_vm9 = vmmov %vm10682_vm4 }
 0x24b   : > { %2334 = vmatprep.subr.mxu1 %v1804_v50  ;;  %2386 = vmatpush1.msra.mxu0 %v1929_v46  ;;  %v1915_v50 = vld [vmem:[%s10479_s3 + $0x3f8] sm:$0xff]  ;;  %vm10687_vm12 = vmmov %vm10682_vm4 }
 0x24c   : > { %2335 = vmatpush1.msra.mxu1 %v1803_v43  ;;  %2387 = vmatprep.subr.mxu0 %v1927_v10  ;;  %v1836_v43 = vld [vmem:[%s10479_s3 + $0x180] sm:$0xff] }
 0x24d   : > { %v1562_v13 = vpop.f32.mrf.mxu1  ;;  %2336 = vmatprep.subr.mxu1 %v1801_v15  ;;  %2388 = vmatpush1.msra.mxu0 %v1926_v32  ;;  %v1912_v15 = vld [vmem:[%s10479_s3 + $0x3e0] sm:$0xff] }
 0x24e   : > { %2337 = vmatpush1.msra.mxu1 %v1800_v54  ;;  %2389 = vmatprep.subr.mxu0 %v1924_v24  ;;  %v1968_v24 = vld [vmem:[%s10479_s3 + $0x5a0] sm:$0xff] }
 0x24f   : > { %v7694_v26 = vpop.permute.xlu0 %1400  ;;  %v1564_v22 = vpop.f32.mrf.mxu1  ;;  %2338 = vmatprep.subr.mxu1 %v1798_v34  ;;  %2390 = vmatpush1.msra.mxu0 %v1923_v30  ;;  %v1911_v34 = vld [vmem:[%s10479_s3 + $0x3d8] sm:$0xff]  ;;  %v1965_v30 = vld [vmem:[%s10479_s3 + $0x588] sm:$0xff] }
 0x250   : > { %v1565_v41 = vadd.f32 %v1564_v22, %v7694_v26  ;;  %v1494_v23 = vadd.f32 %v1493_v20, %v7694_v26  ;;  %v1563_v0 = vadd.f32 %v1562_v13, %v7694_v26  ;;  %v1492_v19 = vadd.f32 %v1491_v7, %v7694_v26  ;;  %2339 = vmatpush1.msra.mxu1 %v1797_v63  ;;  %v1876_v7 = vld [vmem:[%s10479_s3 + $0x2c0] sm:$0xff]  ;;  %v1873_v20 = vld [vmem:[%s10479_s3 + $0x2a8] sm:$0xff]  ;;  %v1870_v22 = vld [vmem:[%s10479_s3 + $0x290] sm:$0xff] }
 0x251   : > { %2340 = vmatprep.subr.mxu1 %v1795_v3  ;;  %v1872_v13 = vld [vmem:[%s10479_s3 + $0x2a0] sm:$0xff]  ;;  %2391 = vmatprep.subr.mxu0 %v1921_v4  ;;  %v1909_v63 = vld [vmem:[%s10479_s3 + $0x3c8] sm:$0xff]  ;;  %v1962_v4 = vld [vmem:[%s10479_s3 + $0x570] sm:$0xff] }
 0x252   : > { %6058 = vtanh.f32 %v1565_v41  ;;  %2341 = vmatpush1.msra.mxu1 %v1794_v36  ;;  %v1869_v41 = vld [vmem:[%s10479_s3 + $0x288] sm:$0xff]  ;;  %2392 = vmatpush1.msra.mxu0 %v1920_v49  ;;  %v1908_v3 = vld [vmem:[%s10479_s3 + $0x3c0] sm:$0xff]  ;;  %v1906_v36 = vld [vmem:[%s10479_s3 + $0x3b0] sm:$0xff] }
 0x253   : > { %6060 = vtanh.f32 %v1494_v23  ;;  %2342 = vmatprep.subr.mxu1 %v1792_v53  ;;  %v1867_v23 = vld [vmem:[%s10479_s3 + $0x278] sm:$0xff]  ;;  %2393 = vmatprep.subr.mxu0 %v1918_v55 }
 0x254   : > { %6062 = vtanh.f32 %v1563_v0  ;;  %2343 = vmatpush1.msra.mxu1 %v1791_v52  ;;  %v1866_v0 = vld [vmem:[%s10479_s3 + $0x270] sm:$0xff]  ;;  %2394 = vmatpush1.msra.mxu0 %v1917_v51  ;;  %v1959_v49 = vld [vmem:[%s10479_s3 + $0x558] sm:$0xff]  ;;  %v1953_v51 = vld [vmem:[%s10479_s3 + $0x528] sm:$0xff] }
 0x255   : > { %6064 = vtanh.f32 %v1492_v19  ;;  %2344 = vmatprep.subr.mxu1 %v1789_v47  ;;  %v1864_v19 = vld [vmem:[%s10479_s3 + $0x260] sm:$0xff]  ;;  %2395 = vmatprep.subr.mxu0 %v1915_v50  ;;  %v1905_v47 = vld [vmem:[%s10479_s3 + $0x3a8] sm:$0xff]  ;;  %v1950_v50 = vld [vmem:[%s10479_s3 + $0x510] sm:$0xff] }
 0x256   : > { %2345 = vmatpush1.msra.mxu1 %v1788_v2  ;;  %2396 = vmatpush1.msra.mxu0 %v1914_v33  ;;  %v1947_v33 = vld [vmem:[%s10479_s3 + $0x4f8] sm:$0xff] }
 0x257   : > { %2346 = vmatprep.subr.mxu1 %v1882_v21  ;;  %2397 = vmatprep.subr.mxu0 %v1912_v15  ;;  %v1945_v15 = vld [vmem:[%s10479_s3 + $0x4e8] sm:$0xff] }
 0x258   : > { %2347 = vmatpush2.msra.mxu1 %v1881_v62  ;;  %2398 = vmatpush1.msra.mxu0 %v1911_v34  ;;  %v1941_v34 = vld [vmem:[%s10479_s3 + $0x4c8] sm:$0xff] }
 0x259   : > { %2348 = vmatprep.subr.mxu1 %v1879_v45  ;;  %2399 = vmatprep.subr.mxu0 %v1909_v63  ;;  %v1903_v45 = vld [vmem:[%s10479_s3 + $0x398] sm:$0xff] }
 0x25a   : > { %2349 = vmatpush2.msra.mxu1 %v1878_v1  ;;  %2400 = vmatpush1.msra.mxu0 %v1908_v3  ;;  %v1902_v1 = vld [vmem:[%s10479_s3 + $0x390] sm:$0xff]  ;;  %v1939_v63 = vld [vmem:[%s10479_s3 + $0x4b8] sm:$0xff] }
 0x25b   : > { %2350 = vmatprep.subr.mxu1 %v1876_v7  ;;  %2401 = vmatprep.subr.mxu0 %v1906_v36  ;;  %v1897_v7 = vld [vmem:[%s10479_s3 + $0x368] sm:$0xff]  ;;  %v1938_v36 = vld [vmem:[%s10479_s3 + $0x4b0] sm:$0xff] }
 0x25c   : > { %2351 = vmatpush2.msra.mxu1 %v1875_v25  ;;  %2402 = vmatpush1.msra.mxu0 %v1905_v47  ;;  %v1896_v25 = vld [vmem:[%s10479_s3 + $0x360] sm:$0xff] }
 0x25d   : > { %2352 = vmatprep.subr.mxu1 %v1873_v20  ;;  %2403 = vmatprep.subr.mxu0 %v1903_v45  ;;  %v1894_v20 = vld [vmem:[%s10479_s3 + $0x350] sm:$0xff]  ;;  %v1933_v45 = vld [vmem:[%s10479_s3 + $0x488] sm:$0xff] }
 0x25e   : > { %2353 = vmatpush2.msra.mxu1 %v1872_v13  ;;  %2404 = vmatpush1.msra.mxu0 %v1902_v1  ;;  %v1893_v13 = vld [vmem:[%s10479_s3 + $0x348] sm:$0xff] }
 0x25f   : > { %v7700_v18 = vpop.eup %6058  ;;  %2354 = vmatprep.subr.mxu1 %v1870_v22  ;;  %v1891_v22 = vld [vmem:[%s10479_s3 + $0x338] sm:$0xff] }
 0x260   : > { %v7702_v37 = vpop.eup %6060  ;;  %2355 = vmatpush2.msra.mxu1 %v1869_v41  ;;  %v1890_v41 = vld [vmem:[%s10479_s3 + $0x330] sm:$0xff] }
 0x261   : > { %v7704_v11 = vpop.eup %6062  ;;  %2356 = vmatprep.subr.mxu1 %v1867_v23  ;;  %v1888_v23 = vld [vmem:[%s10479_s3 + $0x320] sm:$0xff] }
 0x262   : > { %v7706_v35 = vpop.eup %6064  ;;  %v6022_v58 = vpack.i.bf16 %v7704_v11, %v7702_v37  ;;  %2357 = vmatpush2.msra.mxu1 %v1866_v0 }
 0x263   : > { %v6027_v61 = vpack.i.bf16 %v7706_v35, %v7700_v18  ;;  %2358 = vmatprep.subr.mxu1 %v1864_v19  ;;  %v1887_v19 = vld [vmem:[%s10479_s3 + $0x318] sm:$0xff] }
 0x264   : > { %6023 = vrot.lane.b32.xlu1 %v6022_v58, %s10676_s19  ;;  %v1863_v58 = vld [vmem:[%s10479_s3 + $0x258] sm:$0xff] }
 0x265   : > { %2359 = vmatpush2.msra.mxu1 %v1863_v58 }
 0x268   : > { %6028 = vrot.lane.b32.xlu1 %v6027_v61, %s10676_s19  ;;  %v1861_v61 = vld [vmem:[%s10479_s3 + $0x248] sm:$0xff] }
 0x269   : > { %2360 = vmatprep.subr.mxu1 %v1861_v61  ;;  %v1885_v61 = vld [vmem:[%s10479_s3 + $0x308] sm:$0xff] }
 0x285   : > { %v1633_v6 = vpop.f32.mrf.mxu0 }
 0x286   : > { %v1634_v59 = vadd.f32 %v1633_v6, %v7694_v26  ;;  %v1860_v6 = vld [vmem:[%s10479_s3 + $0x240] sm:$0xff] }
 0x287   : > { %v1635_v5 = vpop.f32.mrf.mxu0  ;;  %2361 = vmatpush2.msra.mxu1 %v1860_v6 }
 0x288   : > { %v1636_v29 = vadd.f32 %v1635_v5, %v7694_v26  ;;  %6066 = vtanh.f32 %v1634_v59  ;;  %v1858_v59 = vld [vmem:[%s10479_s3 + $0x230] sm:$0xff]  ;;  %v1857_v5 = vld [vmem:[%s10479_s3 + $0x228] sm:$0xff] }
 0x289   : > { %2362 = vmatprep.subr.mxu1 %v1858_v59  ;;  %v1884_v59 = vld [vmem:[%s10479_s3 + $0x300] sm:$0xff] }
 0x28a   : > { %6068 = vtanh.f32 %v1636_v29  ;;  %v1855_v29 = vld [vmem:[%s10479_s3 + $0x218] sm:$0xff]  ;;  %2363 = vmatpush2.msra.mxu1 %v1857_v5 }
 0x28b   : > { %2364 = vmatprep.subr.mxu1 %v1855_v29  ;;  %v1978_v29 = vld [vmem:[%s10479_s3 + $0x5f0] sm:$0xff] }
 0x28c   : > { %2365 = vmatpush2.msra.mxu1 %v1854_v42  ;;  %v1977_v42 = vld [vmem:[%s10479_s3 + $0x5e8] sm:$0xff] }
 0x28d   : > { %2366 = vmatprep.subr.mxu1 %v1852_v57  ;;  %v1975_v57 = vld [vmem:[%s10479_s3 + $0x5d8] sm:$0xff] }
 0x295   : > { %v7722_v60 = vpop.eup %6066 }
 0x297   : > { %v7724_v44 = vpop.eup %6068 }
 0x298   : > { %v6032_v8 = vpack.i.bf16 %v7724_v44, %v7722_v60 }
 0x29a   : > { %6033 = vrot.lane.b32.xlu0 %v6032_v8, %s10676_s19  ;;  %v1851_v8 = vld [vmem:[%s10479_s3 + $0x1f8] sm:$0xff] }
 0x29b   : > { %2367 = vmatpush2.msra.mxu1 %v1851_v8  ;;  %v1974_v8 = vld [vmem:[%s10479_s3 + $0x5d0] sm:$0xff] }
 0x29c   : > { %2368 = vmatprep.subr.mxu1 %v1849_v39  ;;  %v1972_v39 = vld [vmem:[%s10479_s3 + $0x5c0] sm:$0xff] }
 0x29d   : > { %2369 = vmatpush2.msra.mxu1 %v1848_v27  ;;  %v1971_v27 = vld [vmem:[%s10479_s3 + $0x5b8] sm:$0xff] }
 0x29e   : > { %2370 = vmatprep.subr.mxu1 %v1846_v28  ;;  %v1969_v28 = vld [vmem:[%s10479_s3 + $0x5a8] sm:$0xff] }
 0x29f   : > { %2371 = vmatpush2.msra.mxu1 %v1845_v9  ;;  %v1966_v9 = vld [vmem:[%s10479_s3 + $0x590] sm:$0xff] }
 0x2a0   : > { %2372 = vmatprep.subr.mxu1 %v1843_v16  ;;  %v1963_v16 = vld [vmem:[%s10479_s3 + $0x578] sm:$0xff] }
 0x2a1   : > { %2373 = vmatpush2.msra.mxu1 %v1842_v17  ;;  %v1960_v17 = vld [vmem:[%s10479_s3 + $0x560] sm:$0xff] }
 0x2a2   : > { %2374 = vmatprep.subr.mxu1 %v1840_v48  ;;  %v1957_v48 = vld [vmem:[%s10479_s3 + $0x548] sm:$0xff] }
 0x2a3   : > { %2375 = vmatpush2.msra.mxu1 %v1839_v56  ;;  %v1954_v56 = vld [vmem:[%s10479_s3 + $0x530] sm:$0xff] }
 0x2a4   : > { %2376 = vmatprep.subr.mxu1 %v1837_v12  ;;  %v1951_v12 = vld [vmem:[%s10479_s3 + $0x518] sm:$0xff] }
 0x2a5   : > { %2377 = vmatpush2.msra.mxu1 %v1836_v43  ;;  %v1948_v43 = vld [vmem:[%s10479_s3 + $0x500] sm:$0xff] }
 0x2d6   : > { %v6024_v31 = vpop.permute.xlu1 %6023 }
 0x2d7   : > { %v6026_v14 = vunpack.i.h.bf16 %v6024_v31  ;;  %v6025_v38 = vunpack.i.l.bf16 %v6024_v31 }
 0x2d9   : > { %v2233_v10 = vsel %vm10677_vm15, %v6025_v38, %v6026_v14  ;;  %vm10688_vm15 = vmmov %vm10680_vm0 }
 0x2da   : > { %v7951_v46 = vpop.permute.xlu1 %6028  ;;  %v7979_v2 = vmax.f32 %v7702_v37, %v2233_v10  ;;  %v1944_v10 = vld [vmem:[%s10479_s3 + $0x4e0] sm:$0xff] }
 0x2db   : > { %v6031_v54 = vunpack.i.h.bf16 %v7951_v46  ;;  %v6030_v32 = vunpack.i.l.bf16 %v7951_v46 }
 0x2dd   : > { %v2232_v53 = vsel %vm10678_vm14, %v6031_v54, %v6025_v38  ;;  %v2234_v52 = vsel %vm10679_vm3, %v6026_v14, %v6030_v32  ;;  %v1956_v14 = vld [vmem:[%s10479_s3 + $0x540] sm:$0xff]  ;;  %v1942_v54 = vld [vmem:[%s10479_s3 + $0x4d0] sm:$0xff]  ;;  %vm10689_vm14 = vmmov %vm10682_vm4 }
 0x2de   : > { %v7982_v21 = vmax.f32 %v7704_v11, %v2234_v52  ;;  %v7985_v62 = vmax.f32 %v7706_v35, %v2232_v53  ;;  %v1900_v11 = vld [vmem:[%s10479_s3 + $0x380] sm:$0xff]  ;;  %v1899_v35 = vld [vmem:[%s10479_s3 + $0x378] sm:$0xff]  ;;  %vm10690_vm3 = vmmov %vm10682_vm4 }
 0x2df   : > { %2405 = vmatprep.subr.mxu0 %v1900_v11  ;;  %v1936_v53 = vld [vmem:[%s10479_s3 + $0x4a0] sm:$0xff]  ;;  %v1935_v52 = vld [vmem:[%s10479_s3 + $0x498] sm:$0xff] }
 0x2e0   : > { %2267 = vrot.lane.b32.xlu0 %v7985_v62, %s6148_s18  ;;  %v6037_v37 = vpack.i.bf16 %v7982_v21, %v7979_v2  ;;  %2406 = vmatpush1.msra.mxu0 %v1899_v35 }
 0x2e1   : > { %2407 = vmatprep.subr.mxu0 %v1897_v7 }
 0x2e2   : > { %6038 = vrot.lane.b32.xlu1 %v6037_v37, %s6148_s18  ;;  %2408 = vmatpush1.msra.mxu0 %v1896_v25  ;;  %v1932_v37 = vld [vmem:[%s10479_s3 + $0x480] sm:$0xff] }
 0x2e3   : > { %2409 = vmatprep.subr.mxu0 %v1894_v20 }
 0x2e4   : > { %2410 = vmatpush1.msra.mxu0 %v1893_v13 }
 0x2e5   : > { %2411 = vmatprep.subr.mxu0 %v1891_v22  ;;  %v2026_v22 = vld [vmem:[%s10479_s3 + $0x770] sm:$0xff] }
 0x2e6   : > { %2412 = vmatpush1.msra.mxu0 %v1890_v41  ;;  %2456 = vmatprep.subr.mxu1 %v2026_v22  ;;  %v2062_v22 = vld [vmem:[%s10479_s3 + $0x890] sm:$0xff] }
 0x2e7   : > { %2413 = vmatprep.subr.mxu0 %v1888_v23 }
 0x2e8   : > { %2414 = vmatpush1.msra.mxu0 %v1887_v19 }
 0x2e9   : > { %v1704_v0 = vpop.f32.mrf.mxu1  ;;  %2415 = vmatprep.subr.mxu0 %v1885_v61 }
 0x2ea   : > { %v1705_v58 = vadd.f32 %v1704_v0, %v7694_v26  ;;  %2416 = vmatpush1.msra.mxu0 %v1884_v59  ;;  %v2025_v59 = vld [vmem:[%s10479_s3 + $0x768] sm:$0xff] }
 0x2eb   : > { %v1706_v6 = vpop.f32.mrf.mxu1  ;;  %2417 = vmatprep.subr.mxu0 %v1978_v29  ;;  %v2019_v29 = vld [vmem:[%s10479_s3 + $0x738] sm:$0xff] }
 0x2ec   : > { %v1707_v5 = vadd.f32 %v1706_v6, %v7694_v26  ;;  %6070 = vtanh.f32 %v1705_v58  ;;  %2418 = vmatpush2.msra.mxu0 %v1977_v42  ;;  %v2017_v42 = vld [vmem:[%s10479_s3 + $0x728] sm:$0xff] }
 0x2ed   : > { %2419 = vmatprep.subr.mxu0 %v1975_v57  ;;  %v2016_v57 = vld [vmem:[%s10479_s3 + $0x720] sm:$0xff] }
 0x2ee   : > { %6072 = vtanh.f32 %v1707_v5  ;;  %2420 = vmatpush2.msra.mxu0 %v1974_v8  ;;  %v2023_v5 = vld [vmem:[%s10479_s3 + $0x758] sm:$0xff]  ;;  %v2014_v8 = vld [vmem:[%s10479_s3 + $0x710] sm:$0xff] }
 0x2ef   : > { %2421 = vmatprep.subr.mxu0 %v1972_v39  ;;  %v2013_v39 = vld [vmem:[%s10479_s3 + $0x708] sm:$0xff] }
 0x2f0   : > { %2422 = vmatpush2.msra.mxu0 %v1971_v27  ;;  %v2011_v27 = vld [vmem:[%s10479_s3 + $0x6f8] sm:$0xff] }
 0x2f1   : > { %2423 = vmatprep.subr.mxu0 %v1969_v28  ;;  %v2010_v28 = vld [vmem:[%s10479_s3 + $0x6f0] sm:$0xff] }
 0x2f2   : > { %2424 = vmatpush2.msra.mxu0 %v1968_v24  ;;  %v2008_v24 = vld [vmem:[%s10479_s3 + $0x6e0] sm:$0xff] }
 0x2f3   : > { %2425 = vmatprep.subr.mxu0 %v1966_v9  ;;  %v2007_v9 = vld [vmem:[%s10479_s3 + $0x6d8] sm:$0xff] }
 0x2f4   : > { %2426 = vmatpush2.msra.mxu0 %v1965_v30  ;;  %v2005_v30 = vld [vmem:[%s10479_s3 + $0x6c8] sm:$0xff] }
 0x2f5   : > { %2427 = vmatprep.subr.mxu0 %v1963_v16  ;;  %v2004_v16 = vld [vmem:[%s10479_s3 + $0x6c0] sm:$0xff] }
 0x2f6   : > { %2428 = vmatpush2.msra.mxu0 %v1962_v4  ;;  %v2002_v4 = vld [vmem:[%s10479_s3 + $0x6b0] sm:$0xff] }
 0x2f7   : > { %2429 = vmatprep.subr.mxu0 %v1960_v17  ;;  %v2001_v17 = vld [vmem:[%s10479_s3 + $0x6a8] sm:$0xff] }
 0x2f8   : > { %2430 = vmatpush2.msra.mxu0 %v1959_v49  ;;  %v1999_v49 = vld [vmem:[%s10479_s3 + $0x698] sm:$0xff] }
 0x2f9   : > { %v8078_v31 = vpop.eup %6070  ;;  %2431 = vmatprep.subr.mxu0 %v1957_v48  ;;  %v1998_v48 = vld [vmem:[%s10479_s3 + $0x690] sm:$0xff] }
 0x2fa   : > { %2432 = vmatpush2.msra.mxu0 %v1956_v14  ;;  %v1996_v14 = vld [vmem:[%s10479_s3 + $0x680] sm:$0xff] }
 0x2fb   : > { %v8083_v55 = vpop.eup %6072  ;;  %2433 = vmatprep.subr.mxu0 %v1954_v56  ;;  %v1993_v56 = vld [vmem:[%s10479_s3 + $0x668] sm:$0xff] }
 0x2fc   : > { %v6042_v38 = vpack.i.bf16 %v8083_v55, %v8078_v31  ;;  %2434 = vmatpush2.msra.mxu0 %v1953_v51  ;;  %v1992_v51 = vld [vmem:[%s10479_s3 + $0x660] sm:$0xff] }
 0x2fd   : > { %2435 = vmatprep.subr.mxu0 %v1951_v12 }
 0x2fe   : > { %6043 = vrot.lane.b32.xlu1 %v6042_v38, %s10676_s19  ;;  %2436 = vmatpush2.msra.mxu0 %v1950_v50  ;;  %v1995_v38 = vld [vmem:[%s10479_s3 + $0x678] sm:$0xff]  ;;  %v1990_v50 = vld [vmem:[%s10479_s3 + $0x650] sm:$0xff] }
 0x2ff   : > { %2437 = vmatprep.subr.mxu0 %v1948_v43 }
 0x300   : > { %2438 = vmatpush2.msra.mxu0 %v1947_v33 }
 0x301   : > { %2439 = vmatprep.subr.mxu0 %v1945_v15  ;;  %v1989_v15 = vld [vmem:[%s10479_s3 + $0x648] sm:$0xff] }
 0x302   : > { %2440 = vmatpush2.msra.mxu0 %v1944_v10  ;;  %v1987_v10 = vld [vmem:[%s10479_s3 + $0x638] sm:$0xff] }
 0x303   : > { %2441 = vmatprep.subr.mxu0 %v1942_v54 }
 0x304   : > { %2442 = vmatpush2.msra.mxu0 %v1941_v34 }
 0x305   : > { %2443 = vmatprep.subr.mxu0 %v1939_v63  ;;  %v1986_v63 = vld [vmem:[%s10479_s3 + $0x630] sm:$0xff] }
 0x306   : > { %2444 = vmatpush2.msra.mxu0 %v1938_v36 }
 0x307   : > { %2445 = vmatprep.subr.mxu0 %v1936_v53  ;;  %v1984_v53 = vld [vmem:[%s10479_s3 + $0x620] sm:$0xff] }
 0x308   : > { %2446 = vmatpush2.msra.mxu0 %v1935_v52  ;;  %v1983_v52 = vld [vmem:[%s10479_s3 + $0x618] sm:$0xff] }
 0x309   : > { %v1775_v3 = vpop.f32.mrf.mxu0  ;;  %2447 = vmatprep.subr.mxu0 %v1933_v45  ;;  %v2074_v45 = vld [vmem:[%s10479_s3 + $0x8f0] sm:$0xff] }
 0x30a   : > { %v1776_v47 = vadd.f32 %v1775_v3, %v7694_v26  ;;  %2448 = vmatpush2.msra.mxu0 %v1932_v37  ;;  %v2071_v37 = vld [vmem:[%s10479_s3 + $0x8d8] sm:$0xff] }
 0x30b   : > { %v5669_v1 = vpop.f32.mrf.mxu0 }
 0x30c   : > { %6074 = vtanh.f32 %v1776_v47  ;;  %v8140_v11 = vpop.permute.xlu0 %6033  ;;  %v2073_v1 = vld [vmem:[%s10479_s3 + $0x8e8] sm:$0xff] }
 0x30d   : > { %v6036_v35 = vunpack.i.h.bf16 %v8140_v11  ;;  %v6035_v7 = vunpack.i.l.bf16 %v8140_v11  ;;  %v2070_v11 = vld [vmem:[%s10479_s3 + $0x8d0] sm:$0xff] }
 0x30f   : > { %v2235_v26 = vsel %vm10680_vm0, %v6030_v32, %v6035_v7  ;;  %v2236_v25 = vsel %vm10681_vm11, %v6035_v7, %v6036_v35  ;;  %v2122_v32 = vld [vmem:[%s10479_s3 + $0xa70] sm:$0xff]  ;;  %v2067_v7 = vld [vmem:[%s10479_s3 + $0x8b8] sm:$0xff]  ;;  %vm10691_vm0 = vmmov %vm10690_vm3 }
 0x310   : > { %v8151_v20 = vmax.f32 %v7700_v18, %v2235_v26  ;;  %v8154_v13 = vmax.f32 %v7722_v60, %v2236_v25  ;;  %2527 = vmatprep.subr.mxu0 %v2122_v32  ;;  %v2065_v26 = vld [vmem:[%s10479_s3 + $0x8a8] sm:$0xff]  ;;  %v2064_v25 = vld [vmem:[%s10479_s3 + $0x8a0] sm:$0xff]  ;;  %v2059_v32 = vld [vmem:[%s10479_s3 + $0x878] sm:$0xff] }
 0x311   : > { %vm10692_vm11 = vmmov %vm10691_vm0 }
 0x312   : > { %v6047_v46 = vpack.i.bf16 %v8154_v13, %v8151_v20 }
 0x314   : > { %6048 = vrot.lane.b32.xlu0 %v6047_v46, %s6148_s18  ;;  %v2061_v46 = vld [vmem:[%s10479_s3 + $0x888] sm:$0xff] }
 0x319   : > { %v8165_v18 = vpop.eup %6074 }
 0x31a   : > { %2230 = vrot.lane.b32.xlu1 %v8165_v18, %s10676_s19 }
 0x352   : > { %v2268_v0 = vpop.permute.xlu0 %2267 }
 0x354   : > { %v8169_v60 = vpop.permute.xlu1 %6038 }
 0x355   : > { %v6041_v41 = vunpack.i.h.bf16 %v8169_v60  ;;  %v6040_v23 = vunpack.i.l.bf16 %v8169_v60  ;;  %v2047_v60 = vld [vmem:[%s10479_s3 + $0x818] sm:$0xff] }
 0x357   : > { %v2285_v19 = vsel %vm10682_vm4, %v2268_v0, %v6040_v23  ;;  %v2286_v58 = vsel %vm10683_vm5, %v6040_v23, %v6041_v41  ;;  %v2058_v23 = vld [vmem:[%s10479_s3 + $0x870] sm:$0xff]  ;;  %v2056_v0 = vld [vmem:[%s10479_s3 + $0x860] sm:$0xff]  ;;  %vm10693_vm4 = vmmov 0   ;;  %vm3065_vm5 = vcmask 916480  }
 0x358   : > { %v8178_v61 = vmax.f32 %v7979_v2, %v2286_v58  ;;  %v8181_v6 = vmax.f32 %v7985_v62, %v2285_v19  ;;  %v2022_v2 = vld [vmem:[%s10479_s3 + $0x750] sm:$0xff]  ;;  %v2020_v62 = vld [vmem:[%s10479_s3 + $0x740] sm:$0xff]  ;;  %v2055_v19 = vld [vmem:[%s10479_s3 + $0x858] sm:$0xff] }
 0x35a   : > { %2378 = vmatprep.mubr.f32.mxu1 %v8178_v61 }
 0x35b   : > { %2379 = vmatmul.mubr.f32.vlgmr.msra.gmra.mxu1 %v8181_v6 }
 0x35c   : > { %2457 = vmatpush1.msra.mxu1 %v2025_v59  ;;  %v2053_v59 = vld [vmem:[%s10479_s3 + $0x848] sm:$0xff] }
 0x35d   : > { %2458 = vmatprep.subr.mxu1 %v2023_v5 }
 0x35e   : > { %2459 = vmatpush1.msra.mxu1 %v2022_v2 }
 0x35f   : > { %2460 = vmatprep.subr.mxu1 %v2020_v62  ;;  %v2052_v62 = vld [vmem:[%s10479_s3 + $0x840] sm:$0xff] }
 0x360   : > { %2461 = vmatpush1.msra.mxu1 %v2019_v29  ;;  %v2050_v29 = vld [vmem:[%s10479_s3 + $0x830] sm:$0xff] }
 0x361   : > { %2462 = vmatprep.subr.mxu1 %v2017_v42 }
 0x362   : > { %2463 = vmatpush1.msra.mxu1 %v2016_v57 }
 0x363   : > { %2464 = vmatprep.subr.mxu1 %v2014_v8  ;;  %v2049_v8 = vld [vmem:[%s10479_s3 + $0x828] sm:$0xff] }
 0x364   : > { %2465 = vmatpush1.msra.mxu1 %v2013_v39 }
 0x365   : > { %2466 = vmatprep.subr.mxu1 %v2011_v27 }
 0x366   : > { %2467 = vmatpush1.msra.mxu1 %v2010_v28  ;;  %v2046_v28 = vld [vmem:[%s10479_s3 + $0x810] sm:$0xff] }
 0x367   : > { %2468 = vmatprep.subr.mxu1 %v2008_v24 }
 0x368   : > { %2469 = vmatpush1.msra.mxu1 %v2007_v9 }
 0x369   : > { %2470 = vmatprep.subr.mxu1 %v2005_v30  ;;  %v2118_v30 = vld [vmem:[%s10479_s3 + $0xa50] sm:$0xff] }
 0x36a   : > { %2471 = vmatpush1.msra.mxu1 %v2004_v16 }
 0x36b   : > { %2472 = vmatprep.subr.mxu1 %v2002_v4  ;;  %v2116_v4 = vld [vmem:[%s10479_s3 + $0xa40] sm:$0xff] }
 0x36c   : > { %2473 = vmatpush1.msra.mxu1 %v2001_v17  ;;  %v2115_v17 = vld [vmem:[%s10479_s3 + $0xa38] sm:$0xff] }
 0x36d   : > { %2474 = vmatprep.subr.mxu1 %v1999_v49  ;;  %v2113_v49 = vld [vmem:[%s10479_s3 + $0xa28] sm:$0xff] }
 0x36e   : > { %2475 = vmatpush1.msra.mxu1 %v1998_v48  ;;  %v2041_v48 = vld [vmem:[%s10479_s3 + $0x7e8] sm:$0xff] }
 0x36f   : > { %2476 = vmatprep.subr.mxu1 %v1996_v14  ;;  %v2112_v14 = vld [vmem:[%s10479_s3 + $0xa20] sm:$0xff] }
 0x370   : > { %v8254_v12 = vpop.permute.xlu1 %6043  ;;  %2477 = vmatpush1.msra.mxu1 %v1995_v38  ;;  %v2040_v38 = vld [vmem:[%s10479_s3 + $0x7e0] sm:$0xff] }
 0x371   : > { %v6046_v43 = vunpack.i.h.bf16 %v8254_v12  ;;  %v6045_v33 = vunpack.i.l.bf16 %v8254_v12  ;;  %2478 = vmatprep.subr.mxu1 %v1993_v56  ;;  %v2110_v56 = vld [vmem:[%s10479_s3 + $0xa10] sm:$0xff]  ;;  %v2109_v12 = vld [vmem:[%s10479_s3 + $0xa08] sm:$0xff] }
 0x372   : > { %2479 = vmatpush1.msra.mxu1 %v1992_v51  ;;  %v2038_v51 = vld [vmem:[%s10479_s3 + $0x7d0] sm:$0xff] }
 0x373   : > { %v2237_v54 = vsel %vm10684_vm7, %v6036_v35, %v6045_v33  ;;  %v2238_v34 = vsel %vm10685_vm8, %v6045_v33, %v6046_v43  ;;  %2480 = vmatprep.subr.mxu1 %v1990_v50  ;;  %v2068_v35 = vld [vmem:[%s10479_s3 + $0x8c0] sm:$0xff]  ;;  %v2037_v50 = vld [vmem:[%s10479_s3 + $0x7c8] sm:$0xff]  ;;  %v2035_v33 = vld [vmem:[%s10479_s3 + $0x7b8] sm:$0xff]  ;;  %vm10696_vm7 = vcmask 1022976   ;;  %vm10697_vm8 = vcmask 1031168  }
 0x374   : > { %v8277_v3 = vmax.f32 %v7724_v44, %v2237_v54  ;;  %v8280_v36 = vmax.f32 %v8078_v31, %v2238_v34  ;;  %2481 = vmatpush1.msra.mxu1 %v1989_v15  ;;  %v1981_v44 = vld [vmem:[%s10479_s3 + $0x608] sm:$0xff]  ;;  %v1980_v31 = vld [vmem:[%s10479_s3 + $0x600] sm:$0xff]  ;;  %v2106_v15 = vld [vmem:[%s10479_s3 + $0x9f0] sm:$0xff] }
 0x375   : > { %2482 = vmatprep.subr.mxu1 %v1987_v10  ;;  %v2034_v10 = vld [vmem:[%s10479_s3 + $0x7b0] sm:$0xff]  ;;  %v2104_v54 = vld [vmem:[%s10479_s3 + $0x9e0] sm:$0xff] }
 0x376   : > { %v6052_v47 = vpack.i.bf16 %v8280_v36, %v8277_v3  ;;  %2483 = vmatpush1.msra.mxu1 %v1986_v63  ;;  %v2032_v34 = vld [vmem:[%s10479_s3 + $0x7a0] sm:$0xff]  ;;  %v2103_v63 = vld [vmem:[%s10479_s3 + $0x9d8] sm:$0xff] }
 0x377   : > { %2484 = vmatprep.subr.mxu1 %v1984_v53  ;;  %v2031_v53 = vld [vmem:[%s10479_s3 + $0x798] sm:$0xff] }
 0x378   : > { %6053 = vrot.lane.b32.xlu0 %v6052_v47, %s6148_s18  ;;  %2485 = vmatpush1.msra.mxu1 %v1983_v52  ;;  %v2101_v52 = vld [vmem:[%s10479_s3 + $0x9c8] sm:$0xff] }
 0x379   : > { %2486 = vmatprep.subr.mxu1 %v1981_v44  ;;  %v2029_v47 = vld [vmem:[%s10479_s3 + $0x788] sm:$0xff]  ;;  %v2100_v44 = vld [vmem:[%s10479_s3 + $0x9c0] sm:$0xff] }
 0x37a   : > { %2487 = vmatpush1.msra.mxu1 %v1980_v31  ;;  %v2028_v31 = vld [vmem:[%s10479_s3 + $0x780] sm:$0xff] }
 0x37b   : > { %2488 = vmatprep.subr.mxu1 %v2074_v45  ;;  %v2098_v45 = vld [vmem:[%s10479_s3 + $0x9b0] sm:$0xff] }
 0x37c   : > { %2489 = vmatpush2.msra.mxu1 %v2073_v1  ;;  %v2203_v1 = vld [vmem:[%s10479_s3 + $0xcf8] sm:$0xff] }
 0x37d   : > { %2490 = vmatprep.subr.mxu1 %v2071_v37  ;;  %v2097_v37 = vld [vmem:[%s10479_s3 + $0x9a8] sm:$0xff] }
 0x37e   : > { %2491 = vmatpush2.msra.mxu1 %v2070_v11  ;;  %v2095_v11 = vld [vmem:[%s10479_s3 + $0x998] sm:$0xff] }
 0x37f   : > { %2492 = vmatprep.subr.mxu1 %v2068_v35  ;;  %v2094_v35 = vld [vmem:[%s10479_s3 + $0x990] sm:$0xff] }
 0x380   : > { %2493 = vmatpush2.msra.mxu1 %v2067_v7  ;;  %v2092_v7 = vld [vmem:[%s10479_s3 + $0x980] sm:$0xff] }
 0x381   : > { %2494 = vmatprep.subr.mxu1 %v2065_v26  ;;  %v2091_v26 = vld [vmem:[%s10479_s3 + $0x978] sm:$0xff] }
 0x382   : > { %2495 = vmatpush2.msra.mxu1 %v2064_v25  ;;  %v2089_v25 = vld [vmem:[%s10479_s3 + $0x968] sm:$0xff] }
 0x383   : > { %2496 = vmatprep.subr.mxu1 %v2062_v22  ;;  %v2088_v22 = vld [vmem:[%s10479_s3 + $0x960] sm:$0xff] }
 0x384   : > { %2497 = vmatpush2.msra.mxu1 %v2061_v46  ;;  %v2086_v46 = vld [vmem:[%s10479_s3 + $0x950] sm:$0xff] }
 0x385   : > { %2498 = vmatprep.subr.mxu1 %v2059_v32  ;;  %v2085_v32 = vld [vmem:[%s10479_s3 + $0x948] sm:$0xff] }
 0x386   : > { %v8339_v58 = vpop.permute.xlu0 %6048  ;;  %2499 = vmatpush2.msra.mxu1 %v2058_v23  ;;  %v2083_v23 = vld [vmem:[%s10479_s3 + $0x938] sm:$0xff] }
 0x387   : > { %v6051_v5 = vunpack.i.h.bf16 %v8339_v58  ;;  %v6050_v2 = vunpack.i.l.bf16 %v8339_v58  ;;  %2500 = vmatprep.subr.mxu1 %v2056_v0  ;;  %v2082_v0 = vld [vmem:[%s10479_s3 + $0x930] sm:$0xff]  ;;  %v2200_v58 = vld [vmem:[%s10479_s3 + $0xce0] sm:$0xff] }
 0x388   : > { %2501 = vmatpush2.msra.mxu1 %v2055_v19  ;;  %v2080_v19 = vld [vmem:[%s10479_s3 + $0x920] sm:$0xff] }
 0x389   : > { %v2287_v42 = vsel %vm10686_vm9, %v6041_v41, %v6050_v2  ;;  %v2288_v57 = vsel %vm10687_vm12, %v6050_v2, %v6051_v5  ;;  %2502 = vmatprep.subr.mxu1 %v2053_v59  ;;  %v2121_v41 = vld [vmem:[%s10479_s3 + $0xa68] sm:$0xff]  ;;  %v2079_v59 = vld [vmem:[%s10479_s3 + $0x918] sm:$0xff]  ;;  %vm10698_vm9 = vmmov %vm10688_vm15  ;;  %vm3089_vm12 = vcmask 891904  }
 0x38a   : > { %v8362_v39 = vmax.f32 %v8151_v20, %v2288_v57  ;;  %v8365_v27 = vmax.f32 %v7982_v21, %v2287_v42  ;;  %2503 = vmatpush2.msra.mxu1 %v2052_v62  ;;  %v2119_v21 = vld [vmem:[%s10479_s3 + $0xa58] sm:$0xff]  ;;  %v2077_v2 = vld [vmem:[%s10479_s3 + $0x908] sm:$0xff]  ;;  %v2076_v62 = vld [vmem:[%s10479_s3 + $0x900] sm:$0xff] }
 0x38b   : > { %2504 = vmatprep.subr.mxu1 %v2050_v29  ;;  %v2170_v29 = vld [vmem:[%s10479_s3 + $0xbf0] sm:$0xff]  ;;  %v2169_v42 = vld [vmem:[%s10479_s3 + $0xbe8] sm:$0xff]  ;;  %v2167_v57 = vld [vmem:[%s10479_s3 + $0xbd8] sm:$0xff] }
 0x38c   : > { %v2231_v24 = vpop.permute.xlu1 %2230  ;;  %2449 = vmatprep.mubr.f32.mxu0 %v8362_v39  ;;  %2505 = vmatpush2.msra.mxu1 %v2049_v8  ;;  %v2166_v8 = vld [vmem:[%s10479_s3 + $0xbd0] sm:$0xff] }
 0x38d   : > { %v2239_v20 = vsel %vm10688_vm15, %v6046_v43, %v2231_v24  ;;  %v8384_v9 = vmax.f32 %v8165_v18, %v2231_v24  ;;  %2450 = vmatmul.mubr.f32.vlgmr.msra.gmra.mxu0 %v8365_v27  ;;  %2506 = vmatprep.subr.mxu1 %v2047_v60  ;;  %v2044_v18 = vld [vmem:[%s10479_s3 + $0x800] sm:$0xff]  ;;  %v2107_v43 = vld [vmem:[%s10479_s3 + $0x9f8] sm:$0xff]  ;;  %vm3081_vm15 = vcmask 900096  }
 0x38e   : > { %v8391_v16 = vmax.f32 %v8083_v55, %v2239_v20  ;;  %2528 = vmatpush1.msra.mxu0 %v2121_v41  ;;  %2507 = vmatpush2.msra.mxu1 %v2046_v28  ;;  %v2043_v55 = vld [vmem:[%s10479_s3 + $0x7f8] sm:$0xff]  ;;  %v2164_v60 = vld [vmem:[%s10479_s3 + $0xbc0] sm:$0xff]  ;;  %v2161_v28 = vld [vmem:[%s10479_s3 + $0xba8] sm:$0xff] }
 0x38f   : > { %2283 = vrot.lane.b32.xlu0 %v8384_v9, %s6148_s18  ;;  %2529 = vmatprep.subr.mxu0 %v2119_v21  ;;  %v2163_v41 = vld [vmem:[%s10479_s3 + $0xbb8] sm:$0xff]  ;;  %v2160_v24 = vld [vmem:[%s10479_s3 + $0xba0] sm:$0xff]  ;;  %v2158_v21 = vld [vmem:[%s10479_s3 + $0xb90] sm:$0xff] }
 0x390   : > { %2281 = vrot.lane.b32.xlu1 %v8391_v16, %s6148_s18  ;;  %2530 = vmatpush1.msra.mxu0 %v2118_v30  ;;  %v2157_v20 = vld [vmem:[%s10479_s3 + $0xb88] sm:$0xff]  ;;  %v2155_v30 = vld [vmem:[%s10479_s3 + $0xb78] sm:$0xff] }
 0x391   : > { %2531 = vmatprep.subr.mxu0 %v2116_v4  ;;  %2508 = vmatprep.subr.mxu1 %v2044_v18  ;;  %v2154_v4 = vld [vmem:[%s10479_s3 + $0xb70] sm:$0xff]  ;;  %v2152_v18 = vld [vmem:[%s10479_s3 + $0xb60] sm:$0xff] }
 0x392   : > { %2532 = vmatpush1.msra.mxu0 %v2115_v17  ;;  %2509 = vmatpush2.msra.mxu1 %v2043_v55  ;;  %v2151_v17 = vld [vmem:[%s10479_s3 + $0xb58] sm:$0xff]  ;;  %v2149_v55 = vld [vmem:[%s10479_s3 + $0xb48] sm:$0xff] }
 0x393   : > { %2533 = vmatprep.subr.mxu0 %v2113_v49  ;;  %2510 = vmatprep.subr.mxu1 %v2041_v48  ;;  %v2148_v49 = vld [vmem:[%s10479_s3 + $0xb40] sm:$0xff]  ;;  %v2146_v48 = vld [vmem:[%s10479_s3 + $0xb30] sm:$0xff] }
 0x394   : > { %2534 = vmatpush1.msra.mxu0 %v2112_v14  ;;  %2511 = vmatpush2.msra.mxu1 %v2040_v38  ;;  %v2145_v14 = vld [vmem:[%s10479_s3 + $0xb28] sm:$0xff]  ;;  %v2143_v38 = vld [vmem:[%s10479_s3 + $0xb18] sm:$0xff] }
 0x395   : > { %2535 = vmatprep.subr.mxu0 %v2110_v56  ;;  %2512 = vmatprep.subr.mxu1 %v2038_v51  ;;  %v2142_v56 = vld [vmem:[%s10479_s3 + $0xb10] sm:$0xff]  ;;  %v2140_v51 = vld [vmem:[%s10479_s3 + $0xb00] sm:$0xff] }
 0x396   : > { %2536 = vmatpush1.msra.mxu0 %v2109_v12  ;;  %2513 = vmatpush2.msra.mxu1 %v2037_v50  ;;  %v2139_v12 = vld [vmem:[%s10479_s3 + $0xaf8] sm:$0xff]  ;;  %v2137_v50 = vld [vmem:[%s10479_s3 + $0xae8] sm:$0xff] }
 0x397   : > { %2537 = vmatprep.subr.mxu0 %v2107_v43  ;;  %2514 = vmatprep.subr.mxu1 %v2035_v33  ;;  %v2136_v43 = vld [vmem:[%s10479_s3 + $0xae0] sm:$0xff]  ;;  %v2134_v33 = vld [vmem:[%s10479_s3 + $0xad0] sm:$0xff] }
 0x398   : > { %2538 = vmatpush1.msra.mxu0 %v2106_v15  ;;  %2515 = vmatpush2.msra.mxu1 %v2034_v10  ;;  %v2133_v15 = vld [vmem:[%s10479_s3 + $0xac8] sm:$0xff]  ;;  %v2131_v10 = vld [vmem:[%s10479_s3 + $0xab8] sm:$0xff] }
 0x399   : > { %2539 = vmatprep.subr.mxu0 %v2104_v54  ;;  %2516 = vmatprep.subr.mxu1 %v2032_v34  ;;  %v2130_v54 = vld [vmem:[%s10479_s3 + $0xab0] sm:$0xff]  ;;  %v2128_v34 = vld [vmem:[%s10479_s3 + $0xaa0] sm:$0xff] }
 0x39a   : > { %2540 = vmatpush1.msra.mxu0 %v2103_v63  ;;  %2517 = vmatpush2.msra.mxu1 %v2031_v53  ;;  %v2127_v63 = vld [vmem:[%s10479_s3 + $0xa98] sm:$0xff]  ;;  %v2125_v53 = vld [vmem:[%s10479_s3 + $0xa88] sm:$0xff] }
 0x39b   : > { %2541 = vmatprep.subr.mxu0 %v2101_v52  ;;  %2518 = vmatprep.subr.mxu1 %v2029_v47  ;;  %v2124_v52 = vld [vmem:[%s10479_s3 + $0xa80] sm:$0xff]  ;;  %v1883_v47 = vld [vmem:[%s10479_s3 + $0x2f8] sm:$0xff] }
 0x39c   : > { %2542 = vmatpush1.msra.mxu0 %v2100_v44  ;;  %2519 = vmatpush2.msra.mxu1 %v2028_v31 }
 0x39d   : > { %2543 = vmatprep.subr.mxu0 %v2098_v45  ;;  %2608 = vmatprep.subr.mxu1 %v2203_v1 }
 0x39e   : > { %2544 = vmatpush1.msra.mxu0 %v2097_v37 }
 0x39f   : > { %2545 = vmatprep.subr.mxu0 %v2095_v11 }
 0x3a0   : > { %2546 = vmatpush1.msra.mxu0 %v2094_v35 }
 0x3a1   : > { %2547 = vmatprep.subr.mxu0 %v2092_v7  ;;  %v2202_v7 = vld [vmem:[%s10479_s3 + $0xcf0] sm:$0xff] }
 0x3a2   : > { %2548 = vmatpush1.msra.mxu0 %v2091_v26  ;;  %v2194_v26 = vld [vmem:[%s10479_s3 + $0xcb0] sm:$0xff] }
 0x3a3   : > { %2549 = vmatprep.subr.mxu0 %v2089_v25  ;;  %v2193_v25 = vld [vmem:[%s10479_s3 + $0xca8] sm:$0xff] }
 0x3a4   : > { %2550 = vmatpush1.msra.mxu0 %v2088_v22  ;;  %v2191_v22 = vld [vmem:[%s10479_s3 + $0xc98] sm:$0xff] }
 0x3a5   : > { %2551 = vmatprep.subr.mxu0 %v2086_v46  ;;  %v2190_v46 = vld [vmem:[%s10479_s3 + $0xc90] sm:$0xff] }
 0x3a6   : > { %2552 = vmatpush1.msra.mxu0 %v2085_v32  ;;  %v2188_v32 = vld [vmem:[%s10479_s3 + $0xc80] sm:$0xff] }
 0x3a7   : > { %2553 = vmatprep.subr.mxu0 %v2083_v23  ;;  %v2187_v23 = vld [vmem:[%s10479_s3 + $0xc78] sm:$0xff] }
 0x3a8   : > { %2554 = vmatpush1.msra.mxu0 %v2082_v0  ;;  %v2185_v0 = vld [vmem:[%s10479_s3 + $0xc68] sm:$0xff] }
 0x3a9   : > { %2555 = vmatprep.subr.mxu0 %v2080_v19  ;;  %v2184_v19 = vld [vmem:[%s10479_s3 + $0xc60] sm:$0xff] }
 0x3aa   : > { %2556 = vmatpush1.msra.mxu0 %v2079_v59  ;;  %v2182_v59 = vld [vmem:[%s10479_s3 + $0xc50] sm:$0xff] }
 0x3ab   : > { %2557 = vmatprep.subr.mxu0 %v2077_v2  ;;  %v2181_v2 = vld [vmem:[%s10479_s3 + $0xc48] sm:$0xff] }
 0x3ac   : > { %2558 = vmatpush1.msra.mxu0 %v2076_v62  ;;  %v2179_v62 = vld [vmem:[%s10479_s3 + $0xc38] sm:$0xff] }
 0x3ad   : > { %2559 = vmatprep.subr.mxu0 %v2170_v29  ;;  %v2178_v29 = vld [vmem:[%s10479_s3 + $0xc30] sm:$0xff] }
 0x3ae   : > { %2560 = vmatpush2.msra.mxu0 %v2169_v42  ;;  %v2176_v42 = vld [vmem:[%s10479_s3 + $0xc20] sm:$0xff] }
 0x3af   : > { %2561 = vmatprep.subr.mxu0 %v2167_v57 }
 0x3b0   : > { %2562 = vmatpush2.msra.mxu0 %v2166_v8  ;;  %v2175_v8 = vld [vmem:[%s10479_s3 + $0xc18] sm:$0xff] }
 0x3b1   : > { %2563 = vmatprep.subr.mxu0 %v2164_v60 }
 0x3b2   : > { %2564 = vmatpush2.msra.mxu0 %v2163_v41  ;;  %v2173_v41 = vld [vmem:[%s10479_s3 + $0xc08] sm:$0xff] }
 0x3b3   : > { %2565 = vmatprep.subr.mxu0 %v2161_v28 }
 0x3b4   : > { %2566 = vmatpush2.msra.mxu0 %v2160_v24 }
 0x3b5   : > { %2567 = vmatprep.subr.mxu0 %v2158_v21  ;;  %v2172_v21 = vld [vmem:[%s10479_s3 + $0xc00] sm:$0xff] }
 0x3b6   : > { %2568 = vmatpush2.msra.mxu0 %v2157_v20 }
 0x3b7   : > { %2569 = vmatprep.subr.mxu0 %v2155_v30 }
 0x3b8   : > { %2570 = vmatpush2.msra.mxu0 %v2154_v4  ;;  %v1979_v4 = vld [vmem:[%s10479_s3 + $0x5f8] sm:$0xff] }
 0x3b9   : > { %2571 = vmatprep.subr.mxu0 %v2152_v18 }
 0x3ba   : > { %2572 = vmatpush2.msra.mxu0 %v2151_v17  ;;  %v1931_v17 = vld [vmem:[%s10479_s3 + $0x478] sm:$0xff] }
 0x3bb   : > { %2573 = vmatprep.subr.mxu0 %v2149_v55  ;;  %v1832_v55 = vld [vmem:[%s10479_s3 + $0x160] sm:$0xff] }
 0x3bc   : > { %2574 = vmatpush2.msra.mxu0 %v2148_v49  ;;  %v1928_v49 = vld [vmem:[%s10479_s3 + $0x460] sm:$0xff] }
 0x3bd   : > { %2575 = vmatprep.subr.mxu0 %v2146_v48  ;;  %v1877_v48 = vld [vmem:[%s10479_s3 + $0x2c8] sm:$0xff] }
 0x3be   : > { %2576 = vmatpush2.msra.mxu0 %v2145_v14  ;;  %v1973_v14 = vld [vmem:[%s10479_s3 + $0x5c8] sm:$0xff] }
 0x3bf   : > { %2577 = vmatprep.subr.mxu0 %v2143_v38  ;;  %v1829_v38 = vld [vmem:[%s10479_s3 + $0x148] sm:$0xff] }
 0x3c0   : > { %2578 = vmatpush2.msra.mxu0 %v2142_v56  ;;  %v1874_v56 = vld [vmem:[%s10479_s3 + $0x2b0] sm:$0xff] }
 0x3c1   : > { %2579 = vmatprep.subr.mxu0 %v2140_v51  ;;  %v1826_v51 = vld [vmem:[%s10479_s3 + $0x130] sm:$0xff] }
 0x3c2   : > { %2580 = vmatpush2.msra.mxu0 %v2139_v12  ;;  %v1922_v12 = vld [vmem:[%s10479_s3 + $0x430] sm:$0xff] }
 0x3c3   : > { %2581 = vmatprep.subr.mxu0 %v2137_v50  ;;  %v1871_v50 = vld [vmem:[%s10479_s3 + $0x298] sm:$0xff] }
 0x3c4   : > { %2582 = vmatpush2.msra.mxu0 %v2136_v43  ;;  %v1967_v43 = vld [vmem:[%s10479_s3 + $0x598] sm:$0xff] }
 0x3c5   : > { %2583 = vmatprep.subr.mxu0 %v2134_v33  ;;  %v1823_v33 = vld [vmem:[%s10479_s3 + $0x118] sm:$0xff] }
 0x3c6   : > { %2584 = vmatpush2.msra.mxu0 %v2133_v15  ;;  %v1919_v15 = vld [vmem:[%s10479_s3 + $0x418] sm:$0xff] }
 0x3c7   : > { %2585 = vmatprep.subr.mxu0 %v2131_v10  ;;  %v1868_v10 = vld [vmem:[%s10479_s3 + $0x280] sm:$0xff] }
 0x3c8   : > { %2586 = vmatpush2.msra.mxu0 %v2130_v54  ;;  %v1964_v54 = vld [vmem:[%s10479_s3 + $0x580] sm:$0xff] }
 0x3c9   : > { %2587 = vmatprep.subr.mxu0 %v2128_v34  ;;  %v1820_v34 = vld [vmem:[%s10479_s3 + $0x100] sm:$0xff] }
 0x3ca   : > { %2588 = vmatpush2.msra.mxu0 %v2127_v63  ;;  %v1916_v63 = vld [vmem:[%s10479_s3 + $0x400] sm:$0xff] }
 0x3cb   : > { %2589 = vmatprep.subr.mxu0 %v2125_v53  ;;  %v1865_v53 = vld [vmem:[%s10479_s3 + $0x268] sm:$0xff] }
 0x3cc   : > { %2590 = vmatpush2.msra.mxu0 %v2124_v52  ;;  %v1961_v52 = vld [vmem:[%s10479_s3 + $0x568] sm:$0xff] }
 0x3cd   : > { %5313 = vmatprep.subr.mxu0 %v1883_v47  ;;  %v1817_v47 = vld [vmem:[%s10479_s3 + $0xe8] sm:$0xff] }
 0x3ea   : > { %v6054_v44 = vpop.permute.xlu0 %6053 }
 0x3eb   : > { %v6056_v31 = vunpack.i.h.bf16 %v6054_v44  ;;  %v6055_v45 = vunpack.i.l.bf16 %v6054_v44  ;;  %v1913_v44 = vld [vmem:[%s10479_s3 + $0x3e8] sm:$0xff] }
 0x3ed   : > { %v2289_v1 = vsel %vm10689_vm14, %v6051_v5, %v6055_v45  ;;  %v2290_v37 = vsel %vm10690_vm3, %v6055_v45, %v6056_v31  ;;  %v2196_v5 = vld [vmem:[%s10479_s3 + $0xcc0] sm:$0xff]  ;;  %v1958_v45 = vld [vmem:[%s10479_s3 + $0x550] sm:$0xff]  ;;  %vm3073_vm14 = vcmask 908288   ;;  %vm3272_vm3 = vcmask 179200  }
 0x3ee   : > { %v8624_v11 = vmax.f32 %v8277_v3, %v2290_v37  ;;  %v8627_v35 = vmax.f32 %v8154_v13, %v2289_v1  ;;  %v2199_v3 = vld [vmem:[%s10479_s3 + $0xcd8] sm:$0xff]  ;;  %v2197_v13 = vld [vmem:[%s10479_s3 + $0xcc8] sm:$0xff]  ;;  %v1814_v1 = vld [vmem:[%s10479_s3 + $0xd0] sm:$0xff] }
 0x3ef   : > { %v1910_v37 = vld [vmem:[%s10479_s3 + $0x3d0] sm:$0xff] }
 0x3f0   : > { %2520 = vmatprep.mubr.f32.mxu1 %v8624_v11 }
 0x3f1   : > { %2521 = vmatmul.mubr.f32.vlgmr.msra.gmra.mxu1 %v8627_v35 }
 0x3f2   : > { %2609 = vmatpush1.msra.mxu1 %v2202_v7  ;;  %2662 = vmatprep.mubr.f32.mxu1 %v10578_v40  ;;  %v1859_v7 = vld [vmem:[%s10479_s3 + $0x238] sm:$0xff] }
 0x3f3   : > { %2610 = vmatprep.subr.mxu1 %v2200_v58  ;;  %v1955_v58 = vld [vmem:[%s10479_s3 + $0x538] sm:$0xff] }
 0x3f4   : > { %2611 = vmatpush1.msra.mxu1 %v2199_v3  ;;  %v1811_v3 = vld [vmem:[%s10479_s3 + $0xb8] sm:$0xff] }
 0x3f5   : > { %2612 = vmatprep.subr.mxu1 %v2197_v13  ;;  %v1907_v13 = vld [vmem:[%s10479_s3 + $0x3b8] sm:$0xff] }
 0x3f6   : > { %2613 = vmatpush1.msra.mxu1 %v2196_v5  ;;  %v1856_v5 = vld [vmem:[%s10479_s3 + $0x220] sm:$0xff] }
 0x3f7   : > { %2614 = vmatprep.subr.mxu1 %v2194_v26  ;;  %v1952_v26 = vld [vmem:[%s10479_s3 + $0x520] sm:$0xff] }
 0x3f8   : > { %2615 = vmatpush1.msra.mxu1 %v2193_v25  ;;  %v1808_v25 = vld [vmem:[%s10479_s3 + $0xa0] sm:$0xff] }
 0x3f9   : > { %2616 = vmatprep.subr.mxu1 %v2191_v22  ;;  %v1904_v22 = vld [vmem:[%s10479_s3 + $0x3a0] sm:$0xff] }
 0x3fa   : > { %2617 = vmatpush1.msra.mxu1 %v2190_v46  ;;  %v1853_v46 = vld [vmem:[%s10479_s3 + $0x208] sm:$0xff] }
 0x3fb   : > { %2618 = vmatprep.subr.mxu1 %v2188_v32  ;;  %v1949_v32 = vld [vmem:[%s10479_s3 + $0x508] sm:$0xff] }
 0x3fc   : > { %2619 = vmatpush1.msra.mxu1 %v2187_v23  ;;  %v1805_v23 = vld [vmem:[%s10479_s3 + $0x88] sm:$0xff] }
 0x3fd   : > { %2620 = vmatprep.subr.mxu1 %v2185_v0  ;;  %v1901_v0 = vld [vmem:[%s10479_s3 + $0x388] sm:$0xff] }
 0x3fe   : > { %2621 = vmatpush1.msra.mxu1 %v2184_v19  ;;  %v1850_v19 = vld [vmem:[%s10479_s3 + $0x1f0] sm:$0xff] }
 0x3ff   : > { %2622 = vmatprep.subr.mxu1 %v2182_v59  ;;  %v1946_v59 = vld [vmem:[%s10479_s3 + $0x4f0] sm:$0xff] }
 0x400   : > { %2623 = vmatpush1.msra.mxu1 %v2181_v2  ;;  %v1802_v2 = vld [vmem:[%s10479_s3 + $0x70] sm:$0xff] }
 0x401   : > { %2624 = vmatprep.subr.mxu1 %v2179_v62  ;;  %v2284_v57 = vpop.permute.xlu0 %2283  ;;  %v1898_v62 = vld [vmem:[%s10479_s3 + $0x370] sm:$0xff] }
 0x402   : > { %2625 = vmatpush1.msra.mxu1 %v2178_v29  ;;  %v2282_v60 = vpop.permute.xlu1 %2281  ;;  %v8707_v18 = vmax.f32 %v8384_v9, %v2284_v57  ;;  %v1880_v9 = vld [vmem:[%s10479_s3 + $0x2e0] sm:$0xff]  ;;  %v1847_v29 = vld [vmem:[%s10479_s3 + $0x1d8] sm:$0xff] }
 0x403   : > { %v2291_v28 = vsel %vm10691_vm0, %v6056_v31, %v2282_v60  ;;  %v2292_v24 = vsel %vm10692_vm11, %v2282_v60, %v2284_v57  ;;  %2626 = vmatprep.subr.mxu1 %v2176_v42  ;;  %v1862_v31 = vld [vmem:[%s10479_s3 + $0x250] sm:$0xff]  ;;  %v1943_v42 = vld [vmem:[%s10479_s3 + $0x4d8] sm:$0xff]  ;;  %v1844_v60 = vld [vmem:[%s10479_s3 + $0x1c0] sm:$0xff]  ;;  %vm3242_vm0 = vcmask 646144   ;;  %vm3143_vm11 = vcmask 654336  }
 0x404   : > { %v8698_v20 = vmax.f32 %v8280_v36, %v2291_v28  ;;  %2627 = vmatpush1.msra.mxu1 %v2175_v8  ;;  %v8701_v30 = vmax.f32 %v8391_v16, %v2292_v24  ;;  %v1835_v36 = vld [vmem:[%s10479_s3 + $0x178] sm:$0xff]  ;;  %v1976_v16 = vld [vmem:[%s10479_s3 + $0x5e0] sm:$0xff] }
 0x405   : > { %2628 = vmatprep.subr.mxu1 %v2173_v41  ;;  %v1799_v57 = vld [vmem:[%s10479_s3 + $0x58] sm:$0xff]  ;;  %v1940_v41 = vld [vmem:[%s10479_s3 + $0x4c0] sm:$0xff] }
 0x406   : > { %2629 = vmatpush1.msra.mxu1 %v2172_v21  ;;  %2591 = vmatprep.mubr.f32.mxu0 %v8701_v30  ;;  %v1895_v8 = vld [vmem:[%s10479_s3 + $0x358] sm:$0xff]  ;;  %v1796_v28 = vld [vmem:[%s10479_s3 + $0x40] sm:$0xff]  ;;  %v1841_v21 = vld [vmem:[%s10479_s3 + $0x1a8] sm:$0xff] }
 0x407   : > { %5201 = vmatmul.mubr.msk.f32.vlgmr.msra.gmra.mxu1 %vm825_vm2, %v8707_v18  ;;  %5348 = vmatprep.subr.mxu1 %v1979_v4  ;;  %v1892_v24 = vld [vmem:[%s10479_s3 + $0x340] sm:$0xff]  ;;  %v1937_v4 = vld [vmem:[%s10479_s3 + $0x4a8] sm:$0xff] }
 0x408   : > { %2592 = vmatmul.mubr.f32.vlgmr.msra.gmra.mxu0 %v8698_v20  ;;  %5349 = vmatpush3.msra.mxu1 %v1931_v17  ;;  %v1793_v17 = vld [vmem:[%s10479_s3 + $0x28] sm:$0xff] }
 0x409   : > { %5314 = vmatpush3.msra.mxu0 %v1835_v36  ;;  %2803 = vmatprep.mubr.f32.mxu1 %v8362_v39  ;;  %v1925_v39 = vld [vmem:[%s10479_s3 + $0x448] sm:$0xff] }
 0x40a   : > { %5315 = vmatprep.subr.mxu0 %v1880_v9  ;;  %2733 = vmatprep.mubr.f32.mxu0 %v8178_v61  ;;  %v1970_v61 = vld [vmem:[%s10479_s3 + $0x5b0] sm:$0xff]  ;;  %v1889_v36 = vld [vmem:[%s10479_s3 + $0x328] sm:$0xff] }
 0x40b   : > { %5350 = vmatprep.subr.mxu1 %v1976_v16  ;;  %5316 = vmatpush3.msra.mxu0 %v1832_v55  ;;  %v1838_v9 = vld [vmem:[%s10479_s3 + $0x190] sm:$0xff] }
 0x40c   : > { %5351 = vmatpush3.msra.mxu1 %v1928_v49  ;;  %5317 = vmatprep.subr.mxu0 %v1877_v48  ;;  %v1934_v16 = vld [vmem:[%s10479_s3 + $0x490] sm:$0xff]  ;;  %v2075_v48 = vld [vmem:[%s10479_s3 + $0x8f8] sm:$0xff] }
 0x40d   : > { %5352 = vmatprep.subr.mxu1 %v1973_v14  ;;  %5318 = vmatpush3.msra.mxu0 %v1829_v38  ;;  %v1790_v55 = vld [vmem:[%s10479_s3 + $0x10] sm:$0xff]  ;;  %v2171_v14 = vld [vmem:[%s10479_s3 + $0xbf8] sm:$0xff] }
 0x40e   : > { %5353 = vmatpush3.msra.mxu1 %v1925_v39  ;;  %5319 = vmatprep.subr.mxu0 %v1874_v56  ;;  %v1886_v49 = vld [vmem:[%s10479_s3 + $0x310] sm:$0xff]  ;;  %v2027_v38 = vld [vmem:[%s10479_s3 + $0x778] sm:$0xff]  ;;  %v2072_v56 = vld [vmem:[%s10479_s3 + $0x8e0] sm:$0xff] }
 0x40f   : > { %5354 = vmatprep.subr.mxu1 %v1970_v61  ;;  %5320 = vmatpush3.msra.mxu0 %v1826_v51  ;;  %v2123_v39 = vld [vmem:[%s10479_s3 + $0xa78] sm:$0xff]  ;;  %v2168_v61 = vld [vmem:[%s10479_s3 + $0xbe0] sm:$0xff]  ;;  %v2069_v51 = vld [vmem:[%s10479_s3 + $0x8c8] sm:$0xff] }
 0x410   : > { %5355 = vmatpush3.msra.mxu1 %v1922_v12  ;;  %5321 = vmatprep.subr.mxu0 %v1871_v50  ;;  %v2165_v12 = vld [vmem:[%s10479_s3 + $0xbc8] sm:$0xff] }
 0x411   : > { %5356 = vmatprep.subr.mxu1 %v1967_v43  ;;  %5322 = vmatpush3.msra.mxu0 %v1823_v33  ;;  %v2117_v50 = vld [vmem:[%s10479_s3 + $0xa48] sm:$0xff]  ;;  %v2066_v43 = vld [vmem:[%s10479_s3 + $0x8b0] sm:$0xff] }
 0x412   : > { %5357 = vmatpush3.msra.mxu1 %v1919_v15  ;;  %5323 = vmatprep.subr.mxu0 %v1868_v10  ;;  %v2018_v33 = vld [vmem:[%s10479_s3 + $0x730] sm:$0xff]  ;;  %v2063_v10 = vld [vmem:[%s10479_s3 + $0x898] sm:$0xff] }
 0x413   : > { %5358 = vmatprep.subr.mxu1 %v1964_v54  ;;  %5324 = vmatpush3.msra.mxu0 %v1820_v34  ;;  %v2114_v15 = vld [vmem:[%s10479_s3 + $0xa30] sm:$0xff]  ;;  %v2159_v54 = vld [vmem:[%s10479_s3 + $0xb98] sm:$0xff] }
 0x414   : > { %5359 = vmatpush3.msra.mxu1 %v1916_v63  ;;  %5325 = vmatprep.subr.mxu0 %v1865_v53  ;;  %v2015_v34 = vld [vmem:[%s10479_s3 + $0x718] sm:$0xff]  ;;  %v2060_v53 = vld [vmem:[%s10479_s3 + $0x880] sm:$0xff] }
 0x415   : > { %5360 = vmatprep.subr.mxu1 %v1961_v52  ;;  %5326 = vmatpush3.msra.mxu0 %v1817_v47  ;;  %v2111_v63 = vld [vmem:[%s10479_s3 + $0xa18] sm:$0xff]  ;;  %v2156_v52 = vld [vmem:[%s10479_s3 + $0xb80] sm:$0xff] }
 0x416   : > { %5361 = vmatpush3.msra.mxu1 %v1913_v44  ;;  %5327 = vmatprep.subr.mxu0 %v1862_v31  ;;  %v2012_v47 = vld [vmem:[%s10479_s3 + $0x700] sm:$0xff]  ;;  %v2057_v31 = vld [vmem:[%s10479_s3 + $0x868] sm:$0xff] }
 0x417   : > { %5362 = vmatprep.subr.mxu1 %v1958_v45  ;;  %5328 = vmatpush3.msra.mxu0 %v1814_v1  ;;  %v2108_v44 = vld [vmem:[%s10479_s3 + $0xa00] sm:$0xff]  ;;  %v2153_v45 = vld [vmem:[%s10479_s3 + $0xb68] sm:$0xff] }
 0x418   : > { %5363 = vmatpush3.msra.mxu1 %v1910_v37  ;;  %5329 = vmatprep.subr.mxu0 %v1859_v7  ;;  %v2009_v1 = vld [vmem:[%s10479_s3 + $0x6e8] sm:$0xff]  ;;  %v2054_v7 = vld [vmem:[%s10479_s3 + $0x850] sm:$0xff] }
 0x419   : > { %5364 = vmatprep.subr.mxu1 %v1955_v58  ;;  %5330 = vmatpush3.msra.mxu0 %v1811_v3  ;;  %v2105_v37 = vld [vmem:[%s10479_s3 + $0x9e8] sm:$0xff]  ;;  %v2150_v58 = vld [vmem:[%s10479_s3 + $0xb50] sm:$0xff] }
 0x41a   : > { %5365 = vmatpush3.msra.mxu1 %v1907_v13  ;;  %5331 = vmatprep.subr.mxu0 %v1856_v5  ;;  %v2006_v3 = vld [vmem:[%s10479_s3 + $0x6d0] sm:$0xff]  ;;  %v2051_v5 = vld [vmem:[%s10479_s3 + $0x838] sm:$0xff] }
 0x41b   : > { %5366 = vmatprep.subr.mxu1 %v1952_v26  ;;  %5332 = vmatpush3.msra.mxu0 %v1808_v25  ;;  %v2102_v13 = vld [vmem:[%s10479_s3 + $0x9d0] sm:$0xff]  ;;  %v2147_v26 = vld [vmem:[%s10479_s3 + $0xb38] sm:$0xff] }
 0x41c   : > { %5367 = vmatpush3.msra.mxu1 %v1904_v22  ;;  %5333 = vmatprep.subr.mxu0 %v1853_v46  ;;  %v2003_v25 = vld [vmem:[%s10479_s3 + $0x6b8] sm:$0xff]  ;;  %v2048_v46 = vld [vmem:[%s10479_s3 + $0x820] sm:$0xff] }
 0x41d   : > { %5368 = vmatprep.subr.mxu1 %v1949_v32  ;;  %5334 = vmatpush3.msra.mxu0 %v1805_v23  ;;  %v2099_v22 = vld [vmem:[%s10479_s3 + $0x9b8] sm:$0xff]  ;;  %v2144_v32 = vld [vmem:[%s10479_s3 + $0xb20] sm:$0xff] }
 0x41e   : > { %5369 = vmatpush3.msra.mxu1 %v1901_v0  ;;  %5335 = vmatprep.subr.mxu0 %v1850_v19  ;;  %v2000_v23 = vld [vmem:[%s10479_s3 + $0x6a0] sm:$0xff]  ;;  %v2045_v19 = vld [vmem:[%s10479_s3 + $0x808] sm:$0xff] }
 0x41f   : > { %5370 = vmatprep.subr.mxu1 %v1946_v59  ;;  %5336 = vmatpush3.msra.mxu0 %v1802_v2  ;;  %v2096_v0 = vld [vmem:[%s10479_s3 + $0x9a0] sm:$0xff]  ;;  %v2141_v59 = vld [vmem:[%s10479_s3 + $0xb08] sm:$0xff] }
 0x420   : > { %5371 = vmatpush3.msra.mxu1 %v1898_v62  ;;  %5337 = vmatprep.subr.mxu0 %v1847_v29  ;;  %v1997_v2 = vld [vmem:[%s10479_s3 + $0x688] sm:$0xff]  ;;  %v2042_v29 = vld [vmem:[%s10479_s3 + $0x7f0] sm:$0xff] }
 0x421   : > { %5372 = vmatprep.subr.mxu1 %v1943_v42  ;;  %5338 = vmatpush3.msra.mxu0 %v1799_v57  ;;  %v2093_v62 = vld [vmem:[%s10479_s3 + $0x988] sm:$0xff]  ;;  %v2138_v42 = vld [vmem:[%s10479_s3 + $0xaf0] sm:$0xff] }
 0x422   : > { %5373 = vmatpush3.msra.mxu1 %v1895_v8  ;;  %5339 = vmatprep.subr.mxu0 %v1844_v60  ;;  %v1994_v57 = vld [vmem:[%s10479_s3 + $0x670] sm:$0xff]  ;;  %v2039_v60 = vld [vmem:[%s10479_s3 + $0x7d8] sm:$0xff] }
 0x423   : > { %5374 = vmatprep.subr.mxu1 %v1940_v41  ;;  %5340 = vmatpush3.msra.mxu0 %v1796_v28  ;;  %v2090_v8 = vld [vmem:[%s10479_s3 + $0x970] sm:$0xff]  ;;  %v2135_v41 = vld [vmem:[%s10479_s3 + $0xad8] sm:$0xff] }
 0x424   : > { %5375 = vmatpush3.msra.mxu1 %v1892_v24  ;;  %5341 = vmatprep.subr.mxu0 %v1841_v21  ;;  %v1991_v28 = vld [vmem:[%s10479_s3 + $0x658] sm:$0xff]  ;;  %v2036_v21 = vld [vmem:[%s10479_s3 + $0x7c0] sm:$0xff] }
 0x425   : > { %5376 = vmatprep.subr.mxu1 %v1937_v4  ;;  %5342 = vmatpush3.msra.mxu0 %v1793_v17  ;;  %v2087_v24 = vld [vmem:[%s10479_s3 + $0x958] sm:$0xff]  ;;  %v2132_v4 = vld [vmem:[%s10479_s3 + $0xac0] sm:$0xff] }
 0x426   : > { %5377 = vmatpush3.msra.mxu1 %v1889_v36  ;;  %5343 = vmatprep.subr.mxu0 %v1838_v9  ;;  %v1988_v17 = vld [vmem:[%s10479_s3 + $0x640] sm:$0xff]  ;;  %v2033_v9 = vld [vmem:[%s10479_s3 + $0x7a8] sm:$0xff] }
 0x427   : > { %5378 = vmatprep.subr.mxu1 %v1934_v16  ;;  %5344 = vmatpush3.msra.mxu0 %v1790_v55  ;;  %v2084_v36 = vld [vmem:[%s10479_s3 + $0x940] sm:$0xff]  ;;  %v2129_v16 = vld [vmem:[%s10479_s3 + $0xaa8] sm:$0xff] }
 0x428   : > { %5379 = vmatpush3.msra.mxu1 %v1886_v49  ;;  %2734 = vmatmul.mubr.f32.vlgmr.msra.gmra.mxu0 %v8181_v6  ;;  %v2024_v6 = vld [vmem:[%s10479_s3 + $0x760] sm:$0xff]  ;;  %v1985_v55 = vld [vmem:[%s10479_s3 + $0x628] sm:$0xff] }
 0x429   : > { %2804 = vmatmul.mubr.f32.vlgmr.msra.gmra.mxu1 %v8365_v27  ;;  %5383 = vmatprep.subr.mxu0 %v2075_v48  ;;  %v2120_v27 = vld [vmem:[%s10479_s3 + $0xa60] sm:$0xff]  ;;  %v2081_v49 = vld [vmem:[%s10479_s3 + $0x928] sm:$0xff]  ;;  %v2030_v48 = vld [vmem:[%s10479_s3 + $0x790] sm:$0xff] }
 0x42a   : > { %5418 = vmatprep.subr.mxu1 %v2171_v14  ;;  %5384 = vmatpush3.msra.mxu0 %v2027_v38  ;;  %v2126_v14 = vld [vmem:[%s10479_s3 + $0xa90] sm:$0xff] }
 0x42b   : > { %2873 = vmatprep.mubr.f32.mxu0 %v8624_v11  ;;  %5419 = vmatpush3.msra.mxu1 %v2123_v39  ;;  %v2021_v11 = vld [vmem:[%s10479_s3 + $0x748] sm:$0xff]  ;;  %v1982_v38 = vld [vmem:[%s10479_s3 + $0x610] sm:$0xff] }
 0x42c   : > { %2943 = vmatprep.mubr.f32.mxu1 %v8701_v30  ;;  %5385 = vmatprep.subr.mxu0 %v2072_v56  ;;  %v2162_v30 = vld [vmem:[%s10479_s3 + $0xbb0] sm:$0xff]  ;;  %v2204_v56 = vld [vmem:[%s10479_s3 + $0xd00] sm:$0xff] }
 0x42d   : > { %5420 = vmatprep.subr.mxu1 %v2168_v61  ;;  %5386 = vmatpush3.msra.mxu0 %v2024_v6  ;;  %v2078_v39 = vld [vmem:[%s10479_s3 + $0x910] sm:$0xff]  ;;  %v2201_v61 = vld [vmem:[%s10479_s3 + $0xce8] sm:$0xff] }
 0x42e   : > { %5421 = vmatpush3.msra.mxu1 %v2120_v27  ;;  %5387 = vmatprep.subr.mxu0 %v2069_v51  ;;  %v2198_v6 = vld [vmem:[%s10479_s3 + $0xcd0] sm:$0xff]  ;;  %v2189_v27 = vld [vmem:[%s10479_s3 + $0xc88] sm:$0xff] }
 0x42f   : > { %5422 = vmatprep.subr.mxu1 %v2165_v12  ;;  %5388 = vmatpush3.msra.mxu0 %v2021_v11  ;;  %v2186_v51 = vld [vmem:[%s10479_s3 + $0xc70] sm:$0xff]  ;;  %v2183_v12 = vld [vmem:[%s10479_s3 + $0xc58] sm:$0xff]  ;;  %v2180_v11 = vld [vmem:[%s10479_s3 + $0xc40] sm:$0xff] }
 0x430   : > { %5423 = vmatpush3.msra.mxu1 %v2117_v50  ;;  %5389 = vmatprep.subr.mxu0 %v2066_v43  ;;  %v2177_v50 = vld [vmem:[%s10479_s3 + $0xc28] sm:$0xff]  ;;  %v2174_v43 = vld [vmem:[%s10479_s3 + $0xc10] sm:$0xff] }
 0x431   : > { %5424 = vmatprep.subr.mxu1 %v2162_v30  ;;  %5390 = vmatpush3.msra.mxu0 %v2018_v33  ;;  %v2380_v30 = vpop.f32.mrf.mxu1 }
 0x432   : > { %5425 = vmatpush3.msra.mxu1 %v2114_v15  ;;  %5391 = vmatprep.subr.mxu0 %v2063_v10 }
 0x433   : > { %5426 = vmatprep.subr.mxu1 %v2159_v54  ;;  %5392 = vmatpush3.msra.mxu0 %v2015_v34  ;;  %v2382_v33 = vpop.f32.mrf.mxu1 }
 0x434   : > { %5427 = vmatpush3.msra.mxu1 %v2111_v63  ;;  %5393 = vmatprep.subr.mxu0 %v2060_v53 }
 0x435   : > { %5428 = vmatprep.subr.mxu1 %v2156_v52  ;;  %5394 = vmatpush3.msra.mxu0 %v2012_v47 }
 0x436   : > { %5429 = vmatpush3.msra.mxu1 %v2108_v44  ;;  %5395 = vmatprep.subr.mxu0 %v2057_v31 }
 0x437   : > { %5430 = vmatprep.subr.mxu1 %v2153_v45  ;;  %5396 = vmatpush3.msra.mxu0 %v2009_v1 }
 0x438   : > { %5431 = vmatpush3.msra.mxu1 %v2105_v37  ;;  %5397 = vmatprep.subr.mxu0 %v2054_v7 }
 0x439   : > { %5432 = vmatprep.subr.mxu1 %v2150_v58  ;;  %5398 = vmatpush3.msra.mxu0 %v2006_v3 }
 0x43a   : > { %5433 = vmatpush3.msra.mxu1 %v2102_v13  ;;  %5399 = vmatprep.subr.mxu0 %v2051_v5 }
 0x43b   : > { %5434 = vmatprep.subr.mxu1 %v2147_v26  ;;  %5400 = vmatpush3.msra.mxu0 %v2003_v25 }
 0x43c   : > { %5435 = vmatpush3.msra.mxu1 %v2099_v22  ;;  %5401 = vmatprep.subr.mxu0 %v2048_v46 }
 0x43d   : > { %5436 = vmatprep.subr.mxu1 %v2144_v32  ;;  %5402 = vmatpush3.msra.mxu0 %v2000_v23 }
 0x43e   : > { %5437 = vmatpush3.msra.mxu1 %v2096_v0  ;;  %5403 = vmatprep.subr.mxu0 %v2045_v19 }
 0x43f   : > { %5438 = vmatprep.subr.mxu1 %v2141_v59  ;;  %5404 = vmatpush3.msra.mxu0 %v1997_v2 }
 0x440   : > { %5439 = vmatpush3.msra.mxu1 %v2093_v62  ;;  %5405 = vmatprep.subr.mxu0 %v2042_v29 }
 0x441   : > { %5440 = vmatprep.subr.mxu1 %v2138_v42  ;;  %5406 = vmatpush3.msra.mxu0 %v1994_v57 }
 0x442   : > { %5441 = vmatpush3.msra.mxu1 %v2090_v8  ;;  %5407 = vmatprep.subr.mxu0 %v2039_v60 }
 0x443   : > { %5442 = vmatprep.subr.mxu1 %v2135_v41  ;;  %5408 = vmatpush3.msra.mxu0 %v1991_v28 }
 0x444   : > { %5443 = vmatpush3.msra.mxu1 %v2087_v24  ;;  %5409 = vmatprep.subr.mxu0 %v2036_v21 }
 0x445   : > { %5444 = vmatprep.subr.mxu1 %v2132_v4  ;;  %5410 = vmatpush3.msra.mxu0 %v1988_v17 }
 0x446   : > { %5445 = vmatpush3.msra.mxu1 %v2084_v36  ;;  %5411 = vmatprep.subr.mxu0 %v2033_v9 }
 0x447   : > { %5446 = vmatprep.subr.mxu1 %v2129_v16  ;;  %5412 = vmatpush3.msra.mxu0 %v1985_v55 }
 0x448   : > { %5447 = vmatpush3.msra.mxu1 %v2081_v49  ;;  %5413 = vmatprep.subr.mxu0 %v2030_v48 }
 0x449   : > { %5448 = vmatprep.subr.mxu1 %v2126_v14  ;;  %5414 = vmatpush3.msra.mxu0 %v1982_v38 }
 0x44a   : > { %5449 = vmatpush3.msra.mxu1 %v2078_v39  ;;  %2874 = vmatmul.mubr.f32.vlgmr.msra.gmra.mxu0 %v8627_v35  ;;  %v2195_v35 = vld [vmem:[%s10479_s3 + $0xcb8] sm:$0xff] }
 0x44b   : > { %2944 = vmatmul.mubr.f32.vlgmr.msra.gmra.mxu1 %v8698_v20  ;;  %5670 = vmatprep.subr.mxu0 %v10578_v40  ;;  %v2192_v20 = vld [vmem:[%s10479_s3 + $0xca0] sm:$0xff] }
 0x44c   : > { %5671 = vmatpush3.msra.mxu0 %v2204_v56  ;;  %5692 = vmatprep.mubr.msk.f32.mxu0 %vm10693_vm4, %v10578_v40 }
 0x44d   : > { %5672 = vmatprep.subr.mxu0 %v10578_v40  ;;  %v2451_v15 = vpop.f32.mrf.mxu0 }
 0x44e   : > { %5673 = vmatpush3.msra.mxu0 %v2201_v61  ;;  %v2452_v34 = vadd.f32 %v2451_v15, %v2380_v30 }
 0x44f   : > { %5674 = vmatprep.subr.mxu0 %v10578_v40  ;;  %v2453_v54 = vpop.f32.mrf.mxu0 }
 0x450   : > { %5675 = vmatpush3.msra.mxu0 %v2198_v6  ;;  %v2454_v53 = vadd.f32 %v2453_v54, %v2382_v33 }
 0x451   : > { %5676 = vmatprep.subr.mxu0 %v10578_v40 }
 0x452   : > { %5677 = vmatpush3.msra.mxu0 %v2195_v35 }
 0x453   : > { %5678 = vmatprep.subr.mxu0 %v10578_v40 }
 0x454   : > { %5679 = vmatpush3.msra.mxu0 %v2192_v20 }
 0x455   : > { %5680 = vmatprep.subr.mxu0 %v10578_v40 }
 0x456   : > { %5681 = vmatpush3.msra.mxu0 %v2189_v27 }
 0x457   : > { %5682 = vmatprep.subr.mxu0 %v10578_v40 }
 0x458   : > { %5683 = vmatpush3.msra.mxu0 %v2186_v51 }
 0x459   : > { %5684 = vmatprep.subr.mxu0 %v10578_v40 }
 0x45a   : > { %5685 = vmatpush3.msra.mxu0 %v2183_v12 }
 0x45b   : > { %5686 = vmatprep.subr.mxu0 %v10578_v40 }
 0x45c   : > { %5687 = vmatpush3.msra.mxu0 %v2180_v11 }
 0x45d   : > { %5688 = vmatprep.subr.mxu0 %v10578_v40 }
 0x45e   : > { %5689 = vmatpush3.msra.mxu0 %v2177_v50 }
 0x45f   : > { %5690 = vmatprep.subr.mxu0 %v10578_v40 }
 0x460   : > { %5691 = vmatpush3.msra.mxu0 %v2174_v43 }
 0x461   : > { %5693 = vmatmul.mubr.msk.f32.vlgmr.msra.gmra.mxu0 %vm825_vm2, %v8707_v18  ;;  %3440 = vmatprep.subr.mxu0 %v10578_v40  ;;  %vm3175_vm2 = vcmask 924672  }
 0x4b1   : > { %v2522_v10 = vpop.f32.mrf.mxu1 }
 0x4b2   : > { %v2523_v52 = vadd.f32 %v2522_v10, %v2452_v34 }
 0x4b3   : > { %v2524_v63 = vpop.f32.mrf.mxu1 }
 0x4b4   : > { %v2525_v31 = vadd.f32 %v2524_v63, %v2454_v53 }
 0x4c7   : > { %v2664_v47 = vpop.f32.mrf.mxu1 }
 0x4c8   : > { %v2593_v44 = vpop.f32.mrf.mxu0 }
 0x4c9   : > { %v2594_v45 = vadd.f32 %v2593_v44, %v2523_v52  ;;  %v2666_v18 = vpop.f32.mrf.mxu1 }
 0x4ca   : > { %v2595_v1 = vpop.f32.mrf.mxu0 }
 0x4cb   : > { %v9148_v37 = vadd.f32 %v2664_v47, %v2594_v45  ;;  %v2596_v7 = vadd.f32 %v2595_v1, %v2525_v31 }
 0x4cd   : > { %v9150_v58 = vadd.f32 %v2666_v18, %v2596_v7  ;;  %3171 = vrot.lane.b32.xlu1 %v9148_v37, %s6164_s15  ;;  %v9157_v3 = vrot.slane %v9148_v37, 2  ;;  %v9162_v13 = vrot.slane %v9148_v37, 4  ;;  %v9172_v26 = vrot.slane %v9148_v37, 6 }
 0x4cf   : > { %3173 = vrot.lane.b32.xlu0 %v9150_v58, %s6164_s15  ;;  %v9167_v5 = vrot.slane %v9150_v58, 4  ;;  %v9177_v25 = vrot.slane %v9150_v58, 6  ;;  %v9182_v22 = vrot.slane %v9150_v58, 2 }
 0x4d1   : > { %3061 = vrot.lane.b32.xlu1 %v9157_v3, %s6165_s17 }
 0x4d3   : > { %3038 = vrot.lane.b32.xlu0 %v9162_v13, %s10694_s20 }
 0x4d5   : > { %3040 = vrot.lane.b32.xlu1 %v9167_v5, %s10694_s20 }
 0x4d7   : > { %3047 = vrot.lane.b32.xlu0 %v9172_v26, %s10695_s21 }
 0x4d9   : > { %3049 = vrot.lane.b32.xlu1 %v9177_v25, %s10695_s21 }
 0x4db   : > { %3063 = vrot.lane.b32.xlu0 %v9182_v22, %s6165_s17 }
 0x4df   : > { %3029 = vrot.lane.b32.xlu0 %v9157_v3, %s10676_s19 }
 0x4e3   : > { %3085 = vrot.lane.b32.xlu0 %v9148_v37, %s6166_s22 }
 0x4e8   : > { %v5345_v46 = vpop.f32.mrf.mxu0 }
 0x4e9   : > { %v5380_v32 = vpop.f32.mrf.mxu1 }
 0x4ea   : > { %v5346_v23 = vpop.f32.mrf.mxu0 }
 0x4eb   : > { %v5381_v19 = vpop.f32.mrf.mxu1  ;;  %v5347_v2 = vadd.f32 %v5346_v23, %v5345_v46 }
 0x4ec   : > { %v5382_v62 = vadd.f32 %v5381_v19, %v5380_v32  ;;  %v3024_v19 = vld [vmem:[%s10481_s5 + $0x8] sm:$0xff] }
 0x4ee   : > { %v2806_v57 = vadd.f32 %v5382_v62, %v5347_v2 }
 0x50a   : > { %v5415_v0 = vpop.f32.mrf.mxu0 }
 0x50b   : > { %v5450_v29 = vpop.f32.mrf.mxu1 }
 0x50c   : > { %v5416_v59 = vpop.f32.mrf.mxu0 }
 0x50d   : > { %v5417_v42 = vadd.f32 %v5416_v59, %v5415_v0  ;;  %v5451_v8 = vpop.f32.mrf.mxu1  ;;  %v3023_v0 = vld [vmem:[%s10481_s5] sm:$0xff] }
 0x50e   : > { %v5452_v41 = vadd.f32 %v5451_v8, %v5450_v29 }
 0x50f   : > { %v2876_v60 = vadd.f32 %v5417_v42, %v2806_v57 }
 0x511   : > { %v2946_v28 = vadd.f32 %v5452_v41, %v2876_v60 }
 0x521   : > { %v3015_v24 = vpop.f32.mrf.mxu0 }
 0x522   : > { %v3016_v21 = vadd.f32 %v3015_v24, %v2946_v28 }
 0x523   : > { %v5694_v4 = vpop.f32.mrf.mxu0 }
 0x524   : > { %3195 = vrot.lane.b32.xlu0 %v3016_v21, %s6166_s22  ;;  %v3180_v17 = vrot.slane %v3016_v21, 2  ;;  %v3190_v36 = vrot.slane %v3016_v21, 6  ;;  %v3185_v9 = vrot.slane %v3016_v21, 4 }
 0x526   : > { %3181 = vrot.lane.b32.xlu1 %v3180_v17, %s6165_s17 }
 0x528   : > { %3071 = vrot.lane.b32.xlu0 %v9167_v5, %s6167_s23 }
 0x52a   : > { %3031 = vrot.lane.b32.xlu1 %v9182_v22, %s10676_s19 }
 0x52c   : > { %3079 = vrot.lane.b32.xlu0 %v9177_v25, %s6168_s24 }
 0x52e   : > { %3087 = vrot.lane.b32.xlu1 %v9150_v58, %s6166_s22 }
 0x530   : > { %3191 = vrot.lane.b32.xlu0 %v3190_v36, %s6168_s24 }
 0x532   : > { %3069 = vrot.lane.b32.xlu1 %v9162_v13, %s6167_s23 }
 0x534   : > { %3134 = vrot.lane.b32.xlu0 %v9167_v5, %s6148_s18 }
 0x536   : > { %3077 = vrot.lane.b32.xlu1 %v9172_v26, %s6168_s24 }
 0x538   : > { %3141 = vrot.lane.b32.xlu0 %v9177_v25, %s6169_s27 }
 0x53a   : > { %3186 = vrot.lane.b32.xlu1 %v3185_v9, %s6167_s23  ;;  %s6175_s23 = smov 114  }
 0x53c   : > { %3127 = vrot.lane.b32.xlu0 %v9182_v22, %s10567_s16 }
 0x53e   : > { %3132 = vrot.lane.b32.xlu1 %v9162_v13, %s6148_s18  ;;  %s6171_s18 = smov 79  }
 0x53f   : > { %v3172_v16 = vpop.permute.xlu1 %3171 }
 0x541   : > { %v3174_v55 = vpop.permute.xlu0 %3173 }
 0x542   : > { %3139 = vrot.lane.b32.xlu1 %v9172_v26, %s6169_s27  ;;  %v3176_v6 = vsel %vm3175_vm2, %v3172_v16, %v3174_v55  ;;  %vm3121_vm2 = vcmask 769024   ;;  %s6176_s27 = smov 120  }
 0x543   : > { %v3062_v49 = vpop.permute.xlu1 %3061 }
 0x545   : > { %v3039_v48 = vpop.permute.xlu0 %3038 }
 0x546   : > { %3125 = vrot.lane.b32.xlu1 %v9157_v3, %s10567_s16  ;;  %s6172_s16 = smov 96  }
 0x547   : > { %v3041_v14 = vpop.permute.xlu1 %3040 }
 0x548   : > { %v3042_v51 = vsel %vm10697_vm8, %v3039_v48, %v3041_v14  ;;  %vm10700_vm8 = vcmask 760832  }
 0x549   : > { %v3048_v38 = vpop.permute.xlu0 %3047 }
 0x54a   : > { %3117 = vrot.lane.b32.xlu1 %v9148_v37, %s6170_s28 }
 0x54b   : > { %v3050_v39 = vpop.permute.xlu1 %3049 }
 0x54c   : > { %v9216_v56 = vsel %vm1088_vm6, %v3041_v14, %v3050_v39  ;;  %v3051_v27 = vsel %vm10696_vm7, %v3048_v38, %v3050_v39  ;;  %vm10699_vm7 = vcmask 752640  }
 0x54d   : > { %v9218_v61 = vpop.permute.xlu0 %3063  ;;  %3224 = vrot.lane.b32.xlu0 %v9216_v56, %s6171_s18  ;;  %v9232_v12 = vsel %vm1088_vm6, %v3042_v51, %v3051_v27 }
 0x54e   : > { %v9224_v35 = vsel %vm3065_vm5, %v3062_v49, %v9218_v61 }
 0x54f   : > { %v3198_v20 = vsel %vm1128_vm13, %v3176_v6, %v9224_v35 }
 0x550   : > { %3226 = vrot.lane.b32.xlu1 %v3198_v20, %s6171_s18 }
 0x551   : > { %v3030_v50 = vpop.permute.xlu0 %3029 }
 0x554   : > { %3222 = vrot.lane.b32.xlu1 %v9232_v12, %s6171_s18 }
 0x555   : > { %v3086_v53 = vpop.permute.xlu0 %3085 }
 0x596   : > { %v3196_v47 = vpop.permute.xlu0 %3195 }
 0x598   : > { %v3182_v11 = vpop.permute.xlu1 %3181 }
 0x599   : > { %v3183_v54 = vsel %vm3065_vm5, %v9218_v61, %v3182_v11 }
 0x59a   : > { %v3199_v63 = vsel %vm1128_vm13, %v3174_v55, %v3183_v54  ;;  %v9271_v31 = vpop.permute.xlu0 %3071 }
 0x59c   : > { %v3032_v43 = vpop.permute.xlu1 %3031 }
 0x59d   : > { %v9237_v30 = vsel %vm1108_vm10, %v3032_v43, %v3041_v14  ;;  %v3033_v33 = vsel %vm10698_vm9, %v3030_v50, %v3032_v43  ;;  %v9249_v10 = vsel %vm1128_vm13, %v9150_v58, %v3032_v43  ;;  %vm3113_vm9 = vcmask 777216  }
 0x59e   : > { %3220 = vrot.lane.b32.xlu0 %v9237_v30, %s6171_s18  ;;  %v9243_v15 = vsel %vm1108_vm10, %v3033_v33, %v3042_v51  ;;  %v9257_v34 = vsel %vm1128_vm13, %v9148_v37, %v3033_v33  ;;  %v9276_v1 = vpop.permute.xlu0 %3079 }
 0x59f   : > { %3218 = vrot.lane.b32.xlu1 %v9243_v15, %s6171_s18 }
 0x5a0   : > { %v9264_v52 = vpop.permute.xlu1 %3087 }
 0x5a1   : > { %v9280_v7 = vsel %vm3089_vm12, %v3086_v53, %v9264_v52 }
 0x5a2   : > { %3216 = vrot.lane.b32.xlu0 %v9249_v10, %s6171_s18 }
 0x5a3   : > { %3214 = vrot.lane.b32.xlu1 %v9257_v34, %s6171_s18 }
 0x5a4   : > { %v3070_v44 = vpop.permute.xlu1 %3069 }
 0x5a6   : > { %3228 = vrot.lane.b32.xlu0 %v3199_v63, %s6171_s18 }
 0x5a7   : > { %3101 = vrot.lane.b32.xlu1 %v9162_v13, %s6172_s16 }
 0x5a8   : > { %v3078_v45 = vpop.permute.xlu1 %3077 }
 0x5a9   : > { %v3082_v18 = vsel %vm3081_vm15, %v3078_v45, %v9276_v1 }
 0x5aa   : > { %3119 = vrot.lane.b32.xlu0 %v9150_v58, %s6170_s28  ;;  %s6177_s28 = smov 121  }
 0x5ab   : > { %3109 = vrot.lane.b32.xlu1 %v9172_v26, %s6173_s29  ;;  %v3197_v26 = vsel %vm3089_vm12, %v9264_v52, %v3196_v47  ;;  %vm3105_vm12 = vcmask 785408  }
 0x5ac   : > { %v3187_v13 = vpop.permute.xlu1 %3186 }
 0x5ae   : > { %3103 = vrot.lane.b32.xlu0 %v9167_v5, %s6172_s16  ;;  %v3192_v5 = vpop.permute.xlu0 %3191  ;;  %s6178_s16 = smov 122  }
 0x5af   : > { %3093 = vrot.lane.b32.xlu1 %v9157_v3, %s6174_s14  ;;  %v3074_v3 = vsel %vm3073_vm14, %v3070_v44, %v9271_v31  ;;  %v3193_v46 = vsel %vm3081_vm15, %v9276_v1, %v3192_v5  ;;  %vm3097_vm15 = vcmask 883712  }
 0x5b0   : > { %v3133_v59 = vpop.permute.xlu1 %3132 }
 0x5b2   : > { %3111 = vrot.lane.b32.xlu0 %v9177_v25, %s6173_s29  ;;  %v3188_v25 = vsel %vm3073_vm14, %v9271_v31, %v3187_v13  ;;  %v3135_v62 = vpop.permute.xlu0 %3134  ;;  %s6179_s29 = smov 123   ;;  %vm4178_vm14 = vcmask 982016  }
 0x5b3   : > { %3054 = vrot.lane.b32.xlu1 %v9148_v37, %s10561_s30  ;;  %v9290_v37 = vsel %vm1088_vm6, %v3074_v3, %v3082_v18  ;;  %v3201_v32 = vsel %vm1088_vm6, %v3188_v25, %v3193_v46  ;;  %v3200_v23 = vsel %vm1108_vm10, %v3183_v54, %v3188_v25  ;;  %v3136_v6 = vsel %vm10699_vm7, %v3133_v59, %v3135_v62 }
 0x5b4   : > { %v3140_v2 = vpop.permute.xlu1 %3139  ;;  %v3156_v59 = vsel %vm1108_vm10, %v9218_v61, %v9271_v31 }
 0x5b6   : > { %3095 = vrot.lane.b32.xlu0 %v9182_v22, %s6174_s14  ;;  %v9299_v22 = vsel %vm1108_vm10, %v9224_v35, %v3074_v3  ;;  %v3142_v42 = vpop.permute.xlu0 %3141  ;;  %s6180_s14 = smov 119  }
 0x5b7   : > { %3238 = vrot.lane.b32.xlu1 %v9280_v7, %s6171_s18  ;;  %v3144_v14 = vsel %vm3143_vm11, %v3140_v2, %v3142_v42  ;;  %v3170_v51 = vsel %vm1088_vm6, %v3135_v62, %v3142_v42 }
 0x5b8   : > { %v3126_v29 = vpop.permute.xlu1 %3125  ;;  %v3169_v11 = vsel %vm1088_vm6, %v3136_v6, %v3144_v14 }
 0x5ba   : > { %3056 = vrot.lane.b32.xlu0 %v9150_v58, %s10561_s30  ;;  %v3020_v58 = vld [vmem:[%s10480_s4 + $0x8] sm:$0xff]  ;;  %v3128_v60 = vpop.permute.xlu0 %3127 }
 0x5bb   : > { %3234 = vrot.lane.b32.xlu1 %v9290_v37, %s6171_s18  ;;  %5205 = vmatprep.mubr.msk.f32.mxu1 %vm3272_vm3, %v3020_v58  ;;  %v3129_v20 = vsel %vm10700_vm8, %v3126_v29, %v3128_v60  ;;  %v3168_v43 = vsel %vm1108_vm10, %v3128_v60, %v3135_v62 }
 0x5bc   : > { %v3118_v57 = vpop.permute.xlu1 %3117  ;;  %v3167_v33 = vsel %vm1108_vm10, %v3129_v20, %v3136_v6  ;;  %v3371_v6 = vld [vmem:[%s10482_s6 + $0x38] sm:$0xff] }
 0x5be   : > { %3240 = vrot.lane.b32.xlu0 %v3197_v26, %s6171_s18 }
 0x5bf   : > { %3230 = vrot.lane.b32.xlu1 %v9299_v22, %s6171_s18  ;;  %v3225_v41 = vpop.permute.xlu0 %3224 }
 0x5c2   : > { %3236 = vrot.lane.b32.xlu0 %v3201_v32, %s6171_s18  ;;  %v3227_v8 = vpop.permute.xlu1 %3226 }
 0x5c3   : > { %3264 = vperm.xlu1 %6057, %v3023_v0   ;;  %v3158_v0 = vsel %vm1088_vm6, %v9271_v31, %v9276_v1 }
 0x5c6   : > { %3232 = vrot.lane.b32.xlu0 %v3200_v23, %s6171_s18  ;;  %v3223_v28 = vpop.permute.xlu1 %3222  ;;  %s5307_s18 = sshll.u32 %s10704_s26, 4 }
 0x5c7   : > { %v3245_v55 = vsel %vm3242_vm0, %v3223_v28, %v3225_v41 }
 0x5ca   : > { %3269 = vperm.xlu0 %6021, %v3024_v19  }
 0x610   : > { %v3221_v24 = vpop.permute.xlu0 %3220 }
 0x611   : > { %v3219_v21 = vpop.permute.xlu1 %3218 }
 0x612   : > { %v3244_v48 = vsel %vm3242_vm0, %v3219_v21, %v3221_v24  ;;  %v3379_v21 = vld [vmem:[%s10482_s6 + $0x78] sm:$0xff] }
 0x613   : > { %3441 = vmatpush1.msra.mxu0 %v3379_v21 }
 0x614   : > { %v3217_v4 = vpop.permute.xlu0 %3216  ;;  %3442 = vmatprep.subr.mxu0 %v10578_v40 }
 0x615   : > { %v3215_v17 = vpop.permute.xlu1 %3214 }
 0x616   : > { %v3243_v38 = vsel %vm3242_vm0, %v3215_v17, %v3217_v4  ;;  %v3377_v17 = vld [vmem:[%s10482_s6 + $0x68] sm:$0xff] }
 0x618   : > { %v3229_v36 = vpop.permute.xlu0 %3228 }
 0x619   : > { %3283 = vmatprep.subr.mxu1 %v3229_v36  ;;  %v3102_v9 = vpop.permute.xlu1 %3101  ;;  %v3246_v16 = vsel %vm3242_vm0, %v3227_v8, %v3229_v36 }
 0x61a   : > { %3284 = vmatpush1.msra.mxu1 %v3246_v16 }
 0x61b   : > { %3285 = vmatprep.subr.mxu1 %v3225_v41 }
 0x61c   : > { %v3120_v49 = vpop.permute.xlu0 %3119  ;;  %3286 = vmatpush1.msra.mxu1 %v3245_v55  ;;  %v3375_v55 = vld [vmem:[%s10482_s6 + $0x58] sm:$0xff] }
 0x61d   : > { %3287 = vmatprep.subr.mxu1 %v3221_v24  ;;  %v3110_v39 = vpop.permute.xlu1 %3109  ;;  %v3122_v50 = vsel %vm3121_vm2, %v3118_v57, %v3120_v49  ;;  %v3166_v63 = vsel %vm1128_vm13, %v3120_v49, %v3128_v60 }
 0x61e   : > { %3288 = vmatpush1.msra.mxu1 %v3244_v48  ;;  %v3165_v44 = vsel %vm1128_vm13, %v3122_v50, %v3129_v20  ;;  %v3374_v48 = vld [vmem:[%s10482_s6 + $0x50] sm:$0xff] }
 0x61f   : > { %3289 = vmatprep.subr.mxu1 %v3217_v4  ;;  %v3378_v4 = vld [vmem:[%s10482_s6 + $0x70] sm:$0xff] }
 0x620   : > { %v3104_v27 = vpop.permute.xlu0 %3103  ;;  %3290 = vmatpush1.msra.mxu1 %v3243_v38  ;;  %3443 = vmatpush1.msra.mxu0 %v3378_v4  ;;  %v3373_v38 = vld [vmem:[%s10482_s6 + $0x48] sm:$0xff]  ;;  %v3370_v20 = vld [vmem:[%s10482_s6 + $0x30] sm:$0xff] }
 0x621   : > { %3291 = vmatprep.subr.mxu1 %v3170_v51  ;;  %v3094_v53 = vpop.permute.xlu1 %3093  ;;  %v3106_v18 = vsel %vm3105_vm12, %v3102_v9, %v3104_v27  ;;  %3444 = vmatprep.subr.mxu0 %v10578_v40  ;;  %v3376_v9 = vld [vmem:[%s10482_s6 + $0x60] sm:$0xff]  ;;  %v3366_v50 = vld [vmem:[%s10482_s6 + $0x10] sm:$0xff] }
 0x622   : > { %3292 = vmatpush1.msra.mxu1 %v3169_v11  ;;  %3445 = vmatpush1.msra.mxu0 %v3377_v17  ;;  %v3368_v51 = vld [vmem:[%s10482_s6 + $0x20] sm:$0xff]  ;;  %v3367_v11 = vld [vmem:[%s10482_s6 + $0x18] sm:$0xff] }
 0x623   : > { %3293 = vmatprep.subr.mxu1 %v3168_v43  ;;  %3446 = vmatprep.subr.mxu0 %v10578_v40  ;;  %v3365_v43 = vld [vmem:[%s10482_s6 + $0x8] sm:$0xff] }
 0x624   : > { %v3112_v54 = vpop.permute.xlu0 %3111  ;;  %3294 = vmatpush1.msra.mxu1 %v3167_v33  ;;  %3447 = vmatpush1.msra.mxu0 %v3376_v9  ;;  %v3364_v33 = vld [vmem:[%s10482_s6] sm:$0xff] }
 0x625   : > { %v3114_v47 = vsel %vm3113_vm9, %v3110_v39, %v3112_v54  ;;  %3295 = vmatprep.subr.mxu1 %v3166_v63  ;;  %v3164_v45 = vsel %vm1088_vm6, %v3104_v27, %v3112_v54  ;;  %v3055_v58 = vpop.permute.xlu1 %3054  ;;  %3448 = vmatprep.subr.mxu0 %v10578_v40  ;;  %v3372_v39 = vld [vmem:[%s10482_s6 + $0x40] sm:$0xff]  ;;  %v3385_v54 = vld [vmem:[%s10482_s6 + $0xa8] sm:$0xf] }
 0x626   : > { %3296 = vmatpush1.msra.mxu1 %v3165_v44  ;;  %v3163_v3 = vsel %vm1088_vm6, %v3106_v18, %v3114_v47  ;;  %3449 = vmatpush1.msra.mxu0 %v3375_v55  ;;  %v3384_v63 = vld [vmem:[%s10482_s6 + $0xa0] sm:$0xff]  ;;  %v3382_v47 = vld [vmem:[%s10482_s6 + $0x90] sm:$0xff]  ;;  %v3381_v44 = vld [vmem:[%s10482_s6 + $0x88] sm:$0xff] }
 0x627   : > { %3297 = vmatprep.subr.mxu1 %v3164_v45  ;;  %3450 = vmatprep.subr.mxu0 %v10578_v40  ;;  %v3380_v45 = vld [vmem:[%s10482_s6 + $0x80] sm:$0xff]  ;;  %v3588_v55 = vld [vmem:[%s10484_s8 + $0x68] sm:$0xff] }
 0x628   : > { %v3096_v13 = vpop.permute.xlu0 %3095  ;;  %3298 = vmatpush1.msra.mxu1 %v3163_v3  ;;  %3451 = vmatpush1.msra.mxu0 %v3374_v48 }
 0x629   : > { %v3162_v5 = vsel %vm1108_vm10, %v3096_v13, %v3104_v27  ;;  %v3098_v26 = vsel %vm3097_vm15, %v3094_v53, %v3096_v13  ;;  %v3160_v46 = vsel %vm1128_vm13, %v9264_v52, %v3096_v13  ;;  %v3239_v2 = vpop.permute.xlu1 %3238  ;;  %3452 = vmatprep.subr.mxu0 %v10578_v40  ;;  %v3369_v27 = vld [vmem:[%s10482_s6 + $0x28] sm:$0xff]  ;;  %v3383_v53 = vld [vmem:[%s10482_s6 + $0x98] sm:$0xff] }
 0x62a   : > { %3299 = vmatprep.subr.mxu1 %v3162_v5  ;;  %v3161_v25 = vsel %vm1108_vm10, %v3098_v26, %v3106_v18  ;;  %v3159_v23 = vsel %vm1128_vm13, %v9280_v7, %v3098_v26  ;;  %3453 = vmatpush1.msra.mxu0 %v3373_v38 }
 0x62b   : > { %3300 = vmatpush1.msra.mxu1 %v3161_v25  ;;  %3454 = vmatprep.subr.mxu0 %v10578_v40 }
 0x62c   : > { %v3057_v32 = vpop.permute.xlu0 %3056  ;;  %3301 = vmatprep.subr.mxu1 %v3160_v46  ;;  %3455 = vmatpush1.msra.mxu0 %v3372_v39  ;;  %v3584_v39 = vld [vmem:[%s10484_s8 + $0x48] sm:$0xff] }
 0x62d   : > { %3302 = vmatpush1.msra.mxu1 %v3159_v23  ;;  %v3058_v19 = vsel %vm630_vm1, %v3055_v58, %v3057_v32  ;;  %v3154_v7 = vsel %vm1128_vm13, %v3057_v32, %v9218_v61  ;;  %v3235_v31 = vpop.permute.xlu1 %3234  ;;  %3456 = vmatprep.subr.mxu0 %v10578_v40  ;;  %vm10701_vm1 = vcmask 1039360  }
 0x62e   : > { %3303 = vmatprep.subr.mxu1 %v3158_v0  ;;  %v3153_v1 = vsel %vm1128_vm13, %v3058_v19, %v9224_v35  ;;  %3457 = vmatpush1.msra.mxu0 %v3371_v6  ;;  %vm10702_vm6 = vmmov %vm10701_vm1 }
 0x62f   : > { %3304 = vmatpush1.msra.mxu1 %v9290_v37  ;;  %3458 = vmatprep.subr.mxu0 %v10578_v40 }
 0x630   : > { %v3241_v52 = vpop.permute.xlu0 %3240  ;;  %3305 = vmatprep.subr.mxu1 %v3156_v59  ;;  %3459 = vmatpush1.msra.mxu0 %v3370_v20  ;;  %v3582_v20 = vld [vmem:[%s10484_s8 + $0x38] sm:$0xff] }
 0x631   : > { %3306 = vmatpush1.msra.mxu1 %v9299_v22  ;;  %v3249_v61 = vsel %vm3242_vm0, %v3239_v2, %v3241_v52  ;;  %3460 = vmatprep.subr.mxu0 %v10578_v40 }
 0x632   : > { %3307 = vmatprep.subr.mxu1 %v3154_v7  ;;  %3461 = vmatpush1.msra.mxu0 %v3369_v27  ;;  %v3518_v27 = vld [vmem:[%s10483_s7 + $0x18] sm:$0xff] }
 0x633   : > { %3308 = vmatpush1.msra.mxu1 %v3153_v1  ;;  %3462 = vmatprep.subr.mxu0 %v10578_v40 }
 0x634   : > { %3309 = vmatprep.subr.mxu1 %v9216_v56  ;;  %v3237_v37 = vpop.permute.xlu0 %3236  ;;  %3463 = vmatpush1.msra.mxu0 %v3368_v51 }
 0x635   : > { %3310 = vmatpush1.msra.mxu1 %v9232_v12  ;;  %v3248_v56 = vsel %vm3242_vm0, %v3235_v31, %v3237_v37  ;;  %v3231_v12 = vpop.permute.xlu1 %3230  ;;  %3464 = vmatprep.subr.mxu0 %v10578_v40 }
 0x636   : > { %3311 = vmatprep.subr.mxu1 %v9237_v30  ;;  %v3019_v30 = vld [vmem:[%s10480_s4] sm:$0xff]  ;;  %3465 = vmatpush1.msra.mxu0 %v3367_v11  ;;  %v3580_v11 = vld [vmem:[%s10484_s8 + $0x28] sm:$0xff] }
 0x637   : > { %3312 = vmatpush1.msra.mxu1 %v9243_v15  ;;  %3466 = vmatprep.subr.mxu0 %v10578_v40 }
 0x638   : > { %3313 = vmatprep.subr.mxu1 %v9249_v10  ;;  %v3233_v35 = vpop.permute.xlu0 %3232  ;;  %v3022_v10 = vld [vmem:[%s10480_s4 + $0x18] sm:$0xff]  ;;  %3467 = vmatpush1.msra.mxu0 %v3366_v50 }
 0x639   : > { %3314 = vmatpush1.msra.mxu1 %v9257_v34  ;;  %v3247_v15 = vsel %vm3242_vm0, %v3231_v12, %v3233_v35  ;;  %v3021_v34 = vld [vmem:[%s10480_s4 + $0x10] sm:$0xff]  ;;  %3468 = vmatprep.subr.mxu0 %v10578_v40 }
 0x63a   : > { %5203 = vmatprep.subr.msk.mxu1 %vm1128_vm13, %v3241_v52  ;;  %3469 = vmatpush1.msra.mxu0 %v3365_v43  ;;  %v3578_v43 = vld [vmem:[%s10484_s8 + $0x18] sm:$0xff] }
 0x63b   : > { %5204 = vmatpush2.msk.msra.mxu1 %vm1128_vm13, %v3249_v61  ;;  %3470 = vmatprep.subr.mxu0 %v10578_v40  ;;  %vm3430_vm13 = vcmask 359424  }
 0x63c   : > { %3343 = vmatprep.subr.mxu1 %v3237_v37  ;;  %3471 = vmatpush1.msra.mxu0 %v3364_v33 }
 0x63d   : > { %3344 = vmatpush2.msra.mxu1 %v3248_v56  ;;  %3492 = vmatprep.subr.mxu0 %v10578_v40 }
 0x63e   : > { %3345 = vmatprep.subr.mxu1 %v3233_v35  ;;  %v3265_v22 = vpop.permute.xlu1 %3264  ;;  %5207 = vmatpush2.msk.msra.mxu0 %vm1108_vm10, %v3385_v54  ;;  %v3576_v54 = vld [vmem:[%s10484_s8 + $0x8] sm:$0xff] }
 0x63f   : > { %3346 = vmatpush2.msra.mxu1 %v3247_v15  ;;  %3494 = vmatprep.subr.mxu0 %v10578_v40 }
 0x640   : > { %3348 = vmatmul.mubr.f32.vlgmr.msra.gmra.mxu1 %v3019_v30  ;;  %3495 = vmatpush2.msra.mxu0 %v3384_v63  ;;  %v3589_v63 = vld [vmem:[%s10484_s8 + $0x70] sm:$0xff] }
 0x641   : > { %5206 = vmatprep.mubr.msk.f32.mxu1 %vm3272_vm3, %v3022_v10  ;;  %3496 = vmatprep.subr.mxu0 %v10578_v40  ;;  %vm5121_vm3 = vcmask 7168  }
 0x642   : > { %3497 = vmatpush2.msra.mxu0 %v3383_v53 }
 0x643   : > { %3498 = vmatprep.subr.mxu0 %v10578_v40 }
 0x644   : > { %3354 = vmatmul.mubr.f32.gmra.mxu1 %v3021_v34  ;;  %3499 = vmatpush2.msra.mxu0 %v3382_v47 }
 0x645   : > { %v3270_v8 = vpop.permute.xlu0 %3269  ;;  %3500 = vmatprep.subr.mxu0 %v10578_v40 }
 0x646   : > { %3501 = vmatpush2.msra.mxu0 %v3381_v44  ;;  %v3587_v44 = vld [vmem:[%s10484_s8 + $0x60] sm:$0xff] }
 0x647   : > { %3502 = vmatprep.subr.mxu0 %v10578_v40 }
 0x648   : > { %3503 = vmatpush2.msra.mxu0 %v3380_v45 }
 0x649   : > { %4001 = vmatprep.subr.mxu0 %v10578_v40 }
 0x700   : > { %v3349_v62 = vpop.f32.mrf.mxu1 }
 0x701   : > { %v3350_v29 = vadd.f32 %v3349_v62, %v3265_v22 }
 0x702   : > { %v3351_v42 = vpop.f32.mrf.mxu1 }
 0x703   : > { %6076 = vtanh.f32 %v3350_v29  ;;  %v3352_v57 = vadd.f32 %v3351_v42, %v3265_v22 }
 0x704   : > { %v3355_v60 = vpop.f32.mrf.mxu1 }
 0x705   : > { %6078 = vtanh.f32 %v3352_v57  ;;  %v3356_v41 = vadd.f32 %v3355_v60, %v3270_v8 }
 0x706   : > { %v3357_v28 = vpop.f32.mrf.mxu1 }
 0x707   : > { %6080 = vtanh.f32 %v3356_v41  ;;  %v3358_v24 = vadd.f32 %v3357_v28, %v3270_v8  ;;  %v3516_v8 = vld [vmem:[%s10483_s7 + $0x8] sm:$0xff] }
 0x708   : > { %3925 = vmatprep.mubr.f32.mxu1 %v3516_v8 }
 0x709   : > { %6082 = vtanh.f32 %v3358_v24 }
 0x710   : > { %v9383_v36 = vpop.eup %6076 }
 0x711   : > { %3390 = vrot.lane.b32.xlu1 %v9383_v36, %s10676_s19 }
 0x712   : > { %v9391_v16 = vpop.eup %6078 }
 0x713   : > { %3392 = vrot.lane.b32.xlu0 %v9391_v16, %s10676_s19 }
 0x714   : > { %v9399_v49 = vpop.eup %6080 }
 0x715   : > { %3394 = vrot.lane.b32.xlu1 %v9399_v49, %s10676_s19 }
 0x716   : > { %v9407_v14 = vpop.eup %6082 }
 0x717   : > { %3396 = vrot.lane.b32.xlu0 %v9407_v14, %s10676_s19 }
 0x783   : > { %v3391_v18 = vpop.permute.xlu1 %3390 }
 0x785   : > { %v3393_v3 = vpop.permute.xlu0 %3392 }
 0x786   : > { %v3398_v13 = vsel %vm10701_vm1, %v3391_v18, %v3393_v3  ;;  %v3405_v5 = vmax.f32 %v9391_v16, %v3393_v3  ;;  %v3585_v18 = vld [vmem:[%s10484_s8 + $0x50] sm:$0xff] }
 0x787   : > { %v3404_v26 = vmax.f32 %v9383_v36, %v3398_v13  ;;  %v3395_v25 = vpop.permute.xlu1 %3394  ;;  %v3583_v13 = vld [vmem:[%s10484_s8 + $0x40] sm:$0xff] }
 0x788   : > { %3414 = vrot.lane.b32.xlu0 %v3405_v5, %s6165_s17 }
 0x789   : > { %v3397_v58 = vpop.permute.xlu0 %3396  ;;  %3412 = vrot.lane.b32.xlu1 %v3404_v26, %s6165_s17 }
 0x78a   : > { %v3399_v46 = vsel %vm10702_vm6, %v3395_v25, %v3397_v58  ;;  %v3407_v32 = vmax.f32 %v9407_v14, %v3397_v58  ;;  %v3586_v14 = vld [vmem:[%s10484_s8 + $0x58] sm:$0xff]  ;;  %v3577_v25 = vld [vmem:[%s10484_s8 + $0x10] sm:$0xff]  ;;  %v3575_v58 = vld [vmem:[%s10484_s8] sm:$0xff] }
 0x78b   : > { %v3406_v23 = vmax.f32 %v9399_v49, %v3399_v46 }
 0x78c   : > { %3418 = vrot.lane.b32.xlu0 %v3407_v32, %s6165_s17 }
 0x78d   : > { %3416 = vrot.lane.b32.xlu1 %v3406_v23, %s6165_s17 }
 0x7fa   : > { %v3415_v0 = vpop.permute.xlu0 %3414 }
 0x7fb   : > { %v3427_v19 = vmax.f32 %v3405_v5, %v3415_v0  ;;  %v3413_v59 = vpop.permute.xlu1 %3412  ;;  %v3581_v5 = vld [vmem:[%s10484_s8 + $0x30] sm:$0xff] }
 0x7fc   : > { %v3420_v52 = vsel %vm3065_vm5, %v3413_v59, %v3415_v0 }
 0x7fd   : > { %v3426_v2 = vmax.f32 %v3404_v26, %v3420_v52  ;;  %5208 = vmatprep.mubr.msk.f32.mxu0 %vm3430_vm13, %v3427_v19  ;;  %v3579_v26 = vld [vmem:[%s10484_s8 + $0x20] sm:$0xff] }
 0x7fe   : > { %v3419_v7 = vpop.permute.xlu0 %3418 }
 0x7ff   : > { %v3429_v1 = vmax.f32 %v3407_v32, %v3419_v7  ;;  %3505 = vmatmul.mubr.f32.vlgmr.msra.gmra.mxu0 %v3426_v2  ;;  %v3417_v37 = vpop.permute.xlu1 %3416 }
 0x800   : > { %v3421_v31 = vsel %vm3065_vm5, %v3417_v37, %v3419_v7  ;;  %vm3815_vm5 = vcmask 130048   ;;  %v3515_v37 = vld [vmem:[%s10483_s7] sm:$0xff] }
 0x801   : > { %v3428_v61 = vmax.f32 %v3406_v23, %v3421_v31  ;;  %5209 = vmatprep.mubr.msk.f32.mxu0 %vm3430_vm13, %v3429_v1  ;;  %v3520_v31 = vld [vmem:[%s10483_s7 + $0x28] sm:$0xff] }
 0x803   : > { %3510 = vmatmul.mubr.f32.gmra.mxu0 %v3428_v61 }
 0x804   : > { %5210 = vmatprep.mubr.msk.f32.mxu0 %vm3815_vm5, %v3518_v27  ;;  %v3526_v27 = vld [vmem:[%s10483_s7 + $0x58] sm:$0xff] }
 0x8bf   : > { %v9490_v35 = vpop.f32.mrf.mxu0 }
 0x8c0   : > { %3658 = vrot.lane.b32.xlu1 %v9490_v35, %s6175_s23  ;;  %3628 = vrot.lane.b32.xlu0 %v9490_v35, %s6176_s27 }
 0x8c1   : > { %v3508_v56 = vpop.f32.mrf.mxu0 }
 0x8c2   : > { %v3519_v56 = vld [vmem:[%s10483_s7 + $0x20] sm:$0xff] }
 0x8c3   : > { %v9495_v12 = vpop.f32.mrf.mxu0 }
 0x8c4   : > { %3622 = vrot.lane.b32.xlu0 %v9490_v35, %s6177_s28  ;;  %3630 = vrot.lane.b32.xlu1 %v9495_v12, %s6176_s27 }
 0x8c5   : > { %v3513_v30 = vpop.f32.mrf.mxu0 }
 0x8c6   : > { %v3523_v30 = vld [vmem:[%s10483_s7 + $0x40] sm:$0xff] }
 0x8c8   : > { %3616 = vrot.lane.b32.xlu0 %v9490_v35, %s6178_s16  ;;  %3624 = vrot.lane.b32.xlu1 %v9495_v12, %s6177_s28 }
 0x8cc   : > { %3682 = vrot.lane.b32.xlu0 %v9490_v35, %s6179_s29  ;;  %3618 = vrot.lane.b32.xlu1 %v9495_v12, %s6178_s16 }
 0x8d0   : > { %3604 = vrot.lane.b32.xlu0 %v9490_v35, %s10695_s21  ;;  %3684 = vrot.lane.b32.xlu1 %v9495_v12, %s6179_s29 }
 0x8d4   : > { %3598 = vrot.lane.b32.xlu0 %v9490_v35, %s10694_s20  ;;  %3606 = vrot.lane.b32.xlu1 %v9495_v12, %s10695_s21  ;;  %s6182_s21 = smov 116  }
 0x8d8   : > { %3592 = vrot.lane.b32.xlu0 %v9490_v35, %s10676_s19  ;;  %3600 = vrot.lane.b32.xlu1 %v9495_v12, %s10694_s20  ;;  %s6181_s20 = smov 115  }
 0x8dc   : > { %3634 = vrot.lane.b32.xlu0 %v9490_v35, %s6180_s14  ;;  %3594 = vrot.lane.b32.xlu1 %v9495_v12, %s10676_s19 }
 0x8e0   : > { %3676 = vrot.lane.b32.xlu0 %v9490_v35, %s6168_s24  ;;  %3636 = vrot.lane.b32.xlu1 %v9495_v12, %s6180_s14  ;;  %s437_s14 = scalar_lea.vmem %s10489_s13, %s5307_s18 }
 0x8e4   : > { %3670 = vrot.lane.b32.xlu0 %v9490_v35, %s6165_s17  ;;  %3678 = vrot.lane.b32.xlu1 %v9495_v12, %s6168_s24 }
 0x8e8   : > { %3664 = vrot.lane.b32.xlu0 %v9490_v35, %s6164_s15  ;;  %3612 = vrot.lane.b32.xlu1 %v9495_v12, %s10561_s30 }
 0x8ec   : > { %3610 = vrot.lane.b32.xlu0 %v9490_v35, %s10561_s30 }
 0x8f0   : > { %3652 = vrot.lane.b32.xlu0 %v9490_v35, %s6181_s20 }
 0x8f4   : > { %3672 = vrot.lane.b32.xlu0 %v9495_v12, %s6165_s17  ;;  %s6183_s17 = smov 118  }
 0x8f8   : > { %3666 = vrot.lane.b32.xlu0 %v9495_v12, %s6164_s15 }
 0x8fc   : > { %3660 = vrot.lane.b32.xlu0 %v9495_v12, %s6175_s23 }
 0x900   : > { %3654 = vrot.lane.b32.xlu0 %v9495_v12, %s6181_s20 }
 0x904   : > { %3648 = vrot.lane.b32.xlu0 %v9495_v12, %s6182_s21 }
 0x932   : > { %v3629_v15 = vpop.permute.xlu0 %3628  ;;  %v9543_v10 = vpop.permute.xlu1 %3658 }
 0x933   : > { %3714 = vrot.lane.b32.xlu1 %v3629_v15, %s6166_s22 }
 0x936   : > { %v9546_v34 = vpop.permute.xlu0 %3622  ;;  %v3631_v22 = vpop.permute.xlu1 %3630 }
 0x937   : > { %3710 = vrot.lane.b32.xlu1 %v9546_v34, %s6166_s22 }
 0x93a   : > { %v9550_v62 = vpop.permute.xlu0 %3616  ;;  %v3625_v29 = vpop.permute.xlu1 %3624 }
 0x93b   : > { %3706 = vrot.lane.b32.xlu0 %v9550_v62, %s6166_s22 }
 0x93e   : > { %v3683_v42 = vpop.permute.xlu0 %3682  ;;  %v3619_v57 = vpop.permute.xlu1 %3618 }
 0x93f   : > { %3646 = vrot.lane.b32.xlu0 %v9490_v35, %s6182_s21  ;;  %3702 = vrot.lane.b32.xlu1 %v3683_v42, %s6166_s22  ;;  %v3536_v42 = vld [vmem:[%s10483_s7 + $0xa8] sm:$0xff] }
 0x942   : > { %v9559_v60 = vpop.permute.xlu0 %3604  ;;  %v3685_v41 = vpop.permute.xlu1 %3684 }
 0x943   : > { %3642 = vrot.lane.b32.xlu0 %v9495_v12, %s6183_s17  ;;  %3698 = vrot.lane.b32.xlu1 %v9559_v60, %s6166_s22 }
 0x946   : > { %v9564_v28 = vpop.permute.xlu0 %3598  ;;  %v9566_v24 = vpop.permute.xlu1 %3606 }
 0x947   : > { %3640 = vrot.lane.b32.xlu0 %v9490_v35, %s6183_s17  ;;  %3694 = vrot.lane.b32.xlu1 %v9564_v28, %s6166_s22 }
 0x94a   : > { %v9571_v21 = vpop.permute.xlu0 %3592  ;;  %v9573_v4 = vpop.permute.xlu1 %3600 }
 0x94b   : > { %3690 = vrot.lane.b32.xlu0 %v9571_v21, %s6166_s22  ;;  %3716 = vrot.lane.b32.xlu1 %v3631_v22, %s6166_s22 }
 0x94e   : > { %v9578_v17 = vpop.permute.xlu0 %3634  ;;  %v9580_v36 = vpop.permute.xlu1 %3594 }
 0x94f   : > { %3686 = vrot.lane.b32.xlu0 %v9490_v35, %s6166_s22  ;;  %3712 = vrot.lane.b32.xlu1 %v3625_v29, %s6166_s22 }
 0x952   : > { %v3677_v9 = vpop.permute.xlu0 %3676  ;;  %v9585_v16 = vpop.permute.xlu1 %3636 }
 0x953   : > { %3718 = vrot.lane.b32.xlu0 %v9578_v17, %s6166_s22  ;;  %3708 = vrot.lane.b32.xlu1 %v3619_v57, %s6166_s22 }
 0x956   : > { %v3671_v49 = vpop.permute.xlu0 %3670  ;;  %v3679_v48 = vpop.permute.xlu1 %3678 }
 0x957   : > { %3807 = vperm.xlu0 %6021, %v3588_v55   ;;  %3704 = vrot.lane.b32.xlu1 %v3685_v41, %s6166_s22 }
 0x958   : > { %5465 = vmatprep.subr.mxu1 %v3679_v48  ;;  %v3517_v48 = vld [vmem:[%s10483_s7 + $0x10] sm:$0xff] }
 0x959   : > { %5466 = vmatpush3.msra.mxu1 %v3631_v22  ;;  %v3532_v22 = vld [vmem:[%s10483_s7 + $0x88] sm:$0xff] }
 0x95a   : > { %5467 = vmatprep.subr.mxu1 %v3677_v9  ;;  %v3665_v38 = vpop.permute.xlu0 %3664  ;;  %v3613_v47 = vpop.permute.xlu1 %3612  ;;  %v3548_v9 = vld [vmem:[%s10483_s7 + $0x108] sm:$0xff] }
 0x95b   : > { %5468 = vmatpush3.msra.mxu1 %v3629_v15  ;;  %3797 = vperm.xlu0 %6021, %v3586_v14   ;;  %v3528_v15 = vld [vmem:[%s10483_s7 + $0x68] sm:$0xff] }
 0x95c   : > { %3700 = vrot.lane.b32.xlu1 %v9566_v24, %s6166_s22 }
 0x95e   : > { %v3611_v6 = vpop.permute.xlu0 %3610 }
 0x95f   : > { %3787 = vperm.xlu0 %6021, %v3584_v39   ;;  %v3551_v39 = vld [vmem:[%s10483_s7 + $0x120] sm:$0xff] }
 0x960   : > { %3696 = vrot.lane.b32.xlu1 %v9573_v4, %s6166_s22 }
 0x962   : > { %v3653_v51 = vpop.permute.xlu0 %3652 }
 0x963   : > { %3777 = vperm.xlu0 %6021, %v3582_v20   ;;  %v3521_v20 = vld [vmem:[%s10483_s7 + $0x30] sm:$0xff] }
 0x964   : > { %3692 = vrot.lane.b32.xlu1 %v9580_v36, %s6166_s22 }
 0x966   : > { %v3673_v50 = vpop.permute.xlu0 %3672 }
 0x967   : > { %3767 = vperm.xlu0 %6021, %v3580_v11   ;;  %5469 = vmatprep.subr.mxu1 %v3673_v50  ;;  %v3560_v11 = vld [vmem:[%s10483_s7 + $0x168] sm:$0xff]  ;;  %v3525_v50 = vld [vmem:[%s10483_s7 + $0x50] sm:$0xff] }
 0x968   : > { %3688 = vrot.lane.b32.xlu1 %v9495_v12, %s6166_s22  ;;  %5470 = vmatpush3.msra.mxu1 %v3625_v29 }
 0x969   : > { %5471 = vmatprep.subr.mxu1 %v3671_v49  ;;  %v3552_v49 = vld [vmem:[%s10483_s7 + $0x128] sm:$0xff] }
 0x96a   : > { %v3667_v33 = vpop.permute.xlu0 %3666  ;;  %5472 = vmatpush3.msra.mxu1 %v9546_v34  ;;  %v3527_v34 = vld [vmem:[%s10483_s7 + $0x60] sm:$0xff] }
 0x96b   : > { %3757 = vperm.xlu0 %6021, %v3578_v43   ;;  %5473 = vmatprep.subr.mxu1 %v3667_v33  ;;  %v3530_v43 = vld [vmem:[%s10483_s7 + $0x78] sm:$0xff]  ;;  %v3559_v33 = vld [vmem:[%s10483_s7 + $0x160] sm:$0xff] }
 0x96c   : > { %3720 = vrot.lane.b32.xlu1 %v9585_v16, %s6166_s22  ;;  %5474 = vmatpush3.msra.mxu1 %v3619_v57  ;;  %v3535_v57 = vld [vmem:[%s10483_s7 + $0xa0] sm:$0xff] }
 0x96d   : > { %5475 = vmatprep.subr.mxu1 %v3665_v38  ;;  %v3522_v38 = vld [vmem:[%s10483_s7 + $0x38] sm:$0xff] }
 0x96e   : > { %v3661_v53 = vpop.permute.xlu0 %3660  ;;  %5476 = vmatpush3.msra.mxu1 %v9550_v62  ;;  %v3531_v62 = vld [vmem:[%s10483_s7 + $0x80] sm:$0xff] }
 0x96f   : > { %3747 = vperm.xlu0 %6021, %v3576_v54   ;;  %5477 = vmatprep.subr.mxu1 %v3661_v53  ;;  %v3564_v54 = vld [vmem:[%s10483_s7 + $0x188] sm:$0xff]  ;;  %v3534_v53 = vld [vmem:[%s10483_s7 + $0x98] sm:$0xff] }
 0x970   : > { %3812 = vperm.xlu1 %6057, %v3589_v63   ;;  %5478 = vmatpush3.msra.mxu1 %v3613_v47  ;;  %v3529_v63 = vld [vmem:[%s10483_s7 + $0x70] sm:$0xff]  ;;  %v3563_v47 = vld [vmem:[%s10483_s7 + $0x180] sm:$0xff] }
 0x971   : > { %5479 = vmatprep.subr.mxu1 %v9543_v10 }
 0x972   : > { %v3655_v45 = vpop.permute.xlu0 %3654  ;;  %5480 = vmatpush3.msra.mxu1 %v3611_v6  ;;  %v3556_v6 = vld [vmem:[%s10483_s7 + $0x148] sm:$0xff] }
 0x973   : > { %5481 = vmatprep.subr.mxu1 %v3655_v45  ;;  %v3533_v45 = vld [vmem:[%s10483_s7 + $0x90] sm:$0xff] }
 0x974   : > { %3802 = vperm.xlu1 %6057, %v3587_v44   ;;  %5482 = vmatpush3.msra.mxu1 %v9566_v24  ;;  %v3568_v44 = vld [vmem:[%s10483_s7 + $0x1a8] sm:$0xff] }
 0x975   : > { %5483 = vmatprep.subr.mxu1 %v3653_v51  ;;  %v3555_v51 = vld [vmem:[%s10483_s7 + $0x140] sm:$0xff] }
 0x976   : > { %v3649_v3 = vpop.permute.xlu0 %3648  ;;  %5484 = vmatpush3.msra.mxu1 %v9559_v60  ;;  %v3540_v60 = vld [vmem:[%s10483_s7 + $0xc8] sm:$0xff] }
 0x977   : > { %5485 = vmatprep.subr.mxu1 %v3649_v3  ;;  %v3567_v3 = vld [vmem:[%s10483_s7 + $0x1a0] sm:$0xff] }
 0x978   : > { %3792 = vperm.xlu1 %6057, %v3585_v18   ;;  %5486 = vmatpush3.msra.mxu1 %v9573_v4  ;;  %v3543_v4 = vld [vmem:[%s10483_s7 + $0xe0] sm:$0xff]  ;;  %v3538_v18 = vld [vmem:[%s10483_s7 + $0xb8] sm:$0xff] }
 0x97c   : > { %3782 = vperm.xlu1 %6057, %v3583_v13   ;;  %v3572_v13 = vld [vmem:[%s10483_s7 + $0x1c8] sm:$0xff] }
 0x980   : > { %3772 = vperm.xlu1 %6057, %v3581_v5   ;;  %v3537_v5 = vld [vmem:[%s10483_s7 + $0xb0] sm:$0xff] }
 0x984   : > { %3762 = vperm.xlu1 %6057, %v3579_v26   ;;  %v3542_v26 = vld [vmem:[%s10483_s7 + $0xd8] sm:$0xff] }
 0x988   : > { %3752 = vperm.xlu1 %6057, %v3577_v25   ;;  %v3571_v25 = vld [vmem:[%s10483_s7 + $0x1c0] sm:$0xff] }
 0x98c   : > { %3742 = vperm.xlu1 %6057, %v3575_v58   ;;  %v3541_v58 = vld [vmem:[%s10483_s7 + $0xd0] sm:$0xff] }
 0x9a5   : > { %v3715_v46 = vpop.permute.xlu1 %3714 }
 0x9a9   : > { %v3711_v32 = vpop.permute.xlu1 %3710 }
 0x9ad   : > { %v3707_v23 = vpop.permute.xlu0 %3706 }
 0x9b1   : > { %v3647_v0 = vpop.permute.xlu0 %3646  ;;  %v3703_v19 = vpop.permute.xlu1 %3702 }
 0x9b2   : > { %5487 = vmatprep.subr.mxu1 %v3647_v0  ;;  %v3549_v0 = vld [vmem:[%s10483_s7 + $0x110] sm:$0xff] }
 0x9b3   : > { %5488 = vmatpush3.msra.mxu1 %v9564_v28  ;;  %v3539_v28 = vld [vmem:[%s10483_s7 + $0xc0] sm:$0xff] }
 0x9b5   : > { %v3643_v59 = vpop.permute.xlu0 %3642  ;;  %v3699_v52 = vpop.permute.xlu1 %3698 }
 0x9b6   : > { %5489 = vmatprep.subr.mxu1 %v3643_v59  ;;  %v3553_v59 = vld [vmem:[%s10483_s7 + $0x130] sm:$0xff] }
 0x9b7   : > { %5490 = vmatpush3.msra.mxu1 %v9580_v36 }
 0x9b9   : > { %v3641_v2 = vpop.permute.xlu0 %3640  ;;  %v3695_v7 = vpop.permute.xlu1 %3694 }
 0x9ba   : > { %5491 = vmatprep.subr.mxu1 %v3641_v2  ;;  %v3557_v2 = vld [vmem:[%s10483_s7 + $0x150] sm:$0xff] }
 0x9bb   : > { %5492 = vmatpush3.msra.mxu1 %v9571_v21  ;;  %v3544_v21 = vld [vmem:[%s10483_s7 + $0xe8] sm:$0xff] }
 0x9bc   : > { %5493 = vmatprep.subr.mxu1 %v9585_v16  ;;  %v3547_v16 = vld [vmem:[%s10483_s7 + $0x100] sm:$0xff] }
 0x9bd   : > { %5494 = vmatpush3.msra.mxu1 %v9495_v12  ;;  %v3717_v1 = vpop.permute.xlu1 %3716  ;;  %v3524_v12 = vld [vmem:[%s10483_s7 + $0x48] sm:$0xff]  ;;  %v3691_v41 = vpop.permute.xlu0 %3690 }
 0x9be   : > { %5495 = vmatprep.subr.mxu1 %v9578_v17  ;;  %4002 = vmatpush1.msra.mxu0 %v3717_v1  ;;  %v3561_v1 = vld [vmem:[%s10483_s7 + $0x170] sm:$0xff] }
 0x9bf   : > { %5496 = vmatpush3.msra.mxu1 %v9490_v35  ;;  %4003 = vmatprep.subr.mxu0 %v10578_v40 }
 0x9c0   : > { %3926 = vmatmul.mubr.f32.vlgmr.msra.gmra.mxu1 %v3515_v37  ;;  %4004 = vmatpush1.msra.mxu0 %v3715_v46  ;;  %v3546_v46 = vld [vmem:[%s10483_s7 + $0xf8] sm:$0xff] }
 0x9c1   : > { %4005 = vmatprep.subr.mxu0 %v10578_v40  ;;  %v3713_v61 = vpop.permute.xlu1 %3712  ;;  %3930 = vmatprep.mubr.f32.mxu1 %v3520_v31  ;;  %v3687_v17 = vpop.permute.xlu0 %3686  ;;  %v3566_v37 = vld [vmem:[%s10483_s7 + $0x198] sm:$0xff]  ;;  %v3565_v31 = vld [vmem:[%s10483_s7 + $0x190] sm:$0xff] }
 0x9c2   : > { %4006 = vmatpush1.msra.mxu0 %v3713_v61  ;;  %5695 = vmatprep.subr.mxu1 %v10578_v40  ;;  %v3570_v61 = vld [vmem:[%s10483_s7 + $0x1b8] sm:$0xff] }
 0x9c3   : > { %4007 = vmatprep.subr.mxu0 %v10578_v40 }
 0x9c4   : > { %3931 = vmatmul.mubr.f32.gmra.mxu1 %v3519_v56  ;;  %4008 = vmatpush1.msra.mxu0 %v3711_v32  ;;  %v3545_v32 = vld [vmem:[%s10483_s7 + $0xf0] sm:$0xff] }
 0x9c5   : > { %4009 = vmatprep.subr.mxu0 %v10578_v40  ;;  %v3709_v35 = vpop.permute.xlu1 %3708  ;;  %3935 = vmatprep.mubr.f32.mxu1 %v3524_v12  ;;  %v3719_v14 = vpop.permute.xlu0 %3718  ;;  %v3569_v56 = vld [vmem:[%s10483_s7 + $0x1b0] sm:$0xff]  ;;  %v3574_v12 = vld [vmem:[%s10483_s7 + $0x1d8] sm:$0xff] }
 0x9c6   : > { %4010 = vmatpush1.msra.mxu0 %v3709_v35  ;;  %v3573_v35 = vld [vmem:[%s10483_s7 + $0x1d0] sm:$0xff] }
 0x9c7   : > { %4011 = vmatprep.subr.mxu0 %v10578_v40 }
 0x9c8   : > { %3936 = vmatmul.mubr.f32.gmra.mxu1 %v3523_v30  ;;  %4012 = vmatpush1.msra.mxu0 %v3707_v23  ;;  %v3550_v23 = vld [vmem:[%s10483_s7 + $0x118] sm:$0xff] }
 0x9c9   : > { %4013 = vmatprep.subr.mxu0 %v10578_v40  ;;  %v3705_v10 = vpop.permute.xlu1 %3704  ;;  %3940 = vmatprep.mubr.f32.mxu1 %v3528_v15 }
 0x9ca   : > { %4014 = vmatpush1.msra.mxu0 %v3705_v10 }
 0x9cb   : > { %4015 = vmatprep.subr.mxu0 %v10578_v40 }
 0x9cc   : > { %3941 = vmatmul.mubr.f32.gmra.mxu1 %v3527_v34  ;;  %4016 = vmatpush1.msra.mxu0 %v3703_v19  ;;  %v3554_v19 = vld [vmem:[%s10483_s7 + $0x138] sm:$0xff] }
 0x9cd   : > { %4017 = vmatprep.subr.mxu0 %v10578_v40  ;;  %3945 = vmatprep.mubr.f32.mxu1 %v3532_v22 }
 0x9ce   : > { %v3701_v29 = vpop.permute.xlu1 %3700 }
 0x9cf   : > { %4018 = vmatpush1.msra.mxu0 %v3701_v29 }
 0x9d0   : > { %4019 = vmatprep.subr.mxu0 %v10578_v40  ;;  %3946 = vmatmul.mubr.f32.gmra.mxu1 %v3531_v62 }
 0x9d1   : > { %4020 = vmatpush1.msra.mxu0 %v3699_v52  ;;  %3950 = vmatprep.mubr.f32.mxu1 %v3536_v42  ;;  %v3558_v52 = vld [vmem:[%s10483_s7 + $0x158] sm:$0xff] }
 0x9d2   : > { %4021 = vmatprep.subr.mxu0 %v10578_v40  ;;  %v3697_v8 = vpop.permute.xlu1 %3696 }
 0x9d3   : > { %4022 = vmatpush1.msra.mxu0 %v3697_v8 }
 0x9d4   : > { %4023 = vmatprep.subr.mxu0 %v10578_v40  ;;  %3951 = vmatmul.mubr.f32.gmra.mxu1 %v3535_v57 }
 0x9d5   : > { %4024 = vmatpush1.msra.mxu0 %v3695_v7  ;;  %3955 = vmatprep.mubr.f32.mxu1 %v3540_v60  ;;  %v3562_v7 = vld [vmem:[%s10483_s7 + $0x178] sm:$0xff] }
 0x9d6   : > { %4025 = vmatprep.subr.mxu0 %v10578_v40  ;;  %v3693_v24 = vpop.permute.xlu1 %3692 }
 0x9d7   : > { %4026 = vmatpush1.msra.mxu0 %v3693_v24 }
 0x9d8   : > { %4027 = vmatprep.subr.mxu0 %v10578_v40  ;;  %3956 = vmatmul.mubr.f32.gmra.mxu1 %v3539_v28 }
 0x9d9   : > { %4028 = vmatpush1.msra.mxu0 %v3691_v41  ;;  %3960 = vmatprep.mubr.f32.mxu1 %v3544_v21 }
 0x9da   : > { %4029 = vmatprep.subr.mxu0 %v10578_v40  ;;  %v3689_v36 = vpop.permute.xlu1 %3688 }
 0x9db   : > { %4030 = vmatpush1.msra.mxu0 %v3689_v36 }
 0x9dc   : > { %4031 = vmatprep.subr.mxu0 %v10578_v40  ;;  %3961 = vmatmul.mubr.f32.gmra.mxu1 %v3543_v4 }
 0x9dd   : > { %4032 = vmatpush1.msra.mxu0 %v3687_v17  ;;  %3965 = vmatprep.mubr.f32.mxu1 %v3548_v9 }
 0x9de   : > { %4061 = vmatprep.subr.mxu0 %v10578_v40  ;;  %v3721_v55 = vpop.permute.xlu1 %3720 }
 0x9df   : > { %4062 = vmatpush2.msra.mxu0 %v3721_v55 }
 0x9e0   : > { %4063 = vmatprep.subr.mxu0 %v10578_v40  ;;  %3966 = vmatmul.mubr.f32.gmra.mxu1 %v3547_v16 }
 0x9e1   : > { %4064 = vmatpush2.msra.mxu0 %v3719_v14  ;;  %3970 = vmatprep.mubr.f32.mxu1 %v3552_v49 }
 0x9e2   : > { %4066 = vmatmul.mubr.f32.vlgmr.msra.gmra.mxu0 %v3517_v48  ;;  %5758 = vmatprep.subr.mxu0 %v10578_v40  ;;  %v9902_v48 = vpop.permute.xlu0 %3807 }
 0x9e3   : > { %5211 = vmatprep.mubr.msk.f32.mxu0 %vm3815_vm5, %v3522_v38 }
 0x9e4   : > { %3971 = vmatmul.mubr.f32.gmra.mxu1 %v3551_v39 }
 0x9e5   : > { %3975 = vmatprep.mubr.f32.mxu1 %v3556_v6 }
 0x9e6   : > { %4071 = vmatmul.mubr.f32.gmra.mxu0 %v3521_v20  ;;  %v9904_v20 = vpop.permute.xlu0 %3797 }
 0x9e7   : > { %5212 = vmatprep.mubr.msk.f32.mxu0 %vm3815_vm5, %v3526_v27 }
 0x9e8   : > { %3976 = vmatmul.mubr.f32.gmra.mxu1 %v3555_v51 }
 0x9e9   : > { %3980 = vmatprep.mubr.f32.mxu1 %v3560_v11 }
 0x9ea   : > { %4076 = vmatmul.mubr.f32.gmra.mxu0 %v3525_v50 }
 0x9eb   : > { %5213 = vmatprep.mubr.msk.f32.mxu0 %vm3815_vm5, %v3530_v43  ;;  %v9874_v30 = vpop.permute.xlu1 %3812 }
 0x9ec   : > { %3981 = vmatmul.mubr.f32.gmra.mxu1 %v3559_v33 }
 0x9ed   : > { %3985 = vmatprep.mubr.f32.mxu1 %v3564_v54 }
 0x9ee   : > { %4081 = vmatmul.mubr.f32.gmra.mxu0 %v3529_v63  ;;  %v3788_v63 = vpop.permute.xlu0 %3787 }
 0x9ef   : > { %5214 = vmatprep.mubr.msk.f32.mxu0 %vm3815_vm5, %v3534_v53  ;;  %v9876_v15 = vpop.permute.xlu1 %3802 }
 0x9f0   : > { %3986 = vmatmul.mubr.f32.gmra.mxu1 %v3563_v47 }
 0x9f1   : > { %3990 = vmatprep.mubr.f32.mxu1 %v3568_v44 }
 0x9f2   : > { %4086 = vmatmul.mubr.f32.gmra.mxu0 %v3533_v45 }
 0x9f3   : > { %5215 = vmatprep.mubr.msk.f32.mxu0 %vm3815_vm5, %v3538_v18  ;;  %v9878_v34 = vpop.permute.xlu1 %3792  ;;  %v3778_v18 = vpop.permute.xlu0 %3777 }
 0x9f4   : > { %3991 = vmatmul.mubr.f32.gmra.mxu1 %v3567_v3 }
 0x9f5   : > { %3995 = vmatprep.mubr.f32.mxu1 %v3572_v13 }
 0x9f6   : > { %4091 = vmatmul.mubr.f32.gmra.mxu0 %v3537_v5 }
 0x9f7   : > { %5216 = vmatprep.mubr.msk.f32.mxu0 %vm3815_vm5, %v3542_v26  ;;  %v9884_v57 = vpop.permute.xlu1 %3782 }
 0x9f8   : > { %3996 = vmatmul.mubr.f32.gmra.mxu1 %v3571_v25 }
 0x9f9   : > { %5725 = vmatprep.mubr.msk.f32.mxu1 %vm10693_vm4, %v10578_v40 }
 0x9fa   : > { %4096 = vmatmul.mubr.f32.gmra.mxu0 %v3541_v58 }
 0x9fb   : > { %5217 = vmatprep.mubr.msk.f32.mxu0 %vm3815_vm5, %v3546_v46  ;;  %v3773_v28 = vpop.permute.xlu1 %3772  ;;  %v3768_v46 = vpop.permute.xlu0 %3767 }
 0x9fe   : > { %4101 = vmatmul.mubr.f32.gmra.mxu0 %v3545_v32 }
 0x9ff   : > { %5218 = vmatprep.mubr.msk.f32.mxu0 %vm3815_vm5, %v3550_v23  ;;  %v9898_v17 = vpop.permute.xlu1 %3762 }
 0xa02   : > { %4106 = vmatmul.mubr.f32.gmra.mxu0 %v3549_v0 }
 0xa03   : > { %5219 = vmatprep.mubr.msk.f32.mxu0 %vm3815_vm5, %v3554_v19  ;;  %v9900_v55 = vpop.permute.xlu1 %3752 }
 0xa06   : > { %4111 = vmatmul.mubr.f32.gmra.mxu0 %v3553_v59 }
 0xa07   : > { %5220 = vmatprep.mubr.msk.f32.mxu0 %vm3815_vm5, %v3558_v52  ;;  %v3743_v39 = vpop.permute.xlu1 %3742 }
 0xa0a   : > { %4116 = vmatmul.mubr.f32.gmra.mxu0 %v3557_v2 }
 0xa0b   : > { %5221 = vmatprep.mubr.msk.f32.mxu0 %vm3815_vm5, %v3562_v7 }
 0xa0e   : > { %4121 = vmatmul.mubr.f32.gmra.mxu0 %v3561_v1 }
 0xa0f   : > { %5222 = vmatprep.mubr.msk.f32.mxu0 %vm3815_vm5, %v3566_v37 }
 0xa12   : > { %4126 = vmatmul.mubr.f32.gmra.mxu0 %v3565_v31 }
 0xa13   : > { %5223 = vmatprep.mubr.msk.f32.mxu0 %vm3815_vm5, %v3570_v61 }
 0xa16   : > { %4131 = vmatmul.mubr.f32.gmra.mxu0 %v3569_v56 }
 0xa17   : > { %5224 = vmatprep.mubr.msk.f32.mxu0 %vm3815_vm5, %v3574_v12 }
 0xa1a   : > { %4136 = vmatmul.mubr.f32.gmra.mxu0 %v3573_v35 }
 0xa1b   : > { %5788 = vmatprep.mubr.msk.f32.mxu0 %vm10693_vm4, %v10578_v40 }
 0xa80   : > { %v5497_v10 = vpop.f32.mrf.mxu1 }
 0xa82   : > { %v5498_v22 = vpop.f32.mrf.mxu1 }
 0xa83   : > { %v5499_v62 = vadd.f32 %v5498_v22, %v5497_v10 }
 0xa84   : > { %v9880_v29 = vpop.f32.mrf.mxu1 }
 0xa85   : > { %v3928_v27 = vadd.f32 %v5499_v62, %v3743_v39 }
 0xa86   : > { %v9882_v42 = vpop.f32.mrf.mxu1 }
 0xa88   : > { %v9886_v8 = vpop.f32.mrf.mxu1 }
 0xa8a   : > { %v9888_v60 = vpop.f32.mrf.mxu1 }
 0xa8c   : > { %v9890_v41 = vpop.f32.mrf.mxu1 }
 0xa8e   : > { %v9892_v24 = vpop.f32.mrf.mxu1 }
 0xa90   : > { %v9894_v21 = vpop.f32.mrf.mxu1 }
 0xa92   : > { %v9896_v4 = vpop.f32.mrf.mxu1 }
 0xa94   : > { %v5512_v36 = vpop.f32.mrf.mxu1 }
 0xa96   : > { %v5513_v9 = vpop.f32.mrf.mxu1 }
 0xa97   : > { %v5514_v26 = vadd.f32 %v5513_v9, %v5512_v36 }
 0xa98   : > { %v5515_v16 = vpop.f32.mrf.mxu1 }
 0xa99   : > { %v3953_v0 = vadd.f32 %v5514_v26, %v3768_v46 }
 0xa9a   : > { %v5516_v49 = vpop.f32.mrf.mxu1 }
 0xa9b   : > { %v5517_v23 = vadd.f32 %v5516_v49, %v5515_v16 }
 0xa9c   : > { %v5518_v14 = vpop.f32.mrf.mxu1 }
 0xa9d   : > { %v3958_v1 = vadd.f32 %v5517_v23, %v3773_v28 }
 0xa9e   : > { %v5519_v38 = vpop.f32.mrf.mxu1 }
 0xa9f   : > { %v5520_v7 = vadd.f32 %v5519_v38, %v5518_v14 }
 0xaa0   : > { %v5521_v6 = vpop.f32.mrf.mxu1 }
 0xaa1   : > { %v3963_v35 = vadd.f32 %v5520_v7, %v3778_v18 }
 0xaa2   : > { %v4067_v51 = vpop.f32.mrf.mxu0  ;;  %v5522_v11 = vpop.f32.mrf.mxu1 }
 0xaa3   : > { %v9906_v50 = vadd.f32 %v4067_v51, %v3928_v27  ;;  %v5523_v12 = vadd.f32 %v5522_v11, %v5521_v6 }
 0xaa4   : > { %v4069_v43 = vpop.f32.mrf.mxu0  ;;  %v5524_v33 = vpop.f32.mrf.mxu1 }
 0xaa5   : > { %v3968_v16 = vadd.f32 %v5523_v12, %v9884_v57 }
 0xaa6   : > { %v9908_v54 = vpop.f32.mrf.mxu0  ;;  %v5525_v47 = vpop.f32.mrf.mxu1 }
 0xaa7   : > { %v5526_v9 = vadd.f32 %v5525_v47, %v5524_v33 }
 0xaa8   : > { %v4074_v53 = vpop.f32.mrf.mxu0  ;;  %v5527_v3 = vpop.f32.mrf.mxu1 }
 0xaa9   : > { %v3973_v27 = vadd.f32 %v5526_v9, %v3788_v63 }
 0xaaa   : > { %v9910_v44 = vpop.f32.mrf.mxu0  ;;  %v5528_v25 = vpop.f32.mrf.mxu1 }
 0xaab   : > { %v5529_v28 = vadd.f32 %v5528_v25, %v5527_v3 }
 0xaac   : > { %v4079_v45 = vpop.f32.mrf.mxu0  ;;  %v5530_v19 = vpop.f32.mrf.mxu1 }
 0xaad   : > { %v3978_v57 = vadd.f32 %v5529_v28, %v9878_v34  ;;  %v4168_v28 = vld [vmem:[%s10485_s9 + $0x8] sm:$0xff] }
 0xaae   : > { %v9912_v13 = vpop.f32.mrf.mxu0  ;;  %v5531_v37 = vpop.f32.mrf.mxu1 }
 0xaaf   : > { %v5532_v33 = vadd.f32 %v5531_v37, %v5530_v19 }
 0xab0   : > { %v4084_v5 = vpop.f32.mrf.mxu0  ;;  %v5533_v10 = vpop.f32.mrf.mxu1 }
 0xab1   : > { %v3983_v26 = vadd.f32 %v5532_v33, %v9904_v20  ;;  %v4175_v33 = vld [vmem:[%s10485_s9 + $0x40] sm:$0xff] }
 0xab2   : > { %v9914_v58 = vpop.f32.mrf.mxu0  ;;  %v5534_v49 = vpop.f32.mrf.mxu1 }
 0xab3   : > { %v5535_v5 = vadd.f32 %v5534_v49, %v5533_v10 }
 0xab4   : > { %v4089_v32 = vpop.f32.mrf.mxu0  ;;  %v5536_v6 = vpop.f32.mrf.mxu1 }
 0xab5   : > { %v3988_v19 = vadd.f32 %v5535_v5, %v9876_v15 }
 0xab6   : > { %v4092_v59 = vpop.f32.mrf.mxu0  ;;  %v5537_v45 = vpop.f32.mrf.mxu1 }
 0xab7   : > { %v4093_v52 = vadd.f32 %v4092_v59, %v3953_v0  ;;  %v5538_v0 = vadd.f32 %v5537_v45, %v5536_v6  ;;  %v4170_v6 = vld [vmem:[%s10485_s9 + $0x18] sm:$0xff] }
 0xab8   : > { %v4094_v2 = vpop.f32.mrf.mxu0  ;;  %v5539_v46 = vpop.f32.mrf.mxu1 }
 0xab9   : > { %6084 = vtanh.f32 %v4093_v52  ;;  %v5508_v52 = vadd.f32 %v9892_v24, %v9890_v41  ;;  %v5511_v24 = vadd.f32 %v9896_v4, %v9894_v21 }
 0xaba   : > { %v4097_v31 = vpop.f32.mrf.mxu0  ;;  %v5540_v2 = vpop.f32.mrf.mxu1 }
 0xabb   : > { %v4098_v61 = vadd.f32 %v4097_v31, %v3958_v1  ;;  %v3758_v1 = vpop.permute.xlu0 %3757  ;;  %v5541_v31 = vadd.f32 %v5540_v2, %v5539_v46 }
 0xabc   : > { %v4099_v56 = vpop.f32.mrf.mxu0  ;;  %v3943_v15 = vadd.f32 %v5508_v52, %v3758_v1 }
 0xabd   : > { %6086 = vtanh.f32 %v4098_v61  ;;  %v3993_v61 = vadd.f32 %v5538_v0, %v9902_v48  ;;  %v3998_v48 = vadd.f32 %v5541_v31, %v9874_v30 }
 0xabe   : > { %v4102_v22 = vpop.f32.mrf.mxu0  ;;  %v4083_v10 = vadd.f32 %v9912_v13, %v3943_v15 }
 0xabf   : > { %v4103_v62 = vadd.f32 %v4102_v22, %v3963_v35  ;;  %v5502_v35 = vadd.f32 %v9882_v42, %v9880_v29  ;;  %v5505_v29 = vadd.f32 %v9888_v60, %v9886_v8  ;;  %v3948_v42 = vadd.f32 %v5511_v24, %v9898_v17  ;;  %v5237_v24 = vld [vmem:[%s10485_s9 + $0x60] sm:$0xff] }
 0xac0   : > { %v4104_v36 = vpop.f32.mrf.mxu0 }
 0xac1   : > { %6088 = vtanh.f32 %v4103_v62  ;;  %v3748_v36 = vpop.permute.xlu0 %3747  ;;  %v4088_v13 = vadd.f32 %v9914_v58, %v3948_v42  ;;  %v4167_v58 = vld [vmem:[%s10485_s9] sm:$0xff]  ;;  %v5240_v42 = vld [vmem:[%s10485_s9 + $0x78] sm:$0xff] }
 0xac2   : > { %v4107_v39 = vpop.f32.mrf.mxu0 }
 0xac3   : > { %v4108_v14 = vadd.f32 %v4107_v39, %v3968_v16  ;;  %v3933_v16 = vadd.f32 %v5502_v35, %v3748_v36  ;;  %v3938_v39 = vadd.f32 %v5505_v29, %v9900_v55 }
 0xac4   : > { %v4109_v38 = vpop.f32.mrf.mxu0 }
 0xac5   : > { %6090 = vtanh.f32 %v4108_v14  ;;  %v4073_v4 = vadd.f32 %v9908_v54, %v3933_v16  ;;  %v4078_v38 = vadd.f32 %v9910_v44, %v3938_v39 }
 0xac6   : > { %v9917_v51 = vpop.eup %6084  ;;  %v4112_v11 = vpop.f32.mrf.mxu0 }
 0xac7   : > { %v4113_v43 = vadd.f32 %v4112_v11, %v3973_v27  ;;  %4380 = vrot.lane.b32.xlu1 %v9917_v51, %s10676_s19  ;;  %v4169_v27 = vld [vmem:[%s10485_s9 + $0x10] sm:$0xff]  ;;  %v4171_v11 = vld [vmem:[%s10485_s9 + $0x20] sm:$0xff] }
 0xac8   : > { %v4114_v53 = vpop.f32.mrf.mxu0 }
 0xac9   : > { %6092 = vtanh.f32 %v4113_v43  ;;  %v4172_v43 = vld [vmem:[%s10485_s9 + $0x28] sm:$0xff]  ;;  %v4173_v53 = vld [vmem:[%s10485_s9 + $0x30] sm:$0xff] }
 0xaca   : > { %v9922_v47 = vpop.eup %6086  ;;  %v4117_v18 = vpop.f32.mrf.mxu0 }
 0xacb   : > { %v4118_v3 = vadd.f32 %v4117_v18, %v3978_v57  ;;  %4382 = vrot.lane.b32.xlu0 %v9922_v47, %s10676_s19  ;;  %v4176_v57 = vld [vmem:[%s10485_s9 + $0x48] sm:$0xff] }
 0xacc   : > { %v4119_v63 = vpop.f32.mrf.mxu0 }
 0xacd   : > { %6094 = vtanh.f32 %v4118_v3 }
 0xace   : > { %v9927_v25 = vpop.eup %6088  ;;  %v4122_v32 = vpop.f32.mrf.mxu0 }
 0xacf   : > { %v4123_v23 = vadd.f32 %v4122_v32, %v3983_v26  ;;  %4384 = vrot.lane.b32.xlu1 %v9927_v25, %s10676_s19 }
 0xad0   : > { %v4124_v34 = vpop.f32.mrf.mxu0 }
 0xad1   : > { %6096 = vtanh.f32 %v4123_v23 }
 0xad2   : > { %v9932_v59 = vpop.eup %6090  ;;  %v4127_v20 = vpop.f32.mrf.mxu0 }
 0xad3   : > { %v4128_v7 = vadd.f32 %v4127_v20, %v3988_v19  ;;  %4386 = vrot.lane.b32.xlu0 %v9932_v59, %s10676_s19 }
 0xad4   : > { %v4129_v37 = vpop.f32.mrf.mxu0 }
 0xad5   : > { %6098 = vtanh.f32 %v4128_v7 }
 0xad6   : > { %v9939_v56 = vpop.eup %6092  ;;  %v4132_v12 = vpop.f32.mrf.mxu0 }
 0xad7   : > { %v4133_v41 = vadd.f32 %v4132_v12, %v3993_v61  ;;  %4388 = vrot.lane.b32.xlu1 %v9939_v56, %s10676_s19  ;;  %v5236_v12 = vld [vmem:[%s10485_s9 + $0x58] sm:$0xff] }
 0xad8   : > { %v4134_v22 = vpop.f32.mrf.mxu0 }
 0xad9   : > { %6100 = vtanh.f32 %v4133_v41 }
 0xada   : > { %v9949_v62 = vpop.eup %6094  ;;  %v4137_v9 = vpop.f32.mrf.mxu0  ;;  %6102 = vtanh.f32 %v4083_v10 }
 0xadb   : > { %v4138_v49 = vadd.f32 %v4137_v9, %v3998_v48  ;;  %4390 = vrot.lane.b32.xlu0 %v9949_v62, %s10676_s19  ;;  %v5238_v48 = vld [vmem:[%s10485_s9 + $0x68] sm:$0xff]  ;;  %v5239_v9 = vld [vmem:[%s10485_s9 + $0x70] sm:$0xff] }
 0xadc   : > { %v4139_v21 = vpop.f32.mrf.mxu0 }
 0xadd   : > { %6104 = vtanh.f32 %v4138_v49 }
 0xade   : > { %v6097_v30 = vpop.eup %6096  ;;  %6106 = vtanh.f32 %v4073_v4 }
 0xadf   : > { %4392 = vrot.lane.b32.xlu1 %v6097_v30, %s10676_s19  ;;  %6108 = vtanh.f32 %v4088_v13 }
 0xae0   : > { %6110 = vtanh.f32 %v4078_v38 }
 0xae1   : > { %6112 = vtanh.f32 %v9906_v50 }
 0xae2   : > { %v6099_v14 = vpop.eup %6098 }
 0xae3   : > { %4394 = vrot.lane.b32.xlu0 %v6099_v14, %s10676_s19 }
 0xae6   : > { %v6101_v8 = vpop.eup %6100 }
 0xae7   : > { %4396 = vrot.lane.b32.xlu1 %v6101_v8, %s10676_s19  ;;  %v9963_v60 = vpop.eup %6102 }
 0xaea   : > { %v6105_v17 = vpop.eup %6104 }
 0xaeb   : > { %4376 = vrot.lane.b32.xlu1 %v9963_v60, %s10676_s19  ;;  %5696 = vmatpush3.msra.mxu1 %v6105_v17  ;;  %v9970_v55 = vpop.eup %6106 }
 0xaec   : > { %4398 = vrot.lane.b32.xlu0 %v6105_v17, %s10676_s19  ;;  %5697 = vmatprep.subr.mxu1 %v10578_v40  ;;  %v9973_v54 = vpop.eup %6108 }
 0xaed   : > { %5698 = vmatpush3.msra.mxu1 %v6101_v8  ;;  %v9981_v50 = vpop.eup %6110 }
 0xaee   : > { %5699 = vmatprep.subr.mxu1 %v10578_v40  ;;  %v9990_v44 = vpop.eup %6112 }
 0xaef   : > { %4372 = vrot.lane.b32.xlu1 %v9970_v55, %s10676_s19  ;;  %5700 = vmatpush3.msra.mxu1 %v6099_v14 }
 0xaf0   : > { %4378 = vrot.lane.b32.xlu0 %v9973_v54, %s10676_s19  ;;  %5701 = vmatprep.subr.mxu1 %v10578_v40 }
 0xaf1   : > { %5702 = vmatpush3.msra.mxu1 %v6097_v30 }
 0xaf2   : > { %5703 = vmatprep.subr.mxu1 %v10578_v40 }
 0xaf3   : > { %4838 = vrot.lane.b32.xlu1 %v6101_v8, %s6177_s28  ;;  %5704 = vmatpush3.msra.mxu1 %v9949_v62 }
 0xaf4   : > { %4374 = vrot.lane.b32.xlu0 %v9981_v50, %s10676_s19  ;;  %5705 = vmatprep.subr.mxu1 %v10578_v40 }
 0xaf5   : > { %5706 = vmatpush3.msra.mxu1 %v9939_v56 }
 0xaf6   : > { %5707 = vmatprep.subr.mxu1 %v10578_v40 }
 0xaf7   : > { %4836 = vrot.lane.b32.xlu1 %v6099_v14, %s6177_s28  ;;  %5708 = vmatpush3.msra.mxu1 %v9932_v59 }
 0xaf8   : > { %4370 = vrot.lane.b32.xlu0 %v9990_v44, %s10676_s19  ;;  %5709 = vmatprep.subr.mxu1 %v10578_v40 }
 0xaf9   : > { %5710 = vmatpush3.msra.mxu1 %v9927_v25 }
 0xafa   : > { %5711 = vmatprep.subr.mxu1 %v10578_v40 }
 0xafb   : > { %4834 = vrot.lane.b32.xlu1 %v6097_v30, %s6177_s28  ;;  %5712 = vmatpush3.msra.mxu1 %v9922_v47 }
 0xafc   : > { %4617 = vrot.lane.b32.xlu0 %v6101_v8, %s6178_s16  ;;  %5713 = vmatprep.subr.mxu1 %v10578_v40 }
 0xafd   : > { %5714 = vmatpush3.msra.mxu1 %v9917_v51 }
 0xafe   : > { %5715 = vmatprep.subr.mxu1 %v10578_v40 }
 0xaff   : > { %4832 = vrot.lane.b32.xlu1 %v9949_v62, %s6177_s28  ;;  %5716 = vmatpush3.msra.mxu1 %v9973_v54 }
 0xb00   : > { %4615 = vrot.lane.b32.xlu0 %v6099_v14, %s6178_s16  ;;  %5717 = vmatprep.subr.mxu1 %v10578_v40  ;;  %v5242_v14 = vld [vmem:[%s10485_s9 + $0x88] sm:$0xff] }
 0xb01   : > { %5718 = vmatpush3.msra.mxu1 %v9963_v60 }
 0xb02   : > { %5719 = vmatprep.subr.mxu1 %v10578_v40 }
 0xb03   : > { %4830 = vrot.lane.b32.xlu1 %v9939_v56, %s6177_s28  ;;  %5720 = vmatpush3.msra.mxu1 %v9981_v50 }
 0xb04   : > { %4613 = vrot.lane.b32.xlu0 %v6097_v30, %s6178_s16  ;;  %5721 = vmatprep.subr.mxu1 %v10578_v40  ;;  %v5241_v30 = vld [vmem:[%s10485_s9 + $0x80] sm:$0xff] }
 0xb05   : > { %5722 = vmatpush3.msra.mxu1 %v9970_v55 }
 0xb06   : > { %5723 = vmatprep.subr.mxu1 %v10578_v40 }
 0xb07   : > { %4828 = vrot.lane.b32.xlu1 %v9932_v59, %s6177_s28  ;;  %5724 = vmatpush3.msra.mxu1 %v9990_v44 }
 0xb08   : > { %4611 = vrot.lane.b32.xlu0 %v9949_v62, %s6178_s16  ;;  %5726 = vmatmul.mubr.msk.f32.vlgmr.msra.gmra.mxu1 %vm4178_vm14, %v4167_v58  ;;  %v5245_v58 = vld [vmem:[%s10485_s9 + $0xa0] sm:$0xff] }
 0xb09   : > { %5728 = vmatprep.mubr.msk.f32.mxu1 %vm10693_vm4, %v10578_v40  ;;  %5821 = vmatprep.subr.mxu1 %v10578_v40 }
 0xb0b   : > { %4619 = vrot.lane.b32.xlu1 %v6105_v17, %s6178_s16 }
 0xb0c   : > { %4609 = vrot.lane.b32.xlu0 %v9939_v56, %s6178_s16  ;;  %5729 = vmatmul.mubr.msk.f32.gmra.mxu1 %vm4178_vm14, %v4168_v28  ;;  %v5258_v28 = vld [vmem:[%s10485_s9 + $0xb0] sm:$0xff] }
 0xb0d   : > { %5731 = vmatprep.mubr.msk.f32.mxu1 %vm10693_vm4, %v10578_v40 }
 0xb0f   : > { %4840 = vrot.lane.b32.xlu1 %v6105_v17, %s6177_s28 }
 0xb10   : > { %4607 = vrot.lane.b32.xlu0 %v9932_v59, %s6178_s16  ;;  %5732 = vmatmul.mubr.msk.f32.gmra.mxu1 %vm4178_vm14, %v4169_v27 }
 0xb11   : > { %5734 = vmatprep.mubr.msk.f32.mxu1 %vm10693_vm4, %v10578_v40 }
 0xb13   : > { %4826 = vrot.lane.b32.xlu1 %v9927_v25, %s6177_s28 }
 0xb14   : > { %4605 = vrot.lane.b32.xlu0 %v9927_v25, %s6178_s16  ;;  %5735 = vmatmul.mubr.msk.f32.gmra.mxu1 %vm4178_vm14, %v4170_v6  ;;  %v5246_v6 = vld [vmem:[%s10485_s9 + $0xa8] sm:$0xf] }
 0xb15   : > { %5737 = vmatprep.mubr.msk.f32.mxu1 %vm10693_vm4, %v10578_v40 }
 0xb17   : > { %4824 = vrot.lane.b32.xlu1 %v9922_v47, %s6177_s28 }
 0xb18   : > { %4603 = vrot.lane.b32.xlu0 %v9922_v47, %s6178_s16  ;;  %5738 = vmatmul.mubr.msk.f32.gmra.mxu1 %vm4178_vm14, %v4171_v11  ;;  %v4177_v47 = vld [vmem:[%s10485_s9 + $0x50] sm:$0xf] }
 0xb19   : > { %5740 = vmatprep.mubr.msk.f32.mxu1 %vm10693_vm4, %v10578_v40 }
 0xb1b   : > { %4822 = vrot.lane.b32.xlu1 %v9917_v51, %s6177_s28 }
 0xb1c   : > { %4601 = vrot.lane.b32.xlu0 %v9917_v51, %s6178_s16  ;;  %5741 = vmatmul.mubr.msk.f32.gmra.mxu1 %vm4178_vm14, %v4172_v43  ;;  %v4174_v51 = vld [vmem:[%s10485_s9 + $0x38] sm:$0xff] }
 0xb1d   : > { %5743 = vmatprep.mubr.msk.f32.mxu1 %vm10693_vm4, %v10578_v40  ;;  %v5259_v43 = vld [vmem:[%s10485_s9 + $0xb8] sm:$0xff] }
 0xb1f   : > { %4820 = vrot.lane.b32.xlu1 %v9973_v54, %s6177_s28 }
 0xb20   : > { %4599 = vrot.lane.b32.xlu0 %v9973_v54, %s6178_s16  ;;  %5744 = vmatmul.mubr.msk.f32.gmra.mxu1 %vm4178_vm14, %v4173_v53  ;;  %v5244_v54 = vld [vmem:[%s10485_s9 + $0x98] sm:$0xff]  ;;  %v5280_v53 = vld [vmem:[%s10485_s9 + $0x108] sm:$0xff] }
 0xb21   : > { %5746 = vmatprep.mubr.msk.f32.mxu1 %vm10693_vm4, %v10578_v40 }
 0xb23   : > { %4818 = vrot.lane.b32.xlu1 %v9963_v60, %s6177_s28 }
 0xb24   : > { %4597 = vrot.lane.b32.xlu0 %v9963_v60, %s6178_s16  ;;  %5747 = vmatmul.mubr.msk.f32.gmra.mxu1 %vm4178_vm14, %v4174_v51  ;;  %v5243_v60 = vld [vmem:[%s10485_s9 + $0x90] sm:$0xff]  ;;  %v5260_v51 = vld [vmem:[%s10485_s9 + $0xc0] sm:$0xff] }
 0xb25   : > { %5749 = vmatprep.mubr.msk.f32.mxu1 %vm10693_vm4, %v10578_v40 }
 0xb27   : > { %4816 = vrot.lane.b32.xlu1 %v9981_v50, %s6177_s28 }
 0xb28   : > { %4595 = vrot.lane.b32.xlu0 %v9981_v50, %s6178_s16  ;;  %5750 = vmatmul.mubr.msk.f32.gmra.mxu1 %vm4178_vm14, %v4175_v33  ;;  %v5281_v33 = vld [vmem:[%s10485_s9 + $0x110] sm:$0xff] }
 0xb29   : > { %5752 = vmatprep.mubr.msk.f32.mxu1 %vm10693_vm4, %v10578_v40 }
 0xb2b   : > { %4814 = vrot.lane.b32.xlu1 %v9970_v55, %s6177_s28 }
 0xb2c   : > { %4593 = vrot.lane.b32.xlu0 %v9970_v55, %s6178_s16  ;;  %5753 = vmatmul.mubr.msk.f32.gmra.mxu1 %vm4178_vm14, %v4176_v57  ;;  %v5261_v57 = vld [vmem:[%s10485_s9 + $0xc8] sm:$0xff] }
 0xb2d   : > { %5755 = vmatprep.mubr.msk.f32.mxu1 %vm10693_vm4, %v10578_v40 }
 0xb30   : > { %4591 = vrot.lane.b32.xlu0 %v9990_v44, %s6178_s16  ;;  %5756 = vmatmul.mubr.msk.f32.gmra.mxu1 %vm4178_vm14, %v4177_v47  ;;  %v5282_v47 = vld [vmem:[%s10485_s9 + $0x118] sm:$0xff] }
 0xb31   : > { %5851 = vmatprep.mubr.msk.f32.mxu1 %vm10693_vm4, %v10578_v40 }
 0xb34   : > { %4812 = vrot.lane.b32.xlu0 %v9990_v44, %s6177_s28 }
 0xb39   : > { %v4381_v45 = vpop.permute.xlu1 %4380 }
 0xb3d   : > { %v4383_v3 = vpop.permute.xlu0 %4382 }
 0xb41   : > { %v4385_v18 = vpop.permute.xlu1 %4384 }
 0xb45   : > { %v4387_v5 = vpop.permute.xlu0 %4386 }
 0xb49   : > { %v4389_v63 = vpop.permute.xlu1 %4388 }
 0xb4d   : > { %v4391_v25 = vpop.permute.xlu0 %4390 }
 0xb51   : > { %v4393_v26 = vpop.permute.xlu1 %4392 }
 0xb55   : > { %v4395_v32 = vpop.permute.xlu0 %4394 }
 0xb59   : > { %v4397_v46 = vpop.permute.xlu1 %4396 }
 0xb5d   : > { %v4377_v23 = vpop.permute.xlu1 %4376 }
 0xb5e   : > { %v4399_v34 = vpop.permute.xlu0 %4398 }
 0xb5f   : > { %5759 = vmatpush3.msra.mxu0 %v4399_v34  ;;  %v5267_v34 = vld [vmem:[%s10485_s9 + $0xf8] sm:$0xff] }
 0xb60   : > { %5760 = vmatprep.subr.mxu0 %v10578_v40 }
 0xb61   : > { %5761 = vmatpush3.msra.mxu0 %v4397_v46  ;;  %v4373_v0 = vpop.permute.xlu1 %4372  ;;  %v5286_v46 = vld [vmem:[%s10485_s9 + $0x138] sm:$0xff] }
 0xb62   : > { %v4379_v19 = vpop.permute.xlu0 %4378  ;;  %5762 = vmatprep.subr.mxu0 %v10578_v40 }
 0xb63   : > { %5763 = vmatpush3.msra.mxu0 %v4395_v32  ;;  %v5266_v32 = vld [vmem:[%s10485_s9 + $0xf0] sm:$0xff] }
 0xb64   : > { %5764 = vmatprep.subr.mxu0 %v10578_v40 }
 0xb65   : > { %5765 = vmatpush3.msra.mxu0 %v4393_v26  ;;  %v4839_v59 = vpop.permute.xlu1 %4838  ;;  %v5285_v26 = vld [vmem:[%s10485_s9 + $0x130] sm:$0xff] }
 0xb66   : > { %v4375_v52 = vpop.permute.xlu0 %4374  ;;  %5766 = vmatprep.subr.mxu0 %v10578_v40 }
 0xb67   : > { %5767 = vmatpush3.msra.mxu0 %v4391_v25  ;;  %v5265_v25 = vld [vmem:[%s10485_s9 + $0xe8] sm:$0xff] }
 0xb68   : > { %5768 = vmatprep.subr.mxu0 %v10578_v40 }
 0xb69   : > { %5769 = vmatpush3.msra.mxu0 %v4389_v63  ;;  %v4837_v2 = vpop.permute.xlu1 %4836  ;;  %v5284_v63 = vld [vmem:[%s10485_s9 + $0x128] sm:$0xff] }
 0xb6a   : > { %v4371_v20 = vpop.permute.xlu0 %4370  ;;  %5770 = vmatprep.subr.mxu0 %v10578_v40 }
 0xb6b   : > { %5771 = vmatpush3.msra.mxu0 %v4387_v5  ;;  %v5264_v5 = vld [vmem:[%s10485_s9 + $0xe0] sm:$0xff] }
 0xb6c   : > { %5772 = vmatprep.subr.mxu0 %v10578_v40 }
 0xb6d   : > { %5773 = vmatpush3.msra.mxu0 %v4385_v18  ;;  %v4835_v7 = vpop.permute.xlu1 %4834  ;;  %v5283_v18 = vld [vmem:[%s10485_s9 + $0x120] sm:$0xff] }
 0xb6e   : > { %v4618_v1 = vpop.permute.xlu0 %4617  ;;  %5774 = vmatprep.subr.mxu0 %v10578_v40 }
 0xb6f   : > { %5775 = vmatpush3.msra.mxu0 %v4383_v3  ;;  %v5263_v3 = vld [vmem:[%s10485_s9 + $0xd8] sm:$0xff] }
 0xb70   : > { %5776 = vmatprep.subr.mxu0 %v10578_v40 }
 0xb71   : > { %5777 = vmatpush3.msra.mxu0 %v4381_v45  ;;  %v4833_v37 = vpop.permute.xlu1 %4832  ;;  %v5262_v45 = vld [vmem:[%s10485_s9 + $0xd0] sm:$0xff] }
 0xb72   : > { %v4616_v31 = vpop.permute.xlu0 %4615  ;;  %5778 = vmatprep.subr.mxu0 %v10578_v40 }
 0xb73   : > { %5779 = vmatpush3.msra.mxu0 %v4379_v19 }
 0xb74   : > { %5780 = vmatprep.subr.mxu0 %v10578_v40 }
 0xb75   : > { %5781 = vmatpush3.msra.mxu0 %v4377_v23  ;;  %v4831_v61 = vpop.permute.xlu1 %4830  ;;  %v5287_v23 = vld [vmem:[%s10485_s9 + $0x140] sm:$0xff] }
 0xb76   : > { %v4614_v56 = vpop.permute.xlu0 %4613  ;;  %5782 = vmatprep.subr.mxu0 %v10578_v40 }
 0xb77   : > { %5783 = vmatpush3.msra.mxu0 %v4375_v52 }
 0xb78   : > { %5784 = vmatprep.subr.mxu0 %v10578_v40 }
 0xb79   : > { %5785 = vmatpush3.msra.mxu0 %v4373_v0  ;;  %v4829_v15 = vpop.permute.xlu1 %4828  ;;  %v5288_v0 = vld [vmem:[%s10485_s9 + $0x148] sm:$0xff] }
 0xb7a   : > { %v4612_v35 = vpop.permute.xlu0 %4611  ;;  %5786 = vmatprep.subr.mxu0 %v10578_v40 }
 0xb7b   : > { %5787 = vmatpush3.msra.mxu0 %v4371_v20 }
 0xb7c   : > { %5789 = vmatmul.mubr.msk.f32.vlgmr.msra.gmra.mxu0 %vm4178_vm14, %v5236_v12  ;;  %5884 = vmatprep.subr.mxu0 %v10578_v40 }
 0xb7d   : > { %v4620_v41 = vpop.permute.xlu1 %4619  ;;  %5791 = vmatprep.mubr.msk.f32.mxu0 %vm10693_vm4, %v10578_v40 }
 0xb7e   : > { %v4610_v10 = vpop.permute.xlu0 %4609  ;;  %5822 = vmatpush3.msra.mxu1 %v4620_v41 }
 0xb7f   : > { %5823 = vmatprep.subr.mxu1 %v10578_v40 }
 0xb80   : > { %5792 = vmatmul.mubr.msk.f32.gmra.mxu0 %vm4178_vm14, %v5237_v24  ;;  %5824 = vmatpush3.msra.mxu1 %v4618_v1  ;;  %v5290_v1 = vld [vmem:[%s10485_s9 + $0x158] sm:$0xf] }
 0xb81   : > { %5825 = vmatprep.subr.mxu1 %v10578_v40  ;;  %v4841_v22 = vpop.permute.xlu1 %4840  ;;  %5794 = vmatprep.mubr.msk.f32.mxu0 %vm10693_vm4, %v10578_v40 }
 0xb82   : > { %v4608_v62 = vpop.permute.xlu0 %4607  ;;  %5826 = vmatpush3.msra.mxu1 %v4616_v31  ;;  %5885 = vmatpush3.msra.mxu0 %v4841_v22 }
 0xb83   : > { %5827 = vmatprep.subr.mxu1 %v10578_v40  ;;  %5886 = vmatprep.subr.mxu0 %v10578_v40 }
 0xb84   : > { %5795 = vmatmul.mubr.msk.f32.gmra.mxu0 %vm4178_vm14, %v5238_v48  ;;  %5828 = vmatpush3.msra.mxu1 %v4614_v56 }
 0xb85   : > { %5887 = vmatpush3.msra.mxu0 %v4839_v59  ;;  %5829 = vmatprep.subr.mxu1 %v10578_v40  ;;  %v4827_v36 = vpop.permute.xlu1 %4826  ;;  %v5268_v59 = vld [vmem:[%s10485_s9 + $0x100] sm:$0xf] }
 0xb86   : > { %v4606_v16 = vpop.permute.xlu0 %4605  ;;  %5888 = vmatprep.subr.mxu0 %v10578_v40  ;;  %5797 = vmatprep.mubr.msk.f32.mxu0 %vm10693_vm4, %v10578_v40 }
 0xb87   : > { %5830 = vmatpush3.msra.mxu1 %v4612_v35  ;;  %5889 = vmatpush3.msra.mxu0 %v4837_v2  ;;  %v5289_v2 = vld [vmem:[%s10485_s9 + $0x150] sm:$0xff] }
 0xb88   : > { %5798 = vmatmul.mubr.msk.f32.gmra.mxu0 %vm4178_vm14, %v5239_v9  ;;  %5831 = vmatprep.subr.mxu1 %v10578_v40 }
 0xb89   : > { %5890 = vmatprep.subr.mxu0 %v10578_v40  ;;  %5832 = vmatpush3.msra.mxu1 %v4610_v10  ;;  %v4825_v49 = vpop.permute.xlu1 %4824 }
 0xb8a   : > { %5891 = vmatpush3.msra.mxu0 %v4835_v7  ;;  %v4604_v29 = vpop.permute.xlu0 %4603  ;;  %5833 = vmatprep.subr.mxu1 %v10578_v40 }
 0xb8b   : > { %5892 = vmatprep.subr.mxu0 %v10578_v40  ;;  %5800 = vmatprep.mubr.msk.f32.mxu0 %vm10693_vm4, %v10578_v40 }
 0xb8c   : > { %5834 = vmatpush3.msra.mxu1 %v4608_v62  ;;  %5893 = vmatpush3.msra.mxu0 %v4833_v37 }
 0xb8d   : > { %5801 = vmatmul.mubr.msk.f32.gmra.mxu0 %vm4178_vm14, %v5240_v42  ;;  %5835 = vmatprep.subr.mxu1 %v10578_v40  ;;  %v4823_v21 = vpop.permute.xlu1 %4822  ;;  %v5032_v42 = vld [vmem:[%s10487_s11] sm:$0xff] }
 0xb8e   : > { %5894 = vmatprep.subr.mxu0 %v10578_v40  ;;  %5836 = vmatpush3.msra.mxu1 %v4606_v16  ;;  %v4602_v4 = vpop.permute.xlu0 %4601 }
 0xb8f   : > { %5895 = vmatpush3.msra.mxu0 %v4831_v61  ;;  %5837 = vmatprep.subr.mxu1 %v10578_v40 }
 0xb90   : > { %5896 = vmatprep.subr.mxu0 %v10578_v40  ;;  %5803 = vmatprep.mubr.msk.f32.mxu0 %vm10693_vm4, %v10578_v40 }
 0xb91   : > { %5838 = vmatpush3.msra.mxu1 %v4604_v29  ;;  %5897 = vmatpush3.msra.mxu0 %v4829_v15  ;;  %v4821_v13 = vpop.permute.xlu1 %4820  ;;  %v4156_v29 = vld [vmem:[%s10486_s10] sm:$0xff] }
 0xb92   : > { %5804 = vmatmul.mubr.msk.f32.gmra.mxu0 %vm4178_vm14, %v5241_v30  ;;  %5839 = vmatprep.subr.mxu1 %v10578_v40  ;;  %v4600_v39 = vpop.permute.xlu0 %4599 }
 0xb93   : > { %5898 = vmatprep.subr.mxu0 %v10578_v40  ;;  %5840 = vmatpush3.msra.mxu1 %v4602_v4  ;;  %v4157_v4 = vld [vmem:[%s10486_s10 + $0x8] sm:$0xff] }
 0xb94   : > { %5899 = vmatpush3.msra.mxu0 %v4827_v36  ;;  %5841 = vmatprep.subr.mxu1 %v10578_v40 }
 0xb95   : > { %5900 = vmatprep.subr.mxu0 %v10578_v40  ;;  %5806 = vmatprep.mubr.msk.f32.mxu0 %vm10693_vm4, %v10578_v40  ;;  %v4819_v38 = vpop.permute.xlu1 %4818 }
 0xb96   : > { %5842 = vmatpush3.msra.mxu1 %v4600_v39  ;;  %5901 = vmatpush3.msra.mxu0 %v4825_v49  ;;  %v4598_v8 = vpop.permute.xlu0 %4597 }
 0xb97   : > { %5807 = vmatmul.mubr.msk.f32.gmra.mxu0 %vm4178_vm14, %v5242_v14  ;;  %5902 = vmatprep.subr.mxu0 %v10578_v40 }
 0xb98   : > { %5903 = vmatpush3.msra.mxu0 %v4823_v21  ;;  %5843 = vmatprep.subr.mxu1 %v10578_v40 }
 0xb99   : > { %5904 = vmatprep.subr.mxu0 %v10578_v40  ;;  %5809 = vmatprep.mubr.msk.f32.mxu0 %vm10693_vm4, %v10578_v40  ;;  %v4817_v17 = vpop.permute.xlu1 %4816 }
 0xb9a   : > { %5844 = vmatpush3.msra.mxu1 %v4598_v8  ;;  %5905 = vmatpush3.msra.mxu0 %v4821_v13  ;;  %v4596_v55 = vpop.permute.xlu0 %4595 }
 0xb9b   : > { %5810 = vmatmul.mubr.msk.f32.gmra.mxu0 %vm4178_vm14, %v5243_v60  ;;  %5906 = vmatprep.subr.mxu0 %v10578_v40 }
 0xb9c   : > { %5907 = vmatpush3.msra.mxu0 %v4819_v38  ;;  %5845 = vmatprep.subr.mxu1 %v10578_v40  ;;  %v4158_v38 = vld [vmem:[%s10486_s10 + $0x10] sm:$0xff] }
 0xb9d   : > { %5908 = vmatprep.subr.mxu0 %v10578_v40  ;;  %5812 = vmatprep.mubr.msk.f32.mxu0 %vm10693_vm4, %v10578_v40  ;;  %v4815_v44 = vpop.permute.xlu1 %4814 }
 0xb9e   : > { %5846 = vmatpush3.msra.mxu1 %v4596_v55  ;;  %5909 = vmatpush3.msra.mxu0 %v4817_v17  ;;  %v4594_v50 = vpop.permute.xlu0 %4593 }
 0xb9f   : > { %5813 = vmatmul.mubr.msk.f32.gmra.mxu0 %vm4178_vm14, %v5244_v54  ;;  %5847 = vmatprep.subr.mxu1 %v10578_v40  ;;  %v4159_v54 = vld [vmem:[%s10486_s10 + $0x18] sm:$0xff] }
 0xba0   : > { %5910 = vmatprep.subr.mxu0 %v10578_v40  ;;  %5815 = vmatprep.mubr.msk.f32.mxu0 %vm10693_vm4, %v10578_v40 }
 0xba1   : > { %5848 = vmatpush3.msra.mxu1 %v4594_v50  ;;  %5911 = vmatpush3.msra.mxu0 %v4815_v44 }
 0xba2   : > { %v4592_v27 = vpop.permute.xlu0 %4591  ;;  %5849 = vmatprep.subr.mxu1 %v10578_v40  ;;  %5912 = vmatprep.subr.mxu0 %v10578_v40 }
 0xba3   : > { %5816 = vmatmul.mubr.msk.f32.gmra.mxu0 %vm4178_vm14, %v5245_v58  ;;  %5850 = vmatpush3.msra.mxu1 %v4592_v27  ;;  %v4160_v27 = vld [vmem:[%s10486_s10 + $0x20] sm:$0xff] }
 0xba4   : > { %5818 = vmatprep.mubr.msk.f32.mxu0 %vm10693_vm4, %v10578_v40  ;;  %5852 = vmatmul.mubr.msk.f32.vlgmr.msra.gmra.mxu1 %vm4178_vm14, %v5258_v28 }
 0xba5   : > { %5854 = vmatprep.mubr.msk.f32.mxu1 %vm10693_vm4, %v10578_v40 }
 0xba6   : > { %v4813_v11 = vpop.permute.xlu0 %4812 }
 0xba7   : > { %5819 = vmatmul.mubr.msk.f32.gmra.mxu0 %vm4178_vm14, %v5246_v6 }
 0xba8   : > { %5913 = vmatpush3.msra.mxu0 %v4813_v11  ;;  %5914 = vmatprep.mubr.msk.f32.mxu0 %vm10693_vm4, %v10578_v40 }
 0xba9   : > { %5855 = vmatmul.mubr.msk.f32.gmra.mxu1 %vm4178_vm14, %v5259_v43 }
 0xbaa   : > { %5857 = vmatprep.mubr.msk.f32.mxu1 %vm10693_vm4, %v10578_v40 }
 0xbab   : > { %5915 = vmatmul.mubr.msk.f32.vlgmr.msra.gmra.mxu0 %vm4178_vm14, %v5280_v53 }
 0xbac   : > { %5917 = vmatprep.mubr.msk.f32.mxu0 %vm10693_vm4, %v10578_v40 }
 0xbad   : > { %5858 = vmatmul.mubr.msk.f32.gmra.mxu1 %vm4178_vm14, %v5260_v51  ;;  %v4161_v51 = vld [vmem:[%s10486_s10 + $0x28] sm:$0xff] }
 0xbae   : > { %5860 = vmatprep.mubr.msk.f32.mxu1 %vm10693_vm4, %v10578_v40 }
 0xbaf   : > { %5918 = vmatmul.mubr.msk.f32.gmra.mxu0 %vm4178_vm14, %v5281_v33 }
 0xbb0   : > { %5920 = vmatprep.mubr.msk.f32.mxu0 %vm10693_vm4, %v10578_v40 }
 0xbb1   : > { %5861 = vmatmul.mubr.msk.f32.gmra.mxu1 %vm4178_vm14, %v5261_v57 }
 0xbb2   : > { %5863 = vmatprep.mubr.msk.f32.mxu1 %vm10693_vm4, %v10578_v40 }
 0xbb3   : > { %5921 = vmatmul.mubr.msk.f32.gmra.mxu0 %vm4178_vm14, %v5282_v47 }
 0xbb4   : > { %5923 = vmatprep.mubr.msk.f32.mxu0 %vm10693_vm4, %v10578_v40 }
 0xbb5   : > { %5864 = vmatmul.mubr.msk.f32.gmra.mxu1 %vm4178_vm14, %v5262_v45 }
 0xbb6   : > { %5866 = vmatprep.mubr.msk.f32.mxu1 %vm10693_vm4, %v10578_v40 }
 0xbb7   : > { %5924 = vmatmul.mubr.msk.f32.gmra.mxu0 %vm4178_vm14, %v5283_v18  ;;  %v4162_v18 = vld [vmem:[%s10486_s10 + $0x30] sm:$0xff] }
 0xbb8   : > { %5926 = vmatprep.mubr.msk.f32.mxu0 %vm10693_vm4, %v10578_v40 }
 0xbb9   : > { %5867 = vmatmul.mubr.msk.f32.gmra.mxu1 %vm4178_vm14, %v5263_v3 }
 0xbba   : > { %5869 = vmatprep.mubr.msk.f32.mxu1 %vm10693_vm4, %v10578_v40 }
 0xbbb   : > { %5927 = vmatmul.mubr.msk.f32.gmra.mxu0 %vm4178_vm14, %v5284_v63 }
 0xbbc   : > { %5929 = vmatprep.mubr.msk.f32.mxu0 %vm10693_vm4, %v10578_v40 }
 0xbbd   : > { %5870 = vmatmul.mubr.msk.f32.gmra.mxu1 %vm4178_vm14, %v5264_v5 }
 0xbbe   : > { %5872 = vmatprep.mubr.msk.f32.mxu1 %vm10693_vm4, %v10578_v40 }
 0xbbf   : > { %5930 = vmatmul.mubr.msk.f32.gmra.mxu0 %vm4178_vm14, %v5285_v26 }
 0xbc0   : > { %5932 = vmatprep.mubr.msk.f32.mxu0 %vm10693_vm4, %v10578_v40 }
 0xbc1   : > { %5873 = vmatmul.mubr.msk.f32.gmra.mxu1 %vm4178_vm14, %v5265_v25 }
 0xbc2   : > { %5875 = vmatprep.mubr.msk.f32.mxu1 %vm10693_vm4, %v10578_v40 }
 0xbc3   : > { %5933 = vmatmul.mubr.msk.f32.gmra.mxu0 %vm4178_vm14, %v5286_v46 }
 0xbc4   : > { %5935 = vmatprep.mubr.msk.f32.mxu0 %vm10693_vm4, %v10578_v40 }
 0xbc5   : > { %5876 = vmatmul.mubr.msk.f32.gmra.mxu1 %vm4178_vm14, %v5266_v32 }
 0xbc6   : > { %5878 = vmatprep.mubr.msk.f32.mxu1 %vm10693_vm4, %v10578_v40 }
 0xbc7   : > { %5936 = vmatmul.mubr.msk.f32.gmra.mxu0 %vm4178_vm14, %v5287_v23 }
 0xbc8   : > { %5938 = vmatprep.mubr.msk.f32.mxu0 %vm10693_vm4, %v10578_v40  ;;  %v4278_v19 = vpop.f32.mrf.mxu1 }
 0xbc9   : > { %5879 = vmatmul.mubr.msk.f32.gmra.mxu1 %vm4178_vm14, %v5267_v34  ;;  %v4332_v21 = vadd.f32 %v4278_v19, %v4156_v29 }
 0xbca   : > { %5881 = vmatprep.mubr.msk.f32.mxu1 %vm10693_vm4, %v10578_v40  ;;  %v5727_v52 = vpop.f32.mrf.mxu1 }
 0xbcb   : > { %5939 = vmatmul.mubr.msk.f32.gmra.mxu0 %vm4178_vm14, %v5288_v0 }
 0xbcc   : > { %5941 = vmatprep.mubr.msk.f32.mxu0 %vm10693_vm4, %v10578_v40  ;;  %v4283_v20 = vpop.f32.mrf.mxu1 }
 0xbcd   : > { %5882 = vmatmul.mubr.msk.f32.gmra.mxu1 %vm4178_vm14, %v5268_v59  ;;  %v4333_v13 = vadd.f32 %v4283_v20, %v4157_v4 }
 0xbce   : > { %v5730_v7 = vpop.f32.mrf.mxu1 }
 0xbcf   : > { %5942 = vmatmul.mubr.msk.f32.gmra.mxu0 %vm4178_vm14, %v5289_v2 }
 0xbd0   : > { %5944 = vmatprep.mubr.msk.f32.mxu0 %vm10693_vm4, %v10578_v40  ;;  %v4288_v37 = vpop.f32.mrf.mxu1  ;;  %vm5036_vm4 = vcmask 687104  }
 0xbd1   : > { %5969 = vmatprep.mubr.msk.f32.mxu1 %vm5036_vm4, %v5032_v42  ;;  %v4334_v60 = vadd.f32 %v4288_v37, %v4158_v38 }
 0xbd2   : > { %v5733_v31 = vpop.f32.mrf.mxu1 }
 0xbd3   : > { %5945 = vmatmul.mubr.msk.f32.gmra.mxu0 %vm4178_vm14, %v5290_v1 }
 0xbd4   : > { %v4293_v61 = vpop.f32.mrf.mxu1 }
 0xbd5   : > { %v4335_v44 = vadd.f32 %v4293_v61, %v4159_v54 }
 0xbd6   : > { %v5736_v56 = vpop.f32.mrf.mxu1 }
 0xbd8   : > { %v4298_v15 = vpop.f32.mrf.mxu1 }
 0xbd9   : > { %v4336_v43 = vadd.f32 %v4298_v15, %v4160_v27 }
 0xbda   : > { %v5739_v12 = vpop.f32.mrf.mxu1 }
 0xbdc   : > { %v4303_v35 = vpop.f32.mrf.mxu1 }
 0xbdd   : > { %v4337_v47 = vadd.f32 %v4303_v35, %v4161_v51 }
 0xbde   : > { %v5742_v41 = vpop.f32.mrf.mxu1 }
 0xbe0   : > { %v4308_v24 = vpop.f32.mrf.mxu1 }
 0xbe1   : > { %v4338_v5 = vadd.f32 %v4308_v24, %v4162_v18 }
 0xbe2   : > { %v5745_v10 = vpop.f32.mrf.mxu1 }
 0xbe4   : > { %v10366_v22 = vpop.f32.mrf.mxu1 }
 0xbe6   : > { %v5748_v48 = vpop.f32.mrf.mxu1 }
 0xbe8   : > { %v10368_v40 = vpop.f32.mrf.mxu1 }
 0xbea   : > { %v5751_v62 = vpop.f32.mrf.mxu1 }
 0xbec   : > { %v10370_v36 = vpop.f32.mrf.mxu1 }
 0xbee   : > { %v5754_v9 = vpop.f32.mrf.mxu1 }
 0xbf0   : > { %v10372_v16 = vpop.f32.mrf.mxu1 }
 0xbf2   : > { %v5757_v49 = vpop.f32.mrf.mxu1 }
 0xc3c   : > { %v4514_v30 = vpop.f32.mrf.mxu0 }
 0xc3d   : > { %v4568_v39 = vadd.f32 %v4514_v30, %v4332_v21 }
 0xc3e   : > { %v5790_v14 = vpop.f32.mrf.mxu0 }
 0xc40   : > { %v4519_v8 = vpop.f32.mrf.mxu0 }
 0xc41   : > { %v10387_v17 = vadd.f32 %v4519_v8, %v4333_v13 }
 0xc42   : > { %v5793_v55 = vpop.f32.mrf.mxu0 }
 0xc44   : > { %v4524_v50 = vpop.f32.mrf.mxu0 }
 0xc45   : > { %v10392_v58 = vadd.f32 %v4524_v50, %v4334_v60 }
 0xc46   : > { %v5796_v28 = vpop.f32.mrf.mxu0 }
 0xc48   : > { %v4529_v6 = vpop.f32.mrf.mxu0 }
 0xc49   : > { %v10397_v11 = vadd.f32 %v4529_v6, %v4335_v44 }
 0xc4a   : > { %v5799_v53 = vpop.f32.mrf.mxu0 }
 0xc4b   : > { %v4166_v53 = vld [vmem:[%s10486_s10 + $0x50] sm:$0xf] }
 0xc4d   : > { %v4534_v33 = vpop.f32.mrf.mxu0 }
 0xc4e   : > { %v10402_v57 = vadd.f32 %v4534_v33, %v4336_v43  ;;  %v4165_v43 = vld [vmem:[%s10486_s10 + $0x48] sm:$0xff] }
 0xc4f   : > { %v5802_v45 = vpop.f32.mrf.mxu0 }
 0xc52   : > { %v4539_v3 = vpop.f32.mrf.mxu0 }
 0xc53   : > { %v10407_v63 = vadd.f32 %v4539_v3, %v4337_v47  ;;  %v4164_v47 = vld [vmem:[%s10486_s10 + $0x40] sm:$0xff]  ;;  %v4341_v3 = vadd.f32 %v10370_v36, %v4165_v43 }
 0xc54   : > { %v5805_v26 = vpop.f32.mrf.mxu0 }
 0xc55   : > { %v4163_v26 = vld [vmem:[%s10486_s10 + $0x38] sm:$0xff] }
 0xc57   : > { %v4544_v25 = vpop.f32.mrf.mxu0 }
 0xc58   : > { %v10409_v46 = vadd.f32 %v4544_v25, %v4338_v5  ;;  %v4342_v5 = vadd.f32 %v10372_v16, %v4166_v53 }
 0xc59   : > { %v5808_v32 = vpop.f32.mrf.mxu0 }
 0xc5b   : > { %v10411_v23 = vpop.f32.mrf.mxu0 }
 0xc5d   : > { %v5811_v34 = vpop.f32.mrf.mxu0 }
 0xc5e   : > { %v4340_v34 = vadd.f32 %v10368_v40, %v4164_v47 }
 0xc5f   : > { %v4554_v0 = vpop.f32.mrf.mxu0 }
 0xc61   : > { %v5814_v19 = vpop.f32.mrf.mxu0 }
 0xc63   : > { %v4559_v59 = vpop.f32.mrf.mxu0 }
 0xc64   : > { %v4735_v52 = vpop.f32.mrf.mxu1 }
 0xc65   : > { %v5817_v2 = vpop.f32.mrf.mxu0  ;;  %v10413_v20 = vadd.f32 %v4735_v52, %v4568_v39 }
 0xc66   : > { %v5853_v7 = vpop.f32.mrf.mxu1  ;;  %v4339_v2 = vadd.f32 %v10366_v22, %v4163_v26 }
 0xc67   : > { %v4564_v1 = vpop.f32.mrf.mxu0  ;;  %v4577_v7 = vadd.f32 %v4559_v59, %v4341_v3 }
 0xc68   : > { %v4575_v16 = vadd.f32 %v10411_v23, %v4339_v2 }
 0xc69   : > { %v5820_v37 = vpop.f32.mrf.mxu0  ;;  %v10415_v31 = vpop.f32.mrf.mxu1 }
 0xc6a   : > { %v4578_v37 = vadd.f32 %v4564_v1, %v4342_v5 }
 0xc6b   : > { %v10417_v61 = vpop.f32.mrf.mxu0  ;;  %v5856_v56 = vpop.f32.mrf.mxu1 }
 0xc6d   : > { %v5916_v15 = vpop.f32.mrf.mxu0  ;;  %v10419_v12 = vpop.f32.mrf.mxu1 }
 0xc6e   : > { %v4576_v15 = vadd.f32 %v4554_v0, %v4340_v34 }
 0xc6f   : > { %v10421_v35 = vpop.f32.mrf.mxu0  ;;  %v5859_v41 = vpop.f32.mrf.mxu1 }
 0xc71   : > { %v5919_v24 = vpop.f32.mrf.mxu0  ;;  %v10423_v10 = vpop.f32.mrf.mxu1 }
 0xc72   : > { %v4792_v23 = vadd.f32 %v10423_v10, %v10397_v11 }
 0xc73   : > { %v10425_v48 = vpop.f32.mrf.mxu0  ;;  %v5862_v62 = vpop.f32.mrf.mxu1 }
 0xc75   : > { %v5922_v9 = vpop.f32.mrf.mxu0  ;;  %v4755_v49 = vpop.f32.mrf.mxu1 }
 0xc76   : > { %v4793_v0 = vadd.f32 %v4755_v49, %v10402_v57 }
 0xc77   : > { %v4971_v29 = vpop.f32.mrf.mxu0  ;;  %v5865_v42 = vpop.f32.mrf.mxu1 }
 0xc79   : > { %v5925_v21 = vpop.f32.mrf.mxu0  ;;  %v4760_v4 = vpop.f32.mrf.mxu1 }
 0xc7a   : > { %v4794_v22 = vadd.f32 %v4760_v4, %v10407_v63 }
 0xc7b   : > { %v4976_v30 = vpop.f32.mrf.mxu0  ;;  %v5868_v13 = vpop.f32.mrf.mxu1 }
 0xc7d   : > { %v5928_v39 = vpop.f32.mrf.mxu0  ;;  %v4765_v14 = vpop.f32.mrf.mxu1 }
 0xc7e   : > { %v4795_v40 = vadd.f32 %v4765_v14, %v10409_v46  ;;  %v4790_v46 = vadd.f32 %v10415_v31, %v10387_v17 }
 0xc7f   : > { %v4981_v38 = vpop.f32.mrf.mxu0  ;;  %v5871_v8 = vpop.f32.mrf.mxu1 }
 0xc80   : > { %v5015_v1 = vadd.f32 %v4981_v38, %v4794_v22  ;;  %v5011_v57 = vadd.f32 %v10421_v35, %v4790_v46  ;;  %v5034_v38 = vld [vmem:[%s10488_s12] sm:$0xff] }
 0xc81   : > { %v5931_v60 = vpop.f32.mrf.mxu0  ;;  %v4770_v55 = vpop.f32.mrf.mxu1 }
 0xc82   : > { %v4796_v13 = vadd.f32 %v4770_v55, %v4575_v16  ;;  %v5014_v60 = vadd.f32 %v4976_v30, %v4793_v0  ;;  %v4791_v55 = vadd.f32 %v10419_v12, %v10392_v58  ;;  %v5010_v58 = vadd.f32 %v10417_v61, %v10413_v20  ;;  %v5035_v30 = vld [vmem:[%s10488_s12 + $0x8] sm:$0x3] }
 0xc83   : > { %v4986_v54 = vpop.f32.mrf.mxu0  ;;  %v5874_v50 = vpop.f32.mrf.mxu1 }
 0xc84   : > { %v5016_v59 = vadd.f32 %v4986_v54, %v4795_v40  ;;  %v5013_v50 = vadd.f32 %v4971_v29, %v4792_v23  ;;  %v5012_v63 = vadd.f32 %v10425_v48, %v4791_v55  ;;  %v5033_v29 = vld [vmem:[%s10487_s11 + $0x8] sm:$0x3] }
 0xc85   : > { %v5934_v44 = vpop.f32.mrf.mxu0  ;;  %v4775_v28 = vpop.f32.mrf.mxu1 }
 0xc86   : > { %v4797_v62 = vadd.f32 %v4775_v28, %v4576_v15 }
 0xc87   : > { %v4991_v27 = vpop.f32.mrf.mxu0  ;;  %v5877_v6 = vpop.f32.mrf.mxu1 }
 0xc88   : > { %v5017_v8 = vadd.f32 %v4991_v27, %v4796_v13 }
 0xc89   : > { %v5937_v51 = vpop.f32.mrf.mxu0  ;;  %v4780_v33 = vpop.f32.mrf.mxu1 }
 0xc8a   : > { %v4798_v41 = vadd.f32 %v4780_v33, %v4577_v7 }
 0xc8b   : > { %v4996_v45 = vpop.f32.mrf.mxu0  ;;  %v5880_v18 = vpop.f32.mrf.mxu1 }
 0xc8c   : > { %v5018_v39 = vadd.f32 %v4996_v45, %v4797_v62 }
 0xc8d   : > { %v5940_v25 = vpop.f32.mrf.mxu0  ;;  %v4785_v32 = vpop.f32.mrf.mxu1 }
 0xc8e   : > { %v4799_v36 = vadd.f32 %v4785_v32, %v4578_v37 }
 0xc8f   : > { %v5001_v19 = vpop.f32.mrf.mxu0  ;;  %v5883_v52 = vpop.f32.mrf.mxu1 }
 0xc90   : > { %v5019_v9 = vadd.f32 %v5001_v19, %v4798_v41 }
 0xc91   : > { %v5943_v56 = vpop.f32.mrf.mxu0 }
 0xc93   : > { %v5006_v24 = vpop.f32.mrf.mxu0 }
 0xc94   : > { %v5020_v42 = vadd.f32 %v5006_v24, %v4799_v36 }
 0xc95   : > { %v5946_v21 = vpop.f32.mrf.mxu0 }
 0xc96   : > { %6114 = vtanh.f32 %v5020_v42 }
 0xc97   : > { %6116 = vtanh.f32 %v5019_v9 }
 0xc98   : > { %6118 = vtanh.f32 %v5018_v39 }
 0xc99   : > { %6120 = vtanh.f32 %v5017_v8 }
 0xc9a   : > { %6122 = vtanh.f32 %v5016_v59 }
 0xc9b   : > { %6124 = vtanh.f32 %v5015_v1 }
 0xc9c   : > { %6126 = vtanh.f32 %v5014_v60 }
 0xc9d   : > { %6128 = vtanh.f32 %v5013_v50 }
 0xc9e   : > { %6130 = vtanh.f32 %v5012_v63 }
 0xc9f   : > { %6132 = vtanh.f32 %v5011_v57 }
 0xca0   : > { %6134 = vtanh.f32 %v5010_v58 }
 0xca3   : > { %v6115_v4 = vpop.eup %6114 }
 0xca4   : > { %5947 = vmatprep.subr.msk.mxu1 %vm1108_vm10, %v6115_v4  ;;  %v6117_v11 = vpop.eup %6116 }
 0xca5   : > { %5948 = vmatpush3.msk.msra.mxu1 %vm1108_vm10, %v6115_v4  ;;  %v6119_v12 = vpop.eup %6118  ;;  %vm5123_vm10 = vcmask 1024  }
 0xca6   : > { %5949 = vmatprep.subr.mxu1 %v6117_v11  ;;  %v6121_v17 = vpop.eup %6120 }
 0xca7   : > { %5950 = vmatpush3.msra.mxu1 %v6117_v11  ;;  %v6123_v31 = vpop.eup %6122 }
 0xca8   : > { %5951 = vmatprep.subr.mxu1 %v6119_v12  ;;  %v6125_v35 = vpop.eup %6124 }
 0xca9   : > { %5952 = vmatpush3.msra.mxu1 %v6119_v12  ;;  %v6127_v10 = vpop.eup %6126 }
 0xcaa   : > { %5953 = vmatprep.subr.mxu1 %v6121_v17  ;;  %v6129_v20 = vpop.eup %6128 }
 0xcab   : > { %5954 = vmatpush3.msra.mxu1 %v6121_v17  ;;  %v6131_v61 = vpop.eup %6130 }
 0xcac   : > { %5955 = vmatprep.subr.mxu1 %v6123_v31  ;;  %v6133_v48 = vpop.eup %6132 }
 0xcad   : > { %5956 = vmatpush3.msra.mxu1 %v6123_v31  ;;  %v6135_v49 = vpop.eup %6134 }
 0xcae   : > { %5957 = vmatprep.subr.mxu1 %v6125_v35 }
 0xcaf   : > { %5958 = vmatpush3.msra.mxu1 %v6125_v35 }
 0xcb0   : > { %5959 = vmatprep.subr.mxu1 %v6127_v10 }
 0xcb1   : > { %5960 = vmatpush3.msra.mxu1 %v6127_v10 }
 0xcb2   : > { %5961 = vmatprep.subr.mxu1 %v6129_v20 }
 0xcb3   : > { %5962 = vmatpush3.msra.mxu1 %v6129_v20 }
 0xcb4   : > { %5963 = vmatprep.subr.mxu1 %v6131_v61 }
 0xcb5   : > { %5964 = vmatpush3.msra.mxu1 %v6131_v61 }
 0xcb6   : > { %5965 = vmatprep.subr.mxu1 %v6133_v48 }
 0xcb7   : > { %5966 = vmatpush3.msra.mxu1 %v6133_v48 }
 0xcb8   : > { %5967 = vmatprep.subr.mxu1 %v6135_v49 }
 0xcb9   : > { %5968 = vmatpush3.msra.mxu1 %v6135_v49 }
 0xcba   : > { %5970 = vmatmul.mubr.msk.f32.vlgmr.msra.gmra.mxu1 %vm5036_vm4, %v5033_v29 }
 0xd7a   : > { %v5971_v14 = vpop.f32.mrf.mxu1 }
 0xd7b   : > { %v5118_v54 = vadd.f32 %v5971_v14, %v5035_v30 }
 0xd7c   : > { %v5112_v44 = vpop.f32.mrf.mxu1 }
 0xd7d   : > { %5124 = vst.msk [vmem:[%s437_s14 + $0x8] sm:$0x3] %vm5123_vm10, %v5118_v54  ;;  %v5113_v28 = vadd.f32 %v5112_v44, %v5034_v38 }
 0xd7f   : > { %5122 = vst.msk [vmem:[%s437_s14] sm:$0xff] %vm5121_vm3, %v5113_v28 }
 0xd80 PF: > { %s23_s25 = sadd.s32 1, %s6142_s25  }
 0xd81   : > { %p20_p4 = scmp.ge.s32.totalorder %s23_s25, 4  }
 0xd83   :  { %22 = sbr.rel (!%p20_p4) target bundleno = 1 (0x1), region = 105 }

</bundles_post_ra>
